<compile_context>
chip_gen: v7x
topology: tpu7x:2x2x1
jax: 0.10.0
libtpu: 0.0.40
codegen_flags: <defaults>
</compile_context>

<pallas_src>
import math

import jax
import jax.numpy as jnp
from jax.experimental import pallas as pl
from jax.experimental.pallas import tpu as pltpu


# ----------------------------- model configuration -----------------------------
D_IN = 3
D_OUT = 9
D_HIDDEN = 64
N_LAYERS = 8
SKIP_IN = (4,)
MULTIRES = 6
SCALE = 1.0

NUM_LAYERS = N_LAYERS + 2                       # len(dims)
EMBED_DIM = D_IN * 2 * MULTIRES + D_IN          # 39 for d_in=3, multires=6
SINCOS_DIM = D_IN * MULTIRES                    # 18
FREQS = tuple(float(2.0 ** k) for k in range(MULTIRES))   # 2**linspace(0, multires-1)
INV_SQRT2 = float(1.0 / math.sqrt(2.0))
SKIP_H = D_HIDDEN - EMBED_DIM                   # 25 hidden rows feeding the skip layer
STACKED = (1, 2, 5, 6, 7)                       # the plain (64,64) hidden layers

# Feature-major embedding-scratch layout (every region starts at a sublane-aligned
# offset so all stores are phase-0; pad rows carry 0/1 and the matching weight columns
# are zero, so the merged dots are exact):
#   rows [0, 3)            : x                         rows [3, 8)        : 0
#   rows [8 + 8i, 14 + 8i) : sin(f_k * x_i), k=0..5    rows [14+8i,16+8i) : sin(0)=0
#   rows [32 + 8i, 38 + 8i): cos(f_k * x_i), k=0..5    rows [38+8i,40+8i) : cos(0)=1
SIN_OFF = 8
COS_OFF = 32
EMB_PAD = 56


def _layer_dims():
    """[(in_dim, out_dim)] for each of the num_layers-1 linear layers."""
    dims = [EMBED_DIM] + [D_HIDDEN] * N_LAYERS + [D_OUT]
    layers = []
    for l in range(NUM_LAYERS - 1):
        out_dim = dims[l + 1] - dims[0] if (l + 1) in SKIP_IN else dims[l + 1]
        layers.append((dims[l], out_dim))
    return layers


def _softplus(x):
    # nn.Softplus(beta=1, threshold=20). In f32 the dead branch of the where is at
    # worst +inf (never NaN), so no extra clamp is needed.
    return jnp.where(x > 20.0, x, jnp.log1p(jnp.exp(x)))


def _round_up(a, b):
    return ((a + b - 1) // b) * b


# --------------------------------- Pallas kernel --------------------------------
def _sdf_kernel(x_ref, fcol_ref,
                w0_ref, b0_ref,
                wstack_ref, bstack_ref,
                w3_ref, b3_ref,
                w4h_ref, w4e_ref, b4_ref,
                w8_ref, b8_ref,
                out_ref, emb_sc):
    """Feature-major fused SDF MLP.  x_ref: (D_IN, T); out_ref: (D_OUT, T)."""
    f32 = jnp.float32
    T = x_ref.shape[-1]

    x = x_ref[...].astype(f32)                                   # (3, T)
    fcol = fcol_ref[...]                                         # (8, 1): [f0..f5, 0, 0] (scale folded)

    # ---- positional embedding into the merged, 8-aligned scratch ----
    emb_sc[0:SIN_OFF, :] = jnp.zeros((SIN_OFF, T), f32)          # keep x-pad rows finite (zero weights)
    emb_sc[0:D_IN, :] = x
    for i in range(D_IN):
        # exact on the VPU: frequencies are powers of two
        zi = fcol * jnp.broadcast_to(x[i:i + 1, :], (8, T))      # (8, T), rows k = f_k * x_i
        emb_sc[SIN_OFF + 8 * i: SIN_OFF + 8 * (i + 1), :] = jnp.sin(zi)   # unmasked 8-row store
        emb_sc[COS_OFF + 8 * i: COS_OFF + 8 * (i + 1), :] = jnp.cos(zi)   # pad rows = cos(0) = 1
    emb = emb_sc[...]                                            # (EMB_PAD, T)

    def mm(w, h):
        # cast activation to the weight dtype (no-op for f32; bf16 path for v6e/v7x)
        return jnp.dot(w, h.astype(w.dtype), preferred_element_type=f32)

    # layer 0: single K=EMB_PAD dot (x / sin / cos weight blocks merged at pack time)
    h = _softplus(mm(w0_ref[...], emb) + b0_ref[...])
    # layers 1..3
    h = _softplus(mm(wstack_ref[0], h) + bstack_ref[0])
    h = _softplus(mm(wstack_ref[1], h) + bstack_ref[1])
    h = _softplus(mm(w3_ref[...], h) + b3_ref[...])              # (25, T)
    # layer 4 (skip): cat([h, emb]) / sqrt(2); the 1/sqrt(2) is folded into the weights
    h = _softplus(mm(w4h_ref[...], h) + mm(w4e_ref[...], emb) + b4_ref[...])
    # layers 5..7
    h = _softplus(mm(wstack_ref[2], h) + bstack_ref[2])
    h = _softplus(mm(wstack_ref[3], h) + bstack_ref[3])
    h = _softplus(mm(wstack_ref[4], h) + bstack_ref[4])
    # final linear (no activation)
    out_ref[...] = (mm(w8_ref[...], h) + b8_ref[...]).astype(out_ref.dtype)


# ----------------------------- parameter repacking ------------------------------
def _emb_weight_cols(w, scale):
    """w: (EMBED_DIM, dout) torch-layout rows [x, sin f0, cos f0, sin f1, cos f1, ...].
    Returns a (dout, EMB_PAD) feature-major weight whose columns match the kernel's
    embedding-scratch layout (zero columns over the pad rows), scaled by `scale`."""
    dout = w.shape[1]
    cols = jnp.zeros((EMB_PAD, dout), jnp.float32)
    cols = cols.at[0:D_IN].set(w[0:D_IN] * jnp.float32(SCALE))   # fold inputs*scale into x cols
    for i in range(D_IN):
        for k in range(MULTIRES):
            cols = cols.at[SIN_OFF + 8 * i + k].set(w[D_IN + 2 * D_IN * k + i])
            cols = cols.at[COS_OFF + 8 * i + k].set(w[2 * D_IN + 2 * D_IN * k + i])
    return (cols * jnp.float32(scale)).T


def pack_params(params, *, dot_dtype=jnp.float32):
    """Convert torch-layout params [(W (din,dout), b (1,dout))] into the feature-major
    kernel inputs: merged/zero-padded embedding weights for layers 0 and 4 (with the
    skip-layer 1/sqrt(2) folded in), stacked (64,64) hidden weights, f32 biases."""
    wd = dot_dtype
    col = lambda b: jnp.reshape(b, (-1, 1)).astype(jnp.float32)

    # frequency column for the in-kernel embedding (scale folded; pad entries = 0)
    fcol = jnp.asarray(list(FREQS) + [0.0, 0.0], jnp.float32).reshape(8, 1) * jnp.float32(SCALE)

    out = {}
    stack_w, stack_b = [], []
    for l, (w, b) in enumerate(params):
        if l == 0:
            out["w0"] = _emb_weight_cols(w, 1.0).astype(wd)
            out["b0"] = col(b)
        elif l in SKIP_IN:                       # fold the 1/sqrt(2) of cat([h, emb])/sqrt2
            out["w4h"] = (w[:SKIP_H].T * jnp.float32(INV_SQRT2)).astype(wd)
            out["w4e"] = _emb_weight_cols(w[SKIP_H:], INV_SQRT2).astype(wd)
            out["b4"] = col(b)
        elif l in STACKED:
            stack_w.append(w.T.astype(wd))
            stack_b.append(col(b))
        elif l == 3:
            out["w3"] = w.T.astype(wd)
            out["b3"] = col(b)
        else:                                    # final linear, l == NUM_LAYERS - 2
            out["w8"] = w.T.astype(wd)
            out["b8"] = col(b)

    return [fcol,
            out["w0"], out["b0"],
            jnp.stack(stack_w), jnp.stack(stack_b),
            out["w3"], out["b3"],
            out["w4h"], out["w4e"], out["b4"],
            out["w8"], out["b8"]]


# --------------------------------- host wrapper ----------------------------------
def _num_tensorcores():
    """Best-effort TensorCores-per-device (v7x has 2; v5e/v6e have 1). Falls back to 1."""
    try:
        info = pltpu.get_tpu_info()
        for attr in ("num_cores", "core_count", "tensorcore_count", "num_tensorcores"):
            v = getattr(info, attr, None)
            if isinstance(v, int) and v > 0:
                return v
    except Exception:
        pass
    try:
        kind = jax.devices()[0].device_kind.lower()
        if "v7" in kind or "7x" in kind:
            return 2
    except Exception:
        pass
    return 1


def sdf_forward(inputs, params, *, tile_n=8192, dot_dtype=jnp.float32):
    """inputs: (N, D_IN) float32.  params: list of (W (din,dout), b (1,dout)).
    dot_dtype=jnp.bfloat16 gives native-MXU matmuls on v6e/v7x (accuracy trade)."""
    N = inputs.shape[0]
    kp = pack_params(params, dot_dtype=dot_dtype)

    # Batch tile: large (compute-bound, weights resident), 128-lane aligned. Split into
    # >=2 grid steps only when the chip actually has >=2 TensorCores (v7x); on 1-core
    # chips the split would just add per-step overhead.
    n128 = _round_up(max(N, 1), 128)
    tile_cap = max(_round_up(tile_n, 128), 128)
    min_steps = 2 if (_num_tensorcores() >= 2 and n128 >= 256) else 1
    grid_n = max(-(-n128 // tile_cap), min_steps)
    tile = _round_up(-(-n128 // grid_n), 128)
    n_pad = grid_n * tile
    grid = (grid_n,)

    # Feature-major: batch goes on the 128-lane axis.
    x_fm = jnp.pad(inputs.astype(jnp.float32), ((0, n_pad - N), (0, 0))).T   # (D_IN, n_pad)

    in_specs = [pl.BlockSpec((D_IN, tile), lambda i: (0, i))]
    for arr in kp:
        in_specs.append(pl.BlockSpec(arr.shape, lambda i, _nd=arr.ndim: (0,) * _nd))
    out_specs = pl.BlockSpec((D_OUT, tile), lambda i: (0, i))

    # Advisory cost estimate: matmul flops + sin/cos + softplus (exp, log1p).
    mm_kn = [(EMB_PAD, D_HIDDEN),
             (D_HIDDEN, D_HIDDEN), (D_HIDDEN, D_HIDDEN), (D_HIDDEN, SKIP_H),
             (SKIP_H, D_HIDDEN), (EMB_PAD, D_HIDDEN),
             (D_HIDDEN, D_HIDDEN), (D_HIDDEN, D_HIDDEN), (D_HIDDEN, D_HIDDEN),
             (D_HIDDEN, D_OUT)]
    flops_pp = sum(2 * k * n for k, n in mm_kn)
    trans_pp = 2 * SINCOS_DIM + 2 * (6 * D_HIDDEN + SKIP_H)
    w_bytes = sum(int(a.size) * a.dtype.itemsize for a in kp)
    cost = pl.CostEstimate(flops=flops_pp * n_pad,
                           transcendentals=trans_pp * n_pad,
                           bytes_accessed=(D_IN + D_OUT) * 4 * n_pad + w_bytes)

    fn = pl.pallas_call(
        _sdf_kernel,
        out_shape=jax.ShapeDtypeStruct((D_OUT, n_pad), jnp.float32),
        grid=grid,
        in_specs=in_specs,
        out_specs=out_specs,
        scratch_shapes=[pltpu.VMEM((EMB_PAD, tile), jnp.float32)],
        compiler_params=pltpu.CompilerParams(
            dimension_semantics=("parallel",),
            vmem_limit_bytes=32 * 1024 * 1024,
        ),
        cost_estimate=cost,
    )
    out_fm = fn(x_fm, *kp)
    return out_fm[:, :N].T


# ------------------------------ parameter creation ------------------------------
def init_params(key):
    """Deterministic synthetic params. weight_norm reparam W = g * v / ||v|| is folded
    into an effective weight here (forward semantics of a weight-normed Linear)."""
    params = []
    for (din, dout) in _layer_dims():
        key, kv, kg, kb = jax.random.split(key, 4)
        v = jax.random.normal(kv, (din, dout), dtype=jnp.float32) * 0.2
        g = jax.random.uniform(kg, (1, dout), minval=0.5, maxval=1.5, dtype=jnp.float32)
        b = jax.random.normal(kb, (1, dout), dtype=jnp.float32) * 0.01
        # norm over the input dim for each output unit (PyTorch weight_norm dim=0 on (out,in))
        w_eff = g * v / (jnp.linalg.norm(v, axis=0, keepdims=True) + 1e-12)
        params.append((w_eff, b))
    return params


# --------------------------------- JAX reference ---------------------------------
def ref_forward(inputs, params):
    x = inputs * SCALE
    feats = [x]
    for f in FREQS:
        feats.append(jnp.sin(f * x))
        feats.append(jnp.cos(f * x))
    emb = jnp.concatenate(feats, axis=-1)
    h = emb
    for l in range(NUM_LAYERS - 1):
        w, b = params[l]
        if l in SKIP_IN:
            h = jnp.concatenate([h, emb], axis=-1) * INV_SQRT2
        h = h @ w + b
        if l < NUM_LAYERS - 2:
            h = _softplus(h)
    return h


# TODO(synk): SDFNetwork.sdf() uses torch.autograd.grad for spatial gradients; that is an
# autodiff feature, not a forward op, and is not reproduced in this forward-pass kernel.

if __name__ == "__main__":
    key = jax.random.PRNGKey(0)
    key, kx = jax.random.split(key)

    N = 256
    inputs = jax.random.normal(kx, (N, D_IN), dtype=jnp.float32)
    params = init_params(key)

    out = jax.block_until_ready(sdf_forward(inputs, params))
    ref = jax.block_until_ready(ref_forward(inputs, params))

    assert out.shape == (N, D_OUT)
    err = float(jnp.max(jnp.abs(out - ref)))
    assert jnp.allclose(out, ref, rtol=1e-4, atol=1e-4), f"max err {err}"

    print("KERNEL_OK")
</pallas_src>

<mosaic_0001>
module attributes {stable_mosaic.version = 11 : i64} {
  func.func @_sdf_kernel(%arg0: i32, %arg1: memref<3x256xf32, #tpu.memory_space<vmem>>, %arg2: memref<8x1xf32, #tpu.memory_space<vmem>>, %arg3: memref<64x56xf32, #tpu.memory_space<vmem>>, %arg4: memref<64x1xf32, #tpu.memory_space<vmem>>, %arg5: memref<5x64x64xf32, #tpu.memory_space<vmem>>, %arg6: memref<5x64x1xf32, #tpu.memory_space<vmem>>, %arg7: memref<25x64xf32, #tpu.memory_space<vmem>>, %arg8: memref<25x1xf32, #tpu.memory_space<vmem>>, %arg9: memref<64x25xf32, #tpu.memory_space<vmem>>, %arg10: memref<64x56xf32, #tpu.memory_space<vmem>>, %arg11: memref<64x1xf32, #tpu.memory_space<vmem>>, %arg12: memref<9x64xf32, #tpu.memory_space<vmem>>, %arg13: memref<9x1xf32, #tpu.memory_space<vmem>>, %arg14: memref<9x256xf32, #tpu.memory_space<vmem>>, %arg15: memref<56x256xf32, #tpu.memory_space<vmem>>) attributes {dimension_semantics = [#tpu.dimension_semantics<parallel>], iteration_bounds = array<i64: 1>, scalar_prefetch = 0 : i64, scratch_operands = 1 : i64, tpu.core_type = #tpu.core_type<tc>, window_params = [{transform_indices = @transform_0, window_bounds = array<i64: 3, 256>}, {pipeline_mode = #tpu.pipeline_mode<synchronous>, transform_indices = @transform_1, window_bounds = array<i64: 8, 1>}, {pipeline_mode = #tpu.pipeline_mode<synchronous>, transform_indices = @transform_2, window_bounds = array<i64: 64, 56>}, {pipeline_mode = #tpu.pipeline_mode<synchronous>, transform_indices = @transform_3, window_bounds = array<i64: 64, 1>}, {pipeline_mode = #tpu.pipeline_mode<synchronous>, transform_indices = @transform_4, window_bounds = array<i64: 5, 64, 64>}, {pipeline_mode = #tpu.pipeline_mode<synchronous>, transform_indices = @transform_5, window_bounds = array<i64: 5, 64, 1>}, {pipeline_mode = #tpu.pipeline_mode<synchronous>, transform_indices = @transform_6, window_bounds = array<i64: 25, 64>}, {pipeline_mode = #tpu.pipeline_mode<synchronous>, transform_indices = @transform_7, window_bounds = array<i64: 25, 1>}, {pipeline_mode = #tpu.pipeline_mode<synchronous>, transform_indices = @transform_8, window_bounds = array<i64: 64, 25>}, {pipeline_mode = #tpu.pipeline_mode<synchronous>, transform_indices = @transform_9, window_bounds = array<i64: 64, 56>}, {pipeline_mode = #tpu.pipeline_mode<synchronous>, transform_indices = @transform_10, window_bounds = array<i64: 64, 1>}, {pipeline_mode = #tpu.pipeline_mode<synchronous>, transform_indices = @transform_11, window_bounds = array<i64: 9, 64>}, {pipeline_mode = #tpu.pipeline_mode<synchronous>, transform_indices = @transform_12, window_bounds = array<i64: 9, 1>}, {transform_indices = @transform_13, window_bounds = array<i64: 9, 256>}]} {
    %c0 = arith.constant 0 : index
    %c0_0 = arith.constant 0 : index
    %0 = vector.load %arg1[%c0, %c0_0] : memref<3x256xf32, #tpu.memory_space<vmem>>, vector<3x256xf32>
    %c0_1 = arith.constant 0 : index
    %c0_2 = arith.constant 0 : index
    %1 = vector.load %arg2[%c0_1, %c0_2] : memref<8x1xf32, #tpu.memory_space<vmem>>, vector<8x1xf32>
    %cst = arith.constant 0.000000e+00 : f32
    %2 = vector.broadcast %cst : f32 to vector<8x256xf32>
    %c0_3 = arith.constant 0 : index
    %c0_4 = arith.constant 0 : index
    %3 = vector.load %arg15[%c0_3, %c0_4] : memref<56x256xf32, #tpu.memory_space<vmem>>, vector<8x256xf32>
    tpu.vector_store %arg15[%c0_3, %c0_4], %2 {strides = array<i32>} : memref<56x256xf32, #tpu.memory_space<vmem>>, vector<8x256xf32>,
    %c0_5 = arith.constant 0 : index
    %c0_6 = arith.constant 0 : index
    %4 = vector.load %arg15[%c0_5, %c0_6] : memref<56x256xf32, #tpu.memory_space<vmem>>, vector<3x256xf32>
    tpu.vector_store %arg15[%c0_5, %c0_6], %0 {strides = array<i32>} : memref<56x256xf32, #tpu.memory_space<vmem>>, vector<3x256xf32>,
    %5 = vector.extract_strided_slice %0 {offsets = [0, 0], sizes = [1, 256], strides = [1, 1]} : vector<3x256xf32> to vector<1x256xf32>
    %6 = vector.shape_cast %5 : vector<1x256xf32> to vector<1x256xf32>
    %7 = vector.broadcast %6 : vector<1x256xf32> to vector<8x256xf32>
    %8 = vector.broadcast %1 : vector<8x1xf32> to vector<8x256xf32>
    %9 = arith.mulf %8, %7 : vector<8x256xf32>
    %10 = math.sin %9 : vector<8x256xf32>
    %c8 = arith.constant 8 : index
    %c0_7 = arith.constant 0 : index
    %11 = vector.load %arg15[%c8, %c0_7] : memref<56x256xf32, #tpu.memory_space<vmem>>, vector<8x256xf32>
    tpu.vector_store %arg15[%c8, %c0_7], %10 {strides = array<i32>} : memref<56x256xf32, #tpu.memory_space<vmem>>, vector<8x256xf32>,
    %12 = math.cos %9 : vector<8x256xf32>
    %c32 = arith.constant 32 : index
    %c0_8 = arith.constant 0 : index
    %13 = vector.load %arg15[%c32, %c0_8] : memref<56x256xf32, #tpu.memory_space<vmem>>, vector<8x256xf32>
    tpu.vector_store %arg15[%c32, %c0_8], %12 {strides = array<i32>} : memref<56x256xf32, #tpu.memory_space<vmem>>, vector<8x256xf32>,
    %14 = vector.extract_strided_slice %0 {offsets = [1, 0], sizes = [1, 256], strides = [1, 1]} : vector<3x256xf32> to vector<1x256xf32>
    %15 = vector.shape_cast %14 : vector<1x256xf32> to vector<1x256xf32>
    %16 = vector.broadcast %15 : vector<1x256xf32> to vector<8x256xf32>
    %17 = vector.broadcast %1 : vector<8x1xf32> to vector<8x256xf32>
    %18 = arith.mulf %17, %16 : vector<8x256xf32>
    %19 = math.sin %18 : vector<8x256xf32>
    %c16 = arith.constant 16 : index
    %c0_9 = arith.constant 0 : index
    %20 = vector.load %arg15[%c16, %c0_9] : memref<56x256xf32, #tpu.memory_space<vmem>>, vector<8x256xf32>
    tpu.vector_store %arg15[%c16, %c0_9], %19 {strides = array<i32>} : memref<56x256xf32, #tpu.memory_space<vmem>>, vector<8x256xf32>,
    %21 = math.cos %18 : vector<8x256xf32>
    %c40 = arith.constant 40 : index
    %c0_10 = arith.constant 0 : index
    %22 = vector.load %arg15[%c40, %c0_10] : memref<56x256xf32, #tpu.memory_space<vmem>>, vector<8x256xf32>
    tpu.vector_store %arg15[%c40, %c0_10], %21 {strides = array<i32>} : memref<56x256xf32, #tpu.memory_space<vmem>>, vector<8x256xf32>,
    %23 = vector.extract_strided_slice %0 {offsets = [2, 0], sizes = [1, 256], strides = [1, 1]} : vector<3x256xf32> to vector<1x256xf32>
    %24 = vector.shape_cast %23 : vector<1x256xf32> to vector<1x256xf32>
    %25 = vector.broadcast %24 : vector<1x256xf32> to vector<8x256xf32>
    %26 = vector.broadcast %1 : vector<8x1xf32> to vector<8x256xf32>
    %27 = arith.mulf %26, %25 : vector<8x256xf32>
    %28 = math.sin %27 : vector<8x256xf32>
    %c24 = arith.constant 24 : index
    %c0_11 = arith.constant 0 : index
    %29 = vector.load %arg15[%c24, %c0_11] : memref<56x256xf32, #tpu.memory_space<vmem>>, vector<8x256xf32>
    tpu.vector_store %arg15[%c24, %c0_11], %28 {strides = array<i32>} : memref<56x256xf32, #tpu.memory_space<vmem>>, vector<8x256xf32>,
    %30 = math.cos %27 : vector<8x256xf32>
    %c48 = arith.constant 48 : index
    %c0_12 = arith.constant 0 : index
    %31 = vector.load %arg15[%c48, %c0_12] : memref<56x256xf32, #tpu.memory_space<vmem>>, vector<8x256xf32>
    tpu.vector_store %arg15[%c48, %c0_12], %30 {strides = array<i32>} : memref<56x256xf32, #tpu.memory_space<vmem>>, vector<8x256xf32>,
    %c0_13 = arith.constant 0 : index
    %c0_14 = arith.constant 0 : index
    %32 = vector.load %arg15[%c0_13, %c0_14] : memref<56x256xf32, #tpu.memory_space<vmem>>, vector<56x256xf32>
    %c0_15 = arith.constant 0 : index
    %c0_16 = arith.constant 0 : index
    %33 = vector.load %arg3[%c0_15, %c0_16] : memref<64x56xf32, #tpu.memory_space<vmem>>, vector<64x56xf32>
    %cst_17 = arith.constant dense<0.000000e+00> : vector<64x256xf32>
    %34 = tpu.matmul %33, %32, %cst_17 {dimension_numbers = #tpu.dot_dimension_numbers<[1], [0], [0], [1], [0, 0, 1, 1], [], []>} : vector<64x56xf32>, vector<56x256xf32>, vector<64x256xf32> -> vector<64x256xf32>
    %c0_18 = arith.constant 0 : index
    %c0_19 = arith.constant 0 : index
    %35 = vector.load %arg4[%c0_18, %c0_19] : memref<64x1xf32, #tpu.memory_space<vmem>>, vector<64x1xf32>
    %36 = vector.broadcast %35 : vector<64x1xf32> to vector<64x256xf32>
    %37 = arith.addf %34, %36 : vector<64x256xf32>
    %cst_20 = arith.constant 2.000000e+01 : f32
    %38 = vector.broadcast %cst_20 : f32 to vector<64x256xf32>
    %39 = arith.cmpf ogt, %37, %38 : vector<64x256xf32>
    %40 = math.exp %37 : vector<64x256xf32>
    %41 = math.log1p %40 : vector<64x256xf32>
    %42 = arith.select %39, %37, %41 : vector<64x256xi1>, vector<64x256xf32>
    %c0_21 = arith.constant 0 : index
    %c0_22 = arith.constant 0 : index
    %c0_23 = arith.constant 0 : index
    %43 = vector.load %arg5[%c0_21, %c0_22, %c0_23] : memref<5x64x64xf32, #tpu.memory_space<vmem>>, vector<1x64x64xf32>
    %44 = vector.shape_cast %43 : vector<1x64x64xf32> to vector<64x64xf32>
    %cst_24 = arith.constant dense<0.000000e+00> : vector<64x256xf32>
    %45 = tpu.matmul %44, %42, %cst_24 {dimension_numbers = #tpu.dot_dimension_numbers<[1], [0], [0], [1], [0, 0, 1, 1], [], []>} : vector<64x64xf32>, vector<64x256xf32>, vector<64x256xf32> -> vector<64x256xf32>
    %c0_25 = arith.constant 0 : index
    %c0_26 = arith.constant 0 : index
    %c0_27 = arith.constant 0 : index
    %46 = vector.load %arg6[%c0_25, %c0_26, %c0_27] : memref<5x64x1xf32, #tpu.memory_space<vmem>>, vector<1x64x1xf32>
    %47 = vector.shape_cast %46 : vector<1x64x1xf32> to vector<64x1xf32>
    %48 = vector.broadcast %47 : vector<64x1xf32> to vector<64x256xf32>
    %49 = arith.addf %45, %48 : vector<64x256xf32>
    %cst_28 = arith.constant 2.000000e+01 : f32
    %50 = vector.broadcast %cst_28 : f32 to vector<64x256xf32>
    %51 = arith.cmpf ogt, %49, %50 : vector<64x256xf32>
    %52 = math.exp %49 : vector<64x256xf32>
    %53 = math.log1p %52 : vector<64x256xf32>
    %54 = arith.select %51, %49, %53 : vector<64x256xi1>, vector<64x256xf32>
    %c1 = arith.constant 1 : index
    %c0_29 = arith.constant 0 : index
    %c0_30 = arith.constant 0 : index
    %55 = vector.load %arg5[%c1, %c0_29, %c0_30] : memref<5x64x64xf32, #tpu.memory_space<vmem>>, vector<1x64x64xf32>
    %56 = vector.shape_cast %55 : vector<1x64x64xf32> to vector<64x64xf32>
    %cst_31 = arith.constant dense<0.000000e+00> : vector<64x256xf32>
    %57 = tpu.matmul %56, %54, %cst_31 {dimension_numbers = #tpu.dot_dimension_numbers<[1], [0], [0], [1], [0, 0, 1, 1], [], []>} : vector<64x64xf32>, vector<64x256xf32>, vector<64x256xf32> -> vector<64x256xf32>
    %c1_32 = arith.constant 1 : index
    %c0_33 = arith.constant 0 : index
    %c0_34 = arith.constant 0 : index
    %58 = vector.load %arg6[%c1_32, %c0_33, %c0_34] : memref<5x64x1xf32, #tpu.memory_space<vmem>>, vector<1x64x1xf32>
    %59 = vector.shape_cast %58 : vector<1x64x1xf32> to vector<64x1xf32>
    %60 = vector.broadcast %59 : vector<64x1xf32> to vector<64x256xf32>
    %61 = arith.addf %57, %60 : vector<64x256xf32>
    %cst_35 = arith.constant 2.000000e+01 : f32
    %62 = vector.broadcast %cst_35 : f32 to vector<64x256xf32>
    %63 = arith.cmpf ogt, %61, %62 : vector<64x256xf32>
    %64 = math.exp %61 : vector<64x256xf32>
    %65 = math.log1p %64 : vector<64x256xf32>
    %66 = arith.select %63, %61, %65 : vector<64x256xi1>, vector<64x256xf32>
    %c0_36 = arith.constant 0 : index
    %c0_37 = arith.constant 0 : index
    %67 = vector.load %arg7[%c0_36, %c0_37] : memref<25x64xf32, #tpu.memory_space<vmem>>, vector<25x64xf32>
    %cst_38 = arith.constant dense<0.000000e+00> : vector<25x256xf32>
    %68 = tpu.matmul %67, %66, %cst_38 {dimension_numbers = #tpu.dot_dimension_numbers<[1], [0], [0], [1], [0, 0, 1, 1], [], []>} : vector<25x64xf32>, vector<64x256xf32>, vector<25x256xf32> -> vector<25x256xf32>
    %c0_39 = arith.constant 0 : index
    %c0_40 = arith.constant 0 : index
    %69 = vector.load %arg8[%c0_39, %c0_40] : memref<25x1xf32, #tpu.memory_space<vmem>>, vector<25x1xf32>
    %70 = vector.broadcast %69 : vector<25x1xf32> to vector<25x256xf32>
    %71 = arith.addf %68, %70 : vector<25x256xf32>
    %cst_41 = arith.constant 2.000000e+01 : f32
    %72 = vector.broadcast %cst_41 : f32 to vector<25x256xf32>
    %73 = arith.cmpf ogt, %71, %72 : vector<25x256xf32>
    %74 = math.exp %71 : vector<25x256xf32>
    %75 = math.log1p %74 : vector<25x256xf32>
    %76 = arith.select %73, %71, %75 : vector<25x256xi1>, vector<25x256xf32>
    %c0_42 = arith.constant 0 : index
    %c0_43 = arith.constant 0 : index
    %77 = vector.load %arg9[%c0_42, %c0_43] : memref<64x25xf32, #tpu.memory_space<vmem>>, vector<64x25xf32>
    %cst_44 = arith.constant dense<0.000000e+00> : vector<64x256xf32>
    %78 = tpu.matmul %77, %76, %cst_44 {dimension_numbers = #tpu.dot_dimension_numbers<[1], [0], [0], [1], [0, 0, 1, 1], [], []>} : vector<64x25xf32>, vector<25x256xf32>, vector<64x256xf32> -> vector<64x256xf32>
    %c0_45 = arith.constant 0 : index
    %c0_46 = arith.constant 0 : index
    %79 = vector.load %arg10[%c0_45, %c0_46] : memref<64x56xf32, #tpu.memory_space<vmem>>, vector<64x56xf32>
    %cst_47 = arith.constant dense<0.000000e+00> : vector<64x256xf32>
    %80 = tpu.matmul %79, %32, %cst_47 {dimension_numbers = #tpu.dot_dimension_numbers<[1], [0], [0], [1], [0, 0, 1, 1], [], []>} : vector<64x56xf32>, vector<56x256xf32>, vector<64x256xf32> -> vector<64x256xf32>
    %81 = arith.addf %78, %80 : vector<64x256xf32>
    %c0_48 = arith.constant 0 : index
    %c0_49 = arith.constant 0 : index
    %82 = vector.load %arg11[%c0_48, %c0_49] : memref<64x1xf32, #tpu.memory_space<vmem>>, vector<64x1xf32>
    %83 = vector.broadcast %82 : vector<64x1xf32> to vector<64x256xf32>
    %84 = arith.addf %81, %83 : vector<64x256xf32>
    %cst_50 = arith.constant 2.000000e+01 : f32
    %85 = vector.broadcast %cst_50 : f32 to vector<64x256xf32>
    %86 = arith.cmpf ogt, %84, %85 : vector<64x256xf32>
    %87 = math.exp %84 : vector<64x256xf32>
    %88 = math.log1p %87 : vector<64x256xf32>
    %89 = arith.select %86, %84, %88 : vector<64x256xi1>, vector<64x256xf32>
    %c2 = arith.constant 2 : index
    %c0_51 = arith.constant 0 : index
    %c0_52 = arith.constant 0 : index
    %90 = vector.load %arg5[%c2, %c0_51, %c0_52] : memref<5x64x64xf32, #tpu.memory_space<vmem>>, vector<1x64x64xf32>
    %91 = vector.shape_cast %90 : vector<1x64x64xf32> to vector<64x64xf32>
    %cst_53 = arith.constant dense<0.000000e+00> : vector<64x256xf32>
    %92 = tpu.matmul %91, %89, %cst_53 {dimension_numbers = #tpu.dot_dimension_numbers<[1], [0], [0], [1], [0, 0, 1, 1], [], []>} : vector<64x64xf32>, vector<64x256xf32>, vector<64x256xf32> -> vector<64x256xf32>
    %c2_54 = arith.constant 2 : index
    %c0_55 = arith.constant 0 : index
    %c0_56 = arith.constant 0 : index
    %93 = vector.load %arg6[%c2_54, %c0_55, %c0_56] : memref<5x64x1xf32, #tpu.memory_space<vmem>>, vector<1x64x1xf32>
    %94 = vector.shape_cast %93 : vector<1x64x1xf32> to vector<64x1xf32>
    %95 = vector.broadcast %94 : vector<64x1xf32> to vector<64x256xf32>
    %96 = arith.addf %92, %95 : vector<64x256xf32>
    %cst_57 = arith.constant 2.000000e+01 : f32
    %97 = vector.broadcast %cst_57 : f32 to vector<64x256xf32>
    %98 = arith.cmpf ogt, %96, %97 : vector<64x256xf32>
    %99 = math.exp %96 : vector<64x256xf32>
    %100 = math.log1p %99 : vector<64x256xf32>
    %101 = arith.select %98, %96, %100 : vector<64x256xi1>, vector<64x256xf32>
    %c3 = arith.constant 3 : index
    %c0_58 = arith.constant 0 : index
    %c0_59 = arith.constant 0 : index
    %102 = vector.load %arg5[%c3, %c0_58, %c0_59] : memref<5x64x64xf32, #tpu.memory_space<vmem>>, vector<1x64x64xf32>
    %103 = vector.shape_cast %102 : vector<1x64x64xf32> to vector<64x64xf32>
    %cst_60 = arith.constant dense<0.000000e+00> : vector<64x256xf32>
    %104 = tpu.matmul %103, %101, %cst_60 {dimension_numbers = #tpu.dot_dimension_numbers<[1], [0], [0], [1], [0, 0, 1, 1], [], []>} : vector<64x64xf32>, vector<64x256xf32>, vector<64x256xf32> -> vector<64x256xf32>
    %c3_61 = arith.constant 3 : index
    %c0_62 = arith.constant 0 : index
    %c0_63 = arith.constant 0 : index
    %105 = vector.load %arg6[%c3_61, %c0_62, %c0_63] : memref<5x64x1xf32, #tpu.memory_space<vmem>>, vector<1x64x1xf32>
    %106 = vector.shape_cast %105 : vector<1x64x1xf32> to vector<64x1xf32>
    %107 = vector.broadcast %106 : vector<64x1xf32> to vector<64x256xf32>
    %108 = arith.addf %104, %107 : vector<64x256xf32>
    %cst_64 = arith.constant 2.000000e+01 : f32
    %109 = vector.broadcast %cst_64 : f32 to vector<64x256xf32>
    %110 = arith.cmpf ogt, %108, %109 : vector<64x256xf32>
    %111 = math.exp %108 : vector<64x256xf32>
    %112 = math.log1p %111 : vector<64x256xf32>
    %113 = arith.select %110, %108, %112 : vector<64x256xi1>, vector<64x256xf32>
    %c4 = arith.constant 4 : index
    %c0_65 = arith.constant 0 : index
    %c0_66 = arith.constant 0 : index
    %114 = vector.load %arg5[%c4, %c0_65, %c0_66] : memref<5x64x64xf32, #tpu.memory_space<vmem>>, vector<1x64x64xf32>
    %115 = vector.shape_cast %114 : vector<1x64x64xf32> to vector<64x64xf32>
    %cst_67 = arith.constant dense<0.000000e+00> : vector<64x256xf32>
    %116 = tpu.matmul %115, %113, %cst_67 {dimension_numbers = #tpu.dot_dimension_numbers<[1], [0], [0], [1], [0, 0, 1, 1], [], []>} : vector<64x64xf32>, vector<64x256xf32>, vector<64x256xf32> -> vector<64x256xf32>
    %c4_68 = arith.constant 4 : index
    %c0_69 = arith.constant 0 : index
    %c0_70 = arith.constant 0 : index
    %117 = vector.load %arg6[%c4_68, %c0_69, %c0_70] : memref<5x64x1xf32, #tpu.memory_space<vmem>>, vector<1x64x1xf32>
    %118 = vector.shape_cast %117 : vector<1x64x1xf32> to vector<64x1xf32>
    %119 = vector.broadcast %118 : vector<64x1xf32> to vector<64x256xf32>
    %120 = arith.addf %116, %119 : vector<64x256xf32>
    %cst_71 = arith.constant 2.000000e+01 : f32
    %121 = vector.broadcast %cst_71 : f32 to vector<64x256xf32>
    %122 = arith.cmpf ogt, %120, %121 : vector<64x256xf32>
    %123 = math.exp %120 : vector<64x256xf32>
    %124 = math.log1p %123 : vector<64x256xf32>
    %125 = arith.select %122, %120, %124 : vector<64x256xi1>, vector<64x256xf32>
    %c0_72 = arith.constant 0 : index
    %c0_73 = arith.constant 0 : index
    %126 = vector.load %arg12[%c0_72, %c0_73] : memref<9x64xf32, #tpu.memory_space<vmem>>, vector<9x64xf32>
    %cst_74 = arith.constant dense<0.000000e+00> : vector<9x256xf32>
    %127 = tpu.matmul %126, %125, %cst_74 {dimension_numbers = #tpu.dot_dimension_numbers<[1], [0], [0], [1], [0, 0, 1, 1], [], []>} : vector<9x64xf32>, vector<64x256xf32>, vector<9x256xf32> -> vector<9x256xf32>
    %c0_75 = arith.constant 0 : index
    %c0_76 = arith.constant 0 : index
    %128 = vector.load %arg13[%c0_75, %c0_76] : memref<9x1xf32, #tpu.memory_space<vmem>>, vector<9x1xf32>
    %129 = vector.broadcast %128 : vector<9x1xf32> to vector<9x256xf32>
    %130 = arith.addf %127, %129 : vector<9x256xf32>
    %c0_77 = arith.constant 0 : index
    %c0_78 = arith.constant 0 : index
    %131 = vector.load %arg14[%c0_77, %c0_78] : memref<9x256xf32, #tpu.memory_space<vmem>>, vector<9x256xf32>
    tpu.vector_store %arg14[%c0_77, %c0_78], %130 {strides = array<i32>} : memref<9x256xf32, #tpu.memory_space<vmem>>, vector<9x256xf32>,
    return
  }
  func.func @transform_0(%arg0: i32) -> (i32, i32) {
    %c0_i32 = arith.constant 0 : i32
    %c0_i32_0 = arith.constant 0 : i32
    return %c0_i32, %arg0 : i32, i32
  }
  func.func @transform_1(%arg0: i32) -> (i32, i32) {
    %c0_i32 = arith.constant 0 : i32
    %c0_i32_0 = arith.constant 0 : i32
    %c0_i32_1 = arith.constant 0 : i32
    return %c0_i32, %c0_i32_0 : i32, i32
  }
  func.func @transform_2(%arg0: i32) -> (i32, i32) {
    %c0_i32 = arith.constant 0 : i32
    %c0_i32_0 = arith.constant 0 : i32
    %c0_i32_1 = arith.constant 0 : i32
    return %c0_i32, %c0_i32_0 : i32, i32
  }
  func.func @transform_3(%arg0: i32) -> (i32, i32) {
    %c0_i32 = arith.constant 0 : i32
    %c0_i32_0 = arith.constant 0 : i32
    %c0_i32_1 = arith.constant 0 : i32
    return %c0_i32, %c0_i32_0 : i32, i32
  }
  func.func @transform_4(%arg0: i32) -> (i32, i32, i32) {
    %c0_i32 = arith.constant 0 : i32
    %c0_i32_0 = arith.constant 0 : i32
    %c0_i32_1 = arith.constant 0 : i32
    %c0_i32_2 = arith.constant 0 : i32
    return %c0_i32, %c0_i32_0, %c0_i32_1 : i32, i32, i32
  }
  func.func @transform_5(%arg0: i32) -> (i32, i32, i32) {
    %c0_i32 = arith.constant 0 : i32
    %c0_i32_0 = arith.constant 0 : i32
    %c0_i32_1 = arith.constant 0 : i32
    %c0_i32_2 = arith.constant 0 : i32
    return %c0_i32, %c0_i32_0, %c0_i32_1 : i32, i32, i32
  }
  func.func @transform_6(%arg0: i32) -> (i32, i32) {
    %c0_i32 = arith.constant 0 : i32
    %c0_i32_0 = arith.constant 0 : i32
    %c0_i32_1 = arith.constant 0 : i32
    return %c0_i32, %c0_i32_0 : i32, i32
  }
  func.func @transform_7(%arg0: i32) -> (i32, i32) {
    %c0_i32 = arith.constant 0 : i32
    %c0_i32_0 = arith.constant 0 : i32
    %c0_i32_1 = arith.constant 0 : i32
    return %c0_i32, %c0_i32_0 : i32, i32
  }
  func.func @transform_8(%arg0: i32) -> (i32, i32) {
    %c0_i32 = arith.constant 0 : i32
    %c0_i32_0 = arith.constant 0 : i32
    %c0_i32_1 = arith.constant 0 : i32
    return %c0_i32, %c0_i32_0 : i32, i32
  }
  func.func @transform_9(%arg0: i32) -> (i32, i32) {
    %c0_i32 = arith.constant 0 : i32
    %c0_i32_0 = arith.constant 0 : i32
    %c0_i32_1 = arith.constant 0 : i32
    return %c0_i32, %c0_i32_0 : i32, i32
  }
  func.func @transform_10(%arg0: i32) -> (i32, i32) {
    %c0_i32 = arith.constant 0 : i32
    %c0_i32_0 = arith.constant 0 : i32
    %c0_i32_1 = arith.constant 0 : i32
    return %c0_i32, %c0_i32_0 : i32, i32
  }
  func.func @transform_11(%arg0: i32) -> (i32, i32) {
    %c0_i32 = arith.constant 0 : i32
    %c0_i32_0 = arith.constant 0 : i32
    %c0_i32_1 = arith.constant 0 : i32
    return %c0_i32, %c0_i32_0 : i32, i32
  }
  func.func @transform_12(%arg0: i32) -> (i32, i32) {
    %c0_i32 = arith.constant 0 : i32
    %c0_i32_0 = arith.constant 0 : i32
    %c0_i32_1 = arith.constant 0 : i32
    return %c0_i32, %c0_i32_0 : i32, i32
  }
  func.func @transform_13(%arg0: i32) -> (i32, i32) {
    %c0_i32 = arith.constant 0 : i32
    %c0_i32_0 = arith.constant 0 : i32
    return %c0_i32, %arg0 : i32, i32
  }
}

</mosaic_0001>

<bundles_post_ra>
// kernel: tpu_custom_call.1
= control target key start
LH: loop header
LB: loop body
LE: loop exit
PB: predicated region body
PF: predicated region fallthrough
CT: control target
= control target key end

     0   :  { %v5638_v1 = vmov 0   ;;  %s8921_s0 = inlined_call_operand.vmem [shape: f32[3,256], index: 0, kind: input, shape index: {}]   ;;  %s8922_s1 = inlined_call_operand.vmem [shape: f32[8,1], index: 1, kind: input, shape index: {}]   ;;  %s8923_s2 = inlined_call_operand.vmem [shape: f32[64,56], index: 2, kind: input, shape index: {}]   ;;  %s8924_s3 = inlined_call_operand.vmem [shape: f32[64,1], index: 3, kind: input, shape index: {}]   ;;  %s8925_s4 = inlined_call_operand.vmem [shape: f32[5,64,64], index: 4, kind: input, shape index: {}]   ;;  %s8926_s5 = inlined_call_operand.vmem [shape: f32[5,64,1], index: 5, kind: input, shape index: {}]   ;;  %s8927_s6 = inlined_call_operand.vmem [shape: f32[25,64], index: 6, kind: input, shape index: {}]   ;;  %s8928_s7 = inlined_call_operand.vmem [shape: f32[25,1], index: 7, kind: input, shape index: {}]   ;;  %s8929_s8 = inlined_call_operand.vmem [shape: f32[64,25], index: 8, kind: input, shape index: {}]   ;;  %s8930_s9 = inlined_call_operand.vmem [shape: f32[64,56], index: 9, kind: input, shape index: {}]   ;;  %s8931_s10 = inlined_call_operand.vmem [shape: f32[64,1], index: 10, kind: input, shape index: {}]   ;;  %s8932_s11 = inlined_call_operand.vmem [shape: f32[9,64], index: 11, kind: input, shape index: {}]   ;;  %s8933_s12 = inlined_call_operand.vmem [shape: f32[9,1], index: 12, kind: input, shape index: {}]   ;;  %s8934_s13 = inlined_call_operand.hbm [shape: f32[9,256], index: 13, kind: output, shape index: {}]  }
   0x1   :  { %v46_v0 = vld [vmem:[%s8922_s1] sm:$0xff]  ;;  %5105 = vset.pattern.permute.xlu0 %v5638_v1  ;;  %5106 = vset.pattern.permute.xlu1 %v5638_v1  ;;  %v1398_v3 = vld [vmem:[%s8924_s3 + $0x18] sm:$0xff]  ;;  %v1400_v4 = vld [vmem:[%s8924_s3 + $0x28] sm:$0xff] }
   0x2   :  { %74 = vperm.xlu0 %5105, %v46_v0   ;;  %v1395_v2 = vld [vmem:[%s8924_s3] sm:$0xff] }
   0x6   :  { %1405 = vperm.xlu0 %5105, %v1395_v2  }
   0xa   :  { %1420 = vperm.xlu0 %5105, %v1398_v3  }
   0xb   :  { %18 = vsyncpa [#allocation4], 0  ;;  %v1402_v5 = vld [vmem:[%s8924_s3 + $0x38] sm:$0xff]  ;;  %v1798_v6 = vld [vmem:[%s8926_s5 + $0x8] sm:$0xff]  ;;  %v54_v29 = vlaneseq  ;;  %s5647_s20 = smov [#allocation3]  }
   0xc   :  { %v1800_v7 = vld [vmem:[%s8926_s5 + $0x18] sm:$0xff]  ;;  %v1802_v8 = vld [vmem:[%s8926_s5 + $0x28] sm:$0xff]  ;;  %v5816_v39 = vld [vmem:[%s8921_s0] sm:$0x77]  ;;  %s4712_s21 = sshll.u32 %s5647_s20, 4  ;;  %s4713_s21 = int_to_ptr.vmem [resolvable:$true] %s4712_s21 }
   0xd   :  { %v1804_v9 = vld [vmem:[%s8926_s5 + $0x38] sm:$0xff]  ;;  %v4796_v10 = vld [vmem:[%s8926_s5 + $0x48] sm:$0xff]  ;;  %v55_v31 = vshrl.u32 %v54_v29, 7  ;;  %v5641_v29 = vmov 2131351028   ;;  %p5619_p1 = scmp.lt.s32.totalorder %s4713_s21, %s4713_s21 }
   0xe   :  { %1430 = vperm.xlu0 %5105, %v1400_v4   ;;  %v4798_v11 = vld [vmem:[%s8926_s5 + $0x58] sm:$0xff]  ;;  %v4800_v12 = vld [vmem:[%s8926_s5 + $0x68] sm:$0xff] }
   0xf   :  { %v4802_v13 = vld [vmem:[%s8926_s5 + $0x78] sm:$0xff]  ;;  %v2599_v14 = vld [vmem:[%s8928_s7 + $0x8] sm:$0xff]  ;;  %v56_v33 = vsub.s32 0, %v55_v31  ;;  %v60_v34 = vsub.s32 4, %v55_v31  ;;  %v499_v36 = vsub.s32 1, %v55_v31  ;;  %v937_v37 = vsub.s32 2, %v55_v31 }
  0x10   :  { %v2601_v15 = vld [vmem:[%s8928_s7 + $0x18] sm:$0x1]  ;;  %v3126_v16 = vld [vmem:[%s8931_s10 + $0x8] sm:$0xff]  ;;  %v941_v38 = vsub.s32 6, %v55_v31  ;;  %v503_v52 = vsub.s32 5, %v55_v31 }
  0x11   :  { %v3128_v17 = vld [vmem:[%s8931_s10 + $0x18] sm:$0xff]  ;;  %v3130_v18 = vld [vmem:[%s8931_s10 + $0x28] sm:$0xff]  ;;  %v57_v40 = vrot.slane %v5816_v39, %v56_v33  ;;  %v61_v41 = vrot.slane %v5816_v39, %v60_v34  ;;  %v500_v43 = vrot.slane %v5816_v39, %v499_v36  ;;  %v938_v44 = vrot.slane %v5816_v39, %v937_v37 }
  0x12   :  { %1440 = vperm.xlu0 %5105, %v1402_v5   ;;  %v3132_v19 = vld [vmem:[%s8931_s10 + $0x38] sm:$0xff]  ;;  %v4842_v20 = vld [vmem:[%s8926_s5 + $0x88] sm:$0xff]  ;;  %v942_v45 = vrot.slane %v5816_v39, %v941_v38  ;;  %v504_v63 = vrot.slane %v5816_v39, %v503_v52  ;;  %v5642_v31 = vmov 2102212464  }
  0x13   :  { %v4844_v21 = vld [vmem:[%s8926_s5 + $0x98] sm:$0xff]  ;;  %v4846_v22 = vld [vmem:[%s8926_s5 + $0xa8] sm:$0xff]  ;;  %v67_v46 = vrot.slane %v57_v40, %v56_v33  ;;  %v71_v47 = vrot.slane %v61_v41, %v56_v33  ;;  %v510_v48 = vrot.slane %v500_v43, %v499_v36  ;;  %v948_v49 = vrot.slane %v938_v44, %v937_v37 }
  0x14   :  { %v4848_v23 = vld [vmem:[%s8926_s5 + $0xb8] sm:$0xff]  ;;  %v4866_v24 = vld [vmem:[%s8926_s5 + $0xc8] sm:$0xff]  ;;  %v952_v50 = vrot.slane %v942_v45, %v937_v37  ;;  %v5643_v33 = vmov 920167782   ;;  %v5644_v41 = vmov 1326507024  }
  0x15   :  { %v4868_v25 = vld [vmem:[%s8926_s5 + $0xd8] sm:$0xff]  ;;  %v4870_v26 = vld [vmem:[%s8926_s5 + $0xe8] sm:$0xff] }
  0x16   :  { %1812 = vperm.xlu0 %5105, %v1798_v6   ;;  %v4872_v27 = vld [vmem:[%s8926_s5 + $0xf8] sm:$0xff]  ;;  %v4890_v28 = vld [vmem:[%s8926_s5 + $0x108] sm:$0xff] }
  0x17   :  { %v4892_v30 = vld [vmem:[%s8926_s5 + $0x118] sm:$0xff]  ;;  %v4894_v32 = vld [vmem:[%s8926_s5 + $0x128] sm:$0xff] }
  0x18   :  { %v4896_v35 = vld [vmem:[%s8926_s5 + $0x138] sm:$0xff]  ;;  %v4609_v42 = vld [vmem:[%s8933_s12 + $0x8] sm:$0x1] }
  0x1a   :  { %1822 = vperm.xlu0 %5105, %v1800_v7  }
  0x1e   :  { %1832 = vperm.xlu0 %5105, %v1802_v8   ;;  %v514_v8 = vrot.slane %v504_v63, %v499_v36 }
  0x22   :  { %1842 = vperm.xlu0 %5105, %v1804_v9  }
  0x26   :  { %2216 = vperm.xlu0 %5105, %v4796_v10  }
  0x2a   :  { %2226 = vperm.xlu0 %5105, %v4798_v11  }
  0x2e   :  { %2236 = vperm.xlu0 %5105, %v4800_v12  }
  0x32   :  { %2246 = vperm.xlu0 %5105, %v4802_v13  }
  0x36   :  { %2609 = vperm.xlu0 %5105, %v2599_v14  }
  0x3a   :  { %2619 = vperm.xlu0 %5105, %v2601_v15  }
  0x3e   :  { %3140 = vperm.xlu0 %5105, %v3126_v16  }
  0x42   :  { %3150 = vperm.xlu0 %5105, %v3128_v17  }
  0x46   :  { %3160 = vperm.xlu0 %5105, %v3130_v18  }
  0x4a   :  { %3170 = vperm.xlu0 %5105, %v3132_v19  }
  0x4e   :  { %3422 = vperm.xlu0 %5105, %v4842_v20  }
  0x52   :  { %3432 = vperm.xlu0 %5105, %v4844_v21  }
  0x56   :  { %3442 = vperm.xlu0 %5105, %v4846_v22  }
  0x5a   :  { %3452 = vperm.xlu0 %5105, %v4848_v23   ;;  %v5639_v23 = vmov 683565275  }
  0x5e   :  { %3825 = vperm.xlu0 %5105, %v4866_v24  }
  0x62   :  { %3835 = vperm.xlu0 %5105, %v4868_v25  }
  0x66   :  { %3845 = vperm.xlu0 %5105, %v4870_v26  }
  0x6a   :  { %3855 = vperm.xlu0 %5105, %v4872_v27   ;;  %v5640_v27 = vmov 2475754826  }
  0x6e   :  { %4228 = vperm.xlu0 %5105, %v4890_v28  }
  0x72   :  { %4238 = vperm.xlu0 %5105, %v4892_v30  }
  0x76   :  { %4248 = vperm.xlu0 %5105, %v4894_v32  }
  0x7a   :  { %4258 = vperm.xlu0 %5105, %v4896_v35  }
  0x7e   :  { %4617 = vperm.xlu0 %5105, %v4609_v42  }
  0x81   :  { %v75_v51 = vpop.permute.xlu0 %74 }
  0x82   :  { %v5826_v53 = vmul.f32 %v75_v51, %v67_v46  ;;  %v5828_v54 = vmul.f32 %v75_v51, %v71_v47  ;;  %v5830_v55 = vmul.f32 %v510_v48, %v75_v51  ;;  %v5832_v56 = vmul.f32 %v948_v49, %v75_v51 }
  0x83   :  { %v5834_v57 = vmul.f32 %v952_v50, %v75_v51  ;;  %v5846_v17 = vmul.f32 %v514_v8, %v75_v51 }
  0x84   :  { %v79_v58 = vand.u32 2147483647, %v5826_v53  ;;  %v82_v59 = vand.u32 2139095040, %v5826_v53  ;;  %v183_v60 = vand.u32 2147483647, %v5828_v54  ;;  %v186_v61 = vand.u32 2139095040, %v5828_v54 }
  0x85   :  { %v520_v3 = vand.u32 2139095040, %v5830_v55  ;;  %v517_v20 = vand.u32 2147483647, %v5830_v55  ;;  %vm81_vm13 = vcmp.lt.s32.totalorder %v5826_v53, 0 }
  0x86   :  { %v83_v62 = vshrl.u32 %v82_v59, 23  ;;  %v86_v0 = vand.u32 8388607, %v79_v58  ;;  %v187_v1 = vshrl.u32 %v186_v61, 23  ;;  %v190_v2 = vand.u32 8388607, %v183_v60 }
  0x87   :  { %v521_v6 = vshrl.u32 %v520_v3, 23  ;;  %vm5949_vm14 = vcmp.le.f32.partialorder %v79_v58, 0.7853982 }
  0x88   :  { %v4723_v4 = vadd.s32 4294967169, %v83_v62  ;;  %v4727_v5 = vadd.s32 4294967169, %v187_v1  ;;  %v87_v9 = vor.u32 8388608, %v86_v0  ;;  %v191_v10 = vor.u32 8388608, %v190_v2 }
  0x89   :  { %v4739_v12 = vadd.s32 4294967169, %v521_v6 }
  0x8a   :  { %v89_v7 = vadd.s32 1, %v4723_v4  ;;  %v193_v11 = vadd.s32 1, %v4727_v5  ;;  %v5848_v18 = vshll.u32 %v87_v9, 8  ;;  %v5850_v19 = vshll.u32 %v191_v10, 8 }
  0x8b   :  { %v5853_v21 = vadd.s32 1, %v4739_v12 }
  0x8c   :  { %vm90_vm0 = vcmp.gt.s32.totalorder %v89_v7, 0  ;;  %vm194_vm1 = vcmp.gt.s32.totalorder %v193_v11, 0 }
  0x8d   :  { %v91_v13 = vsel %vm90_vm0, %v89_v7, 0  ;;  %v195_v16 = vsel %vm194_vm1, %v193_v11, 0  ;;  %vm528_vm6 = vcmp.gt.s32.totalorder %v5853_v21, 0 }
  0x8e   :  { %v92_v14 = vshrl.u32 %v91_v13, 5  ;;  %v93_v15 = vand.u32 31, %v91_v13  ;;  %v5856_v25 = vshrl.u32 %v195_v16, 5  ;;  %v197_v26 = vand.u32 31, %v195_v16 }
  0x90   :  { %v94_v22 = vsub.s32 32, %v93_v15  ;;  %v96_v24 = vshll.u32 %v5639_v23, %v93_v15  ;;  %v99_v28 = vshll.u32 %v5640_v27, %v93_v15  ;;  %v102_v30 = vshll.u32 %v5641_v29, %v93_v15 }
  0x91   :  { %v105_v32 = vshll.u32 %v5642_v31, %v93_v15  ;;  %v108_v34 = vshll.u32 %v5643_v33, %v93_v15  ;;  %vm111_vm2 = vcmp.lt.s32.totalorder %v92_v14, 1  ;;  %vm112_vm3 = vcmp.lt.s32.totalorder %v92_v14, 2 }
  0x92   :  { %v97_v35 = vshrl.u32 %v5640_v27, %v94_v22  ;;  %v100_v36 = vshrl.u32 %v5641_v29, %v94_v22  ;;  %v103_v37 = vshrl.u32 %v5642_v31, %v94_v22  ;;  %v95_v38 = vshrl.u32 %v5639_v23, %v94_v22 }
  0x93   :  { %v106_v40 = vshrl.u32 %v5643_v33, %v94_v22  ;;  %v109_v42 = vshrl.u32 %v5644_v41, %v94_v22  ;;  %v198_v46 = vsub.s32 32, %v197_v26  ;;  %vm113_vm4 = vcmp.lt.s32.totalorder %v92_v14, 3 }
  0x94   :  { %v98_v43 = vor.u32 %v97_v35, %v96_v24  ;;  %v101_v44 = vor.u32 %v100_v36, %v99_v28  ;;  %v104_v45 = vor.u32 %v103_v37, %v102_v30  ;;  %vm114_vm5 = vcmp.lt.s32.totalorder %v92_v14, 4 }
  0x95   :  { %v107_v47 = vor.u32 %v106_v40, %v105_v32  ;;  %v110_v48 = vor.u32 %v109_v42, %v108_v34  ;;  %v200_v63 = vshll.u32 %v5639_v23, %v197_v26  ;;  %v201_v2 = vshrl.u32 %v5640_v27, %v198_v46 }
  0x96   :  { %v115_v49 = vsel %vm111_vm2, %v95_v38, %v98_v43  ;;  %v116_v50 = vsel %vm114_vm5, %v104_v45, 2102212464  ;;  %v119_v51 = vsel %vm111_vm2, %v98_v43, %v101_v44  ;;  %v123_v52 = vsel %vm111_vm2, %v101_v44, %v104_v45 }
  0x97   :  { %v117_v59 = vsel %vm113_vm4, %v101_v44, %v116_v50  ;;  %v120_v61 = vsel %vm114_vm5, %v107_v47, 920167782  ;;  %v124_v62 = vsel %vm114_vm5, %v110_v48, 1326507024  ;;  %v203_v3 = vshll.u32 %v5640_v27, %v197_v26 }
  0x98   :  { %v121_v0 = vsel %vm113_vm4, %v104_v45, %v120_v61  ;;  %v125_v1 = vsel %vm113_vm4, %v107_v47, %v124_v62  ;;  %v118_v4 = vsel %vm112_vm3, %v115_v49, %v117_v59  ;;  %v204_v7 = vshrl.u32 %v5641_v29, %v198_v46 }
  0x99   :  { %v122_v5 = vsel %vm112_vm3, %v119_v51, %v121_v0  ;;  %v126_v6 = vsel %vm112_vm3, %v123_v52, %v125_v1  ;;  %v202_v12 = vor.u32 %v201_v2, %v200_v63  ;;  %v206_v15 = vshll.u32 %v5641_v29, %v197_v26 }
  0x9a   :  { %v5880_v8 = vmul.u32.u64.low %v5848_v18, %v126_v6  ;;  %v5881_v9 = vmul.u32.u64.high %v5848_v18, %v126_v6, %v5880_v8  ;;  %v5884_v10 = vmul.u32.u64.low %v5848_v18, %v122_v5  ;;  %v5885_v11 = vmul.u32.u64.high %v5848_v18, %v122_v5, %v5884_v10 }
  0x9b   :  { %v205_v13 = vor.u32 %v204_v7, %v203_v3  ;;  %v207_v16 = vshrl.u32 %v5642_v31, %v198_v46  ;;  %v199_v14 = vshrl.u32 %v5639_v23, %v198_v46  ;;  %v209_v22 = vshll.u32 %v5642_v31, %v197_v26 }
  0x9c   :  { %v210_v24 = vshrl.u32 %v5643_v33, %v198_v46  ;;  %v213_v28 = vshrl.u32 %v5644_v41, %v198_v46  ;;  %v134_v30 = vmul.u32 %v5848_v18, %v118_v4  ;;  %v212_v34 = vshll.u32 %v5643_v33, %v197_v26 }
  0x9d   :  { %v208_v32 = vor.u32 %v207_v16, %v206_v15  ;;  %vm215_vm7 = vcmp.lt.s32.totalorder %v5856_v25, 1  ;;  %vm136_vm8 = vc.u32 %v5881_v9, %v5884_v10  ;;  %v137_v35 = vadd.s32 1, %v5885_v11 }
  0x9e   :  { %v211_v36 = vor.u32 %v210_v24, %v209_v22  ;;  %vm216_vm9 = vcmp.lt.s32.totalorder %v5856_v25, 2  ;;  %v214_v37 = vor.u32 %v213_v28, %v212_v34  ;;  %vm217_vm10 = vcmp.lt.s32.totalorder %v5856_v25, 3 }
  0x9f   :  { %vm218_vm11 = vcmp.lt.s32.totalorder %v5856_v25, 4  ;;  %v223_v38 = vsel %vm215_vm7, %v202_v12, %v205_v13  ;;  %v138_v18 = vsel %vm136_vm8, %v137_v35, %v5885_v11  ;;  %v227_v42 = vsel %vm215_vm7, %v205_v13, %v208_v32 }
  0xa0   :  { %v220_v40 = vsel %vm218_vm11, %v208_v32, 2102212464  ;;  %v224_v26 = vsel %vm218_vm11, %v211_v36, 920167782  ;;  %v139_v43 = vadd.s32 %v138_v18, %v134_v30  ;;  %v219_v44 = vsel %vm215_vm7, %v199_v14, %v202_v12 }
  0xa1   :  { %v225_v45 = vsel %vm217_vm10, %v208_v32, %v224_v26  ;;  %v228_v46 = vsel %vm218_vm11, %v214_v37, 1326507024  ;;  %v221_v47 = vsel %vm217_vm10, %v205_v13, %v220_v40  ;;  %v529_v50 = vsel %vm528_vm6, %v5853_v21, 0 }
  0xa2   :  { %v226_v48 = vsel %vm216_vm9, %v223_v38, %v225_v45  ;;  %v229_v49 = vsel %vm217_vm10, %v211_v36, %v228_v46  ;;  %v140_v51 = vadd.s32 536870912, %v139_v43  ;;  %v222_v1 = vsel %vm216_vm9, %v219_v44, %v221_v47 }
  0xa3   :  { %v230_v52 = vsel %vm216_vm9, %v227_v42, %v229_v49  ;;  %v5912_v59 = vmul.u32.u64.low %v5850_v19, %v226_v48  ;;  %v5913_v61 = vmul.u32.u64.high %v5850_v19, %v226_v48, %v5912_v59  ;;  %v524_v2 = vand.u32 8388607, %v517_v20 }
  0xa4   :  { %v5916_v62 = vmul.u32.u64.low %v5850_v19, %v230_v52  ;;  %v5917_v63 = vmul.u32.u64.high %v5850_v19, %v230_v52, %v5916_v62  ;;  %v141_v0 = vshrl.u32 %v140_v51, 30  ;;  %v531_v21 = vand.u32 31, %v529_v50 }
  0xa5   :  { %v624_v3 = vand.u32 2139095040, %v5846_v17  ;;  %v241_v5 = vadd.s32 1, %v5913_v61  ;;  %v238_v6 = vmul.u32 %v5850_v19, %v222_v1  ;;  %v525_v11 = vor.u32 8388608, %v524_v2 }
  0xa6   :  { %v142_v4 = vshll.u32 %v141_v0, 30  ;;  %vm240_vm12 = vc.u32 %v5917_v63, %v5912_v59  ;;  %v621_v25 = vand.u32 2147483647, %v5846_v17  ;;  %v532_v13 = vsub.s32 32, %v531_v21 }
  0xa7   :  { %v242_v8 = vsel %vm240_vm12, %v241_v5, %v5913_v61  ;;  %v625_v15 = vshrl.u32 %v624_v3, 23  ;;  %v5932_v14 = vshrl.u32 %v529_v50, 5  ;;  %v5936_v24 = vshll.u32 %v525_v11, 8 }
  0xa8   :  { %v5927_v7 = vsub.s32 %v139_v43, %v142_v4  ;;  %v243_v12 = vadd.s32 %v242_v8, %v238_v6  ;;  %v5940_v28 = vand.u32 8388607, %v621_v25  ;;  %v135_v30 = vadd.s32 %v5884_v10, %v5881_v9 }
  0xa9   :  { %v541_v34 = vshrl.u32 %v5642_v31, %v532_v13  ;;  %v4743_v35 = vadd.s32 4294967169, %v625_v15  ;;  %v535_v38 = vshrl.u32 %v5640_v27, %v532_v13  ;;  %v538_v18 = vshrl.u32 %v5641_v29, %v532_v13 }
  0xaa   :  { %v145_v16 = vsub.s32 0, %v5927_v7  ;;  %v244_v22 = vadd.s32 536870912, %v243_v12  ;;  %vm549_vm15 = vcmp.lt.s32.totalorder %v5932_v14, 1  ;;  %v165_v40 = vsub.s32 4, %v141_v0 }
  0xab   :  { %v540_v10 = vshll.u32 %v5641_v29, %v531_v21  ;;  %v544_v26 = vshrl.u32 %v5643_v33, %v532_v13  ;;  %vm551_vm0 = vcmp.lt.s32.totalorder %v5932_v14, 3  ;;  %v534_v42 = vshll.u32 %v5639_v23, %v531_v21 }
  0xac   :  { %v4724_v19 = vmin.u32 %v145_v16, %v5927_v7  ;;  %v5944_v32 = vshrl.u32 %v244_v22, 30  ;;  %v537_v43 = vshll.u32 %v5640_v27, %v531_v21  ;;  %v543_v44 = vshll.u32 %v5642_v31, %v531_v21 }
  0xad   :  { %vm550_vm1 = vcmp.lt.s32.totalorder %v5932_v14, 2  ;;  %v542_v46 = vor.u32 %v541_v34, %v540_v10  ;;  %v547_v47 = vshrl.u32 %v5644_v41, %v532_v13  ;;  %vm552_vm2 = vcmp.lt.s32.totalorder %v5932_v14, 4 }
  0xae   :  { %v147_v37 = vclz %v4724_v19  ;;  %v246_v9 = vshll.u32 %v5944_v32, 30  ;;  %v536_v48 = vor.u32 %v535_v38, %v534_v42  ;;  %v539_v49 = vor.u32 %v538_v18, %v537_v43  ;;  %v1401_v19 = vld [vmem:[%s8924_s3 + $0x30] sm:$0xff] }
  0xaf   :  { %v545_v50 = vor.u32 %v544_v26, %v543_v44  ;;  %v239_v52 = vadd.s32 %v5912_v59, %v5917_v63  ;;  %v546_v62 = vshll.u32 %v5643_v33, %v531_v21  ;;  %v166_v3 = vsel %vm81_vm13, %v165_v40, %v141_v0 }
  0xb0   :  { %v4725_v58 = vadd.s32 4294967294, %v147_v37  ;;  %v5964_v45 = vsub.s32 %v243_v12, %v246_v9  ;;  %v533_v4 = vshrl.u32 %v5639_v23, %v532_v13  ;;  %vm185_vm4 = vcmp.lt.s32.totalorder %v5828_v54, 0 }
  0xb1   :  { %v548_v8 = vor.u32 %v547_v47, %v546_v62  ;;  %v554_v59 = vsel %vm552_vm2, %v542_v46, 2102212464  ;;  %v557_v21 = vsel %vm549_vm15, %v536_v48, %v539_v49  ;;  %v558_v0 = vsel %vm552_vm2, %v545_v50, 920167782 }
  0xb2   :  { %vm4726_vm3 = vcmp.lt.s32.totalorder %v4725_v58, 0  ;;  %v249_v61 = vsub.s32 0, %v5964_v45  ;;  %v168_v12 = vsel %vm5949_vm14, 0, %v166_v3  ;;  %v269_v13 = vsub.s32 4, %v5944_v32 }
  0xb3   :  { %v150_v51 = vsel %vm4726_vm3, 0, %v4725_v58  ;;  %v553_v15 = vsel %vm549_vm15, %v533_v4, %v536_v48  ;;  %vm5990_vm5 = vcmp.le.f32.partialorder %v183_v60, 0.7853982  ;;  %v561_v34 = vsel %vm549_vm15, %v539_v49, %v542_v46 }
  0xb4   :  { %v151_v1 = vsub.s32 32, %v150_v51  ;;  %v155_v2 = vsub.s32 4294967266, %v150_v51  ;;  %v152_v5 = vshll.u32 %v5927_v7, %v150_v51  ;;  %v4728_v6 = vmin.u32 %v249_v61, %v5964_v45 }
  0xb5   :  { %v555_v38 = vsel %vm551_vm0, %v539_v49, %v554_v59  ;;  %v562_v40 = vsel %vm552_vm2, %v548_v8, 1326507024  ;;  %v631_v26 = vadd.s32 1, %v4743_v35  ;;  %v172_v61 = vadd.s32 3, %v168_v12 }
  0xb6   :  { %v153_v63 = vshrl.u32 %v135_v30, %v151_v1  ;;  %v156_v11 = vadd.s32 127, %v155_v2  ;;  %v251_v7 = vclz %v4728_v6  ;;  %v559_v30 = vsel %vm551_vm0, %v542_v46, %v558_v0 }
  0xb7   :  { %v560_v18 = vsel %vm550_vm1, %v557_v21, %v559_v30  ;;  %v563_v10 = vsel %vm551_vm0, %v545_v50, %v562_v40  ;;  %v556_v35 = vsel %vm550_vm1, %v553_v15, %v555_v38  ;;  %vm632_vm7 = vcmp.gt.s32.totalorder %v631_v26, 0 }
  0xb8   :  { %v154_v16 = vor.u32 %v153_v63, %v152_v5  ;;  %v157_v22 = vshll.u32 %v156_v11, 23  ;;  %v4729_v37 = vadd.s32 4294967294, %v251_v7  ;;  %v564_v58 = vsel %vm550_vm1, %v561_v34, %v563_v10 }
  0xb9   :  { %v6009_v42 = vmul.u32.u64.low %v5936_v24, %v560_v18  ;;  %v6010_v43 = vmul.u32.u64.high %v5936_v24, %v560_v18, %v6009_v42  ;;  %v6014_v47 = vmul.u32.u64.low %v5936_v24, %v564_v58  ;;  %v6015_v48 = vmul.u32.u64.high %v5936_v24, %v564_v58, %v6014_v47 }
  0xba   :  { %v158_v60 = vor.u32 4788187, %v157_v22  ;;  %v161_v9 = vcvt.s32.f32 %v154_v16  ;;  %vm4730_vm6 = vcmp.lt.s32.totalorder %v4729_v37, 0  ;;  %v270_v62 = vsel %vm185_vm4, %v269_v13, %v5944_v32  ;;  %v1396_v16 = vld [vmem:[%s8924_s3 + $0x8] sm:$0xff] }
  0xbb   :  { %v254_v46 = vsel %vm4730_vm6, 0, %v4729_v37  ;;  %v633_v1 = vsel %vm632_vm7, %v631_v26, 0  ;;  %v575_v5 = vadd.s32 1, %v6010_v43  ;;  %v572_v8 = vmul.u32 %v5936_v24, %v556_v35  ;;  %1410 = vperm.xlu1 %5106, %v1396_v16  }
  0xbc   :  { %v159_v44 = vand.u32 2147483647, %v158_v60  ;;  %v255_v49 = vsub.s32 32, %v254_v46  ;;  %v259_v51 = vsub.s32 4294967266, %v254_v46  ;;  %v256_v2 = vshll.u32 %v5964_v45, %v254_v46  ;;  %v1397_v60 = vld [vmem:[%s8924_s3 + $0x10] sm:$0xff] }
  0xbd   :  { %vm574_vm8 = vc.u32 %v6015_v48, %v6009_v42  ;;  %v635_v14 = vand.u32 31, %v633_v1  ;;  %v272_v11 = vsel %vm5990_vm5, 0, %v270_v62  ;;  %v629_v21 = vor.u32 8388608, %v5940_v28 }
  0xbe   :  { %v162_v50 = vmul.f32 %v161_v9, %v159_v44  ;;  %v257_v3 = vshrl.u32 %v239_v52, %v255_v49  ;;  %v260_v4 = vadd.s32 127, %v259_v51  ;;  %v576_v32 = vsel %vm574_vm8, %v575_v5, %v6010_v43 }
  0xbf   :  { %v577_v52 = vadd.s32 %v576_v32, %v572_v8  ;;  %v636_v0 = vsub.s32 32, %v635_v14  ;;  %v6036_v7 = vand.u32 3, %v172_v61  ;;  %v6038_v15 = vand.u32 3, %v168_v12  ;;  %1415 = vperm.xlu1 %5106, %v1397_v60   ;;  %v1399_v61 = vld [vmem:[%s8924_s3 + $0x20] sm:$0xff] }
  0xc0   :  { %v163_v6 = vxor.u32 2147483648, %v162_v50  ;;  %v258_v59 = vor.u32 %v257_v3, %v256_v2  ;;  %v261_v63 = vshll.u32 %v260_v4, 23  ;;  %v276_v22 = vadd.s32 3, %v272_v11 }
  0xc1   :  { %v6043_v30 = vand.u32 3, %v272_v11  ;;  %v578_v34 = vadd.s32 536870912, %v577_v52  ;;  %v6045_v36 = vshrl.u32 %v633_v1, 5  ;;  %v639_v12 = vshrl.u32 %v5640_v27, %v636_v0 }
  0xc2   :  { %v164_v45 = vsel %vm81_vm13, %v163_v6, %v162_v50  ;;  %v262_v13 = vor.u32 4788187, %v261_v63  ;;  %v265_v37 = vcvt.s32.f32 %v258_v59  ;;  %v642_v18 = vshrl.u32 %v5641_v29, %v636_v0 }
  0xc3   :  { %v167_v24 = vsel %vm5949_vm14, %v5826_v53, %v164_v45  ;;  %v6047_v38 = vshrl.u32 %v578_v34, 30  ;;  %v645_v40 = vshrl.u32 %v5642_v31, %v636_v0  ;;  %v644_v10 = vshll.u32 %v5641_v29, %v635_v14  ;;  %1425 = vperm.xlu1 %5106, %v1399_v61  }
  0xc4   :  { %5108 = vcosq.f32 %v167_v24  ;;  %v263_v28 = vand.u32 2147483647, %v262_v13  ;;  %v647_v26 = vshll.u32 %v5642_v31, %v635_v14  ;;  %v648_v58 = vshrl.u32 %v5643_v33, %v636_v0 }
  0xc5   :  { %5110 = vsinq.f32 %v167_v24  ;;  %vm178_vm9 = vcmp.eq.s32.totalorder %v6036_v7, 2  ;;  %vm387_vm10 = vcmp.eq.s32.totalorder %v6038_v15, 2  ;;  %v580_v43 = vshll.u32 %v6047_v38, 30 }
  0xc6   :  { %v266_v9 = vmul.f32 %v265_v37, %v263_v28  ;;  %v638_v44 = vshll.u32 %v5639_v23, %v635_v14  ;;  %v641_v46 = vshll.u32 %v5640_v27, %v635_v14  ;;  %v651_v47 = vshrl.u32 %v5644_v41, %v636_v0 }
  0xc7   :  { %vm175_vm11 = vcmp.eq.s32.totalorder %v6036_v7, 0  ;;  %vm384_vm12 = vcmp.eq.s32.totalorder %v6038_v15, 0  ;;  %v646_v51 = vor.u32 %v645_v40, %v644_v10  ;;  %v649_v35 = vor.u32 %v648_v58, %v647_v26  ;;  %1435 = vperm.xlu1 %5106, %v1401_v19  }
  0xc8   :  { %v267_v49 = vxor.u32 2147483648, %v266_v9  ;;  %v650_v50 = vshll.u32 %v5643_v33, %v635_v14  ;;  %vm174_vm13 = vcmp.lt.s32.totalorder %v6036_v7, 2  ;;  %v6071_v62 = vand.u32 3, %v276_v22 }
  0xc9   :  { %vm383_vm14 = vcmp.lt.s32.totalorder %v6038_v15, 2  ;;  %v6074_v1 = vsub.s32 %v577_v52, %v580_v43  ;;  %v640_v2 = vor.u32 %v639_v12, %v638_v44  ;;  %v643_v3 = vor.u32 %v642_v18, %v641_v46 }
  0xca   :  { %vm171_vm15 = vweird.f32 %v5826_v53  ;;  %v268_v4 = vsel %vm185_vm4, %v267_v49, %v266_v9  ;;  %v652_v5 = vor.u32 %v651_v47, %v650_v50  ;;  %vm653_vm0 = vcmp.lt.s32.totalorder %v6045_v36, 1  ;;  %v1797_v9 = vld [vmem:[%s8926_s5] sm:$0xff] }
  0xcb   :  { %v6080_v6 = vshll.u32 %v629_v21, 8  ;;  %v271_v8 = vsel %vm5990_vm5, %v5828_v54, %v268_v4  ;;  %v583_v14 = vsub.s32 0, %v6074_v1  ;;  %v637_v59 = vshrl.u32 %v5639_v23, %v636_v0  ;;  %1807 = vperm.xlu1 %5106, %v1797_v9  }
  0xcc   :  { %vm656_vm1 = vcmp.lt.s32.totalorder %v6045_v36, 4  ;;  %5112 = vcosq.f32 %v271_v8  ;;  %vm655_vm2 = vcmp.lt.s32.totalorder %v6045_v36, 3  ;;  %v661_v52 = vsel %vm653_vm0, %v640_v2, %v643_v3 }
  0xcd   :  { %v658_v63 = vsel %vm656_vm1, %v646_v51, 2102212464  ;;  %v662_v11 = vsel %vm656_vm1, %v649_v35, 920167782  ;;  %5114 = vsinq.f32 %v271_v8  ;;  %v4740_v45 = vmin.u32 %v583_v14, %v6074_v1 }
  0xce   :  { %v5109_v32 = vpop.eup %5108  ;;  %v663_v21 = vsel %vm655_vm2, %v646_v51, %v662_v11  ;;  %vm654_vm3 = vcmp.lt.s32.totalorder %v6045_v36, 2  ;;  %v665_v13 = vsel %vm653_vm0, %v643_v3, %v646_v51  ;;  %v666_v16 = vsel %vm656_vm1, %v652_v5, 1326507024 }
  0xcf   :  { %v5111_v0 = vpop.eup %5110  ;;  %v179_v24 = vxor.u32 2147483648, %v5109_v32  ;;  %vm519_vm4 = vcmp.lt.s32.totalorder %v5830_v55, 0  ;;  %v585_v34 = vclz %v4740_v45  ;;  %v657_v28 = vsel %vm653_vm0, %v637_v59, %v640_v2  ;;  %v1799_v2 = vld [vmem:[%s8926_s5 + $0x10] sm:$0xff] }
  0xd0   :  { %v176_v22 = vxor.u32 2147483648, %v5111_v0  ;;  %v659_v37 = vsel %vm655_vm2, %v643_v3, %v658_v63  ;;  %v664_v40 = vsel %vm654_vm3, %v661_v52, %v663_v21  ;;  %v667_v60 = vsel %vm655_vm2, %v649_v35, %v666_v16  ;;  %1817 = vperm.xlu1 %5106, %v1799_v2  }
  0xd1   :  { %v180_v12 = vsel %vm178_vm9, %v179_v24, %v5111_v0  ;;  %v389_v18 = vsel %vm387_vm10, %v179_v24, %v5111_v0  ;;  %vm487_vm5 = vcmp.eq.s32.totalorder %v6043_v30, 0  ;;  %v4741_v58 = vadd.s32 4294967294, %v585_v34 }
  0xd2   :  { %v177_v10 = vsel %vm175_vm11, %v5109_v32, %v176_v22  ;;  %v386_v26 = vsel %vm384_vm12, %v5109_v32, %v176_v22  ;;  %v668_v43 = vsel %vm654_vm3, %v665_v13, %v667_v60  ;;  %vm486_vm6 = vcmp.lt.s32.totalorder %v6043_v30, 2 }
  0xd3   :  { %v181_v44 = vsel %vm174_vm13, %v177_v10, %v180_v12  ;;  %v390_v46 = vsel %vm383_vm14, %v386_v26, %v389_v18  ;;  %v6135_v47 = vmul.u32.u64.low %v6080_v6, %v668_v43  ;;  %v6136_v49 = vmul.u32.u64.high %v6080_v6, %v668_v43, %v6135_v47 }
  0xd4   :  { %v6140_v51 = vsel %vm171_vm15, nan, %v181_v44  ;;  %vm275_vm7 = vweird.f32 %v5828_v54  ;;  %v6145_v35 = vsel %vm171_vm15, nan, %v390_v46  ;;  %vm490_vm8 = vcmp.eq.s32.totalorder %v6043_v30, 2 }
  0xd5   :  { %vm4742_vm9 = vcmp.lt.s32.totalorder %v4741_v58, 0  ;;  %v603_v15 = vsub.s32 4, %v6047_v38  ;;  %v6150_v50 = vmul.u32.u64.low %v6080_v6, %v664_v40  ;;  %v6151_v61 = vmul.u32.u64.high %v6080_v6, %v664_v40, %v6150_v50 }
  0xd6   :  { %v588_v7 = vsel %vm4742_vm9, 0, %v4741_v58  ;;  %v573_v53 = vadd.s32 %v6009_v42, %v6015_v48  ;;  %v660_v5 = vsel %vm654_vm3, %v657_v28, %v659_v37  ;;  %v5113_v8 = vpop.eup %5112  ;;  %vm278_vm10 = vcmp.lt.s32.totalorder %v6071_v62, 2 }
  0xd7   :  { %v589_v3 = vsub.s32 32, %v588_v7  ;;  %v593_v4 = vsub.s32 4294967266, %v588_v7  ;;  %vm279_vm11 = vcmp.eq.s32.totalorder %v6071_v62, 0  ;;  %vm282_vm12 = vcmp.eq.s32.totalorder %v6071_v62, 2  ;;  %v5115_v59 = vpop.eup %5114  ;;  %v1803_v62 = vld [vmem:[%s8926_s5 + $0x30] sm:$0xff] }
  0xd8   :  { %v590_v14 = vshll.u32 %v6074_v1, %v588_v7  ;;  %v283_v63 = vxor.u32 2147483648, %v5113_v8  ;;  %vm678_vm13 = vc.u32 %v6136_v49, %v6150_v50  ;;  %v280_v42 = vxor.u32 2147483648, %v5115_v59  ;;  %v1801_v1 = vld [vmem:[%s8926_s5 + $0x20] sm:$0xff] }
  0xd9   :  { %v591_v11 = vshrl.u32 %v573_v53, %v589_v3  ;;  %v594_v19 = vadd.s32 127, %v593_v4  ;;  %v604_v48 = vsel %vm519_vm4, %v603_v15, %v6047_v38  ;;  %v676_v36 = vmul.u32 %v6080_v6, %v660_v5  ;;  %1827 = vperm.xlu1 %5106, %v1801_v1  }
  0xda   :  { %v679_v32 = vadd.s32 1, %v6151_v61  ;;  %v284_v45 = vsel %vm282_vm12, %v283_v63, %v5115_v59  ;;  %v492_v52 = vsel %vm490_vm8, %v283_v63, %v5115_v59  ;;  %v281_v24 = vsel %vm279_vm11, %v5113_v8, %v280_v42 }
  0xdb   :  { %v592_v21 = vor.u32 %v591_v11, %v590_v14  ;;  %v595_v0 = vshll.u32 %v594_v19, 23  ;;  %v489_v38 = vsel %vm487_vm5, %v5113_v8, %v280_v42  ;;  %v958_v13 = vand.u32 2139095040, %v5832_v56  ;;  %v4797_v11 = vld [vmem:[%s8926_s5 + $0x50] sm:$0xff] }
  0xdc   :  { %v680_v6 = vsel %vm678_vm13, %v679_v32, %v6151_v61  ;;  %v285_v16 = vsel %vm278_vm10, %v281_v24, %v284_v45  ;;  %v493_v22 = vsel %vm486_vm6, %v489_v38, %v492_v52  ;;  %v955_v28 = vand.u32 2147483647, %v5832_v56  ;;  %v4799_v38 = vld [vmem:[%s8926_s5 + $0x60] sm:$0xff] }
  0xdd   :  { %v596_v34 = vor.u32 4788187, %v595_v0  ;;  %v6190_v37 = vsel %vm275_vm7, nan, %v285_v16  ;;  %v6194_v12 = vsel %vm275_vm7, nan, %v493_v22  ;;  %v681_v18 = vadd.s32 %v680_v6, %v676_v36  ;;  %1837 = vperm.xlu1 %5106, %v1803_v62  }
  0xde   :  { %v959_v40 = vshrl.u32 %v958_v13, 23  ;;  %vm6201_vm14 = vcmp.le.f32.partialorder %v517_v20, 0.7853982  ;;  %v599_v9 = vcvt.s32.f32 %v592_v21  ;;  %v1062_v58 = vand.u32 2139095040, %v5834_v57  ;;  %v4795_v20 = vld [vmem:[%s8926_s5 + $0x40] sm:$0xff] }
  0xdf   :  { %v597_v60 = vand.u32 2147483647, %v596_v34  ;;  %v606_v10 = vsel %vm6201_vm14, 0, %v604_v48  ;;  %v682_v54 = vadd.s32 536870912, %v681_v18  ;;  %v962_v46 = vand.u32 8388607, %v955_v28 }
  0xe0   :  { %v4755_v26 = vadd.s32 4294967169, %v959_v40  ;;  %v610_v15 = vadd.s32 3, %v606_v10  ;;  %v1063_v2 = vshrl.u32 %v1062_v58, 23  ;;  %v5645_v53 = vmov 0.0   ;;  %v4801_v58 = vld [vmem:[%s8926_s5 + $0x70] sm:$0xff] }
  0xe1   :  { %v600_v43 = vmul.f32 %v599_v9, %v597_v60  ;;  %v683_v44 = vshrl.u32 %v682_v54, 30  ;;  %48 = vst [vmem:[#allocation2 + $0x8] sm:$0xff] %v5645_v53  ;;  %47 = vst [vmem:[#allocation2] sm:$0xff] %v5645_v53  ;;  %1532 = vmatprep.mubr.f32.mxu0 %v5645_v53  ;;  %1934 = vmatprep.mubr.f32.mxu1 %v5645_v53  ;;  %v50_v5 = vcombine.high %v5816_v39, %v5816_v39 }
  0xe2   :  { %v965_v47 = vadd.s32 1, %v4755_v26  ;;  %52 = vst [vmem:[#allocation2] sm:$0x7] %v5816_v39  ;;  %2211 = vperm.xlu1 %5106, %v4795_v20   ;;  %v963_v59 = vor.u32 8388608, %v962_v46  ;;  %v1059_v63 = vand.u32 2147483647, %v5834_v57  ;;  %v677_v1 = vadd.s32 %v6150_v50, %v6136_v49 }
  0xe3   :  { %v601_v7 = vxor.u32 2147483648, %v600_v43  ;;  %v684_v61 = vshll.u32 %v683_v44, 30  ;;  %v6231_v19 = vand.u32 3, %v610_v15  ;;  %v6233_v42 = vand.u32 3, %v606_v10  ;;  %53 = vst [vmem:[#allocation2 + $0x8] sm:$0x7] %v50_v5 }
  0xe4   :  { %vm966_vm15 = vcmp.gt.s32.totalorder %v965_v47, 0  ;;  %v707_v36 = vsub.s32 4, %v683_v44  ;;  %v4759_v32 = vadd.s32 4294967169, %v1063_v2  ;;  %vm623_vm0 = vcmp.lt.s32.totalorder %v5846_v17, 0 }
  0xe5   :  { %v602_v3 = vsel %vm519_vm4, %v601_v7, %v600_v43  ;;  %v967_v4 = vsel %vm966_vm15, %v965_v47, 0  ;;  %v6225_v14 = vsub.s32 %v681_v18, %v684_v61  ;;  %v6242_v0 = vshll.u32 %v963_v59, 8  ;;  %v2598_v59 = vld [vmem:[%s8928_s7] sm:$0xff] }
  0xe6   :  { %v605_v8 = vsel %vm6201_vm14, %v5830_v55, %v602_v3  ;;  %v969_v39 = vand.u32 31, %v967_v4  ;;  %2221 = vperm.xlu1 %5106, %v4797_v11   ;;  %v6240_v21 = vshrl.u32 %v967_v4, 5  ;;  %v6246_v24 = vand.u32 8388607, %v1059_v63 }
  0xe7   :  { %5116 = vcosq.f32 %v605_v8  ;;  %v687_v48 = vsub.s32 0, %v6225_v14  ;;  %vm616_vm1 = vcmp.eq.s32.totalorder %v6231_v19, 2  ;;  %vm825_vm2 = vcmp.eq.s32.totalorder %v6233_v42, 2 }
  0xe8   :  { %5118 = vsinq.f32 %v605_v8  ;;  %v970_v45 = vsub.s32 32, %v969_v39  ;;  %v972_v49 = vshll.u32 %v5639_v23, %v969_v39  ;;  %v975_v6 = vshll.u32 %v5640_v27, %v969_v39 }
  0xe9   :  { %v4744_v52 = vmin.u32 %v687_v48, %v6225_v14  ;;  %vm613_vm3 = vcmp.eq.s32.totalorder %v6231_v19, 0  ;;  %v6260_v22 = vsel %vm623_vm0, %v707_v36, %v683_v44  ;;  %vm822_vm4 = vcmp.eq.s32.totalorder %v6233_v42, 0 }
  0xea   :  { %v973_v50 = vshrl.u32 %v5640_v27, %v970_v45  ;;  %v976_v13 = vshrl.u32 %v5641_v29, %v970_v45  ;;  %v978_v34 = vshll.u32 %v5641_v29, %v969_v39  ;;  %v6264_v18 = vadd.s32 1, %v4759_v32  ;;  %2231 = vperm.xlu1 %5106, %v4799_v38  }
  0xeb   :  { %v689_v16 = vclz %v4744_v52  ;;  %vm612_vm5 = vcmp.lt.s32.totalorder %v6231_v19, 2  ;;  %vm821_vm6 = vcmp.lt.s32.totalorder %v6233_v42, 2  ;;  %v971_v40 = vshrl.u32 %v5639_v23, %v970_v45 }
  0xec   :  { %v974_v62 = vor.u32 %v973_v50, %v972_v49  ;;  %v977_v30 = vor.u32 %v976_v13, %v975_v6  ;;  %v979_v60 = vshrl.u32 %v5642_v31, %v970_v45  ;;  %vm609_vm7 = vweird.f32 %v5830_v55 }
  0xed   :  { %v4745_v9 = vadd.s32 4294967294, %v689_v16  ;;  %v981_v10 = vshll.u32 %v5642_v31, %v969_v39  ;;  %v982_v54 = vshrl.u32 %v5643_v33, %v970_v45  ;;  %v985_v26 = vshrl.u32 %v5644_v41, %v970_v45 }
  0xee   :  { %v980_v43 = vor.u32 %v979_v60, %v978_v34  ;;  %v984_v44 = vshll.u32 %v5643_v33, %v969_v39  ;;  %vm987_vm8 = vcmp.lt.s32.totalorder %v6240_v21, 1  ;;  %vm988_vm9 = vcmp.lt.s32.totalorder %v6240_v21, 2  ;;  %2241 = vperm.xlu1 %5106, %v4801_v58   ;;  %v1373_v58 = vld [vmem:[#allocation2] sm:$0xff] }
  0xef   :  { %vm4746_vm10 = vcmp.lt.s32.totalorder %v4745_v9, 0  ;;  %v983_v46 = vor.u32 %v982_v54, %v981_v10  ;;  %vm989_vm11 = vcmp.lt.s32.totalorder %v6240_v21, 3  ;;  %vm990_vm12 = vcmp.lt.s32.totalorder %v6240_v21, 4  ;;  %v3125_v21 = vld [vmem:[%s8931_s10] sm:$0xff] }
  0xf0   :  { %v692_v20 = vsel %vm4746_vm10, 0, %v4745_v9  ;;  %v986_v7 = vor.u32 %v985_v26, %v984_v44  ;;  %v991_v15 = vsel %vm987_vm8, %v971_v40, %v974_v62  ;;  %v992_v61 = vsel %vm990_vm12, %v980_v43, 2102212464  ;;  %v2600_v40 = vld [vmem:[%s8928_s7 + $0x10] sm:$0xff]  ;;  %v1374_v26 = vld [vmem:[#allocation2 + $0x8] sm:$0xff] }
  0xf1   :  { %v5117_v47 = vpop.eup %5116  ;;  %v693_v4 = vsub.s32 32, %v692_v20  ;;  %v697_v5 = vsub.s32 4294967266, %v692_v20  ;;  %v995_v8 = vsel %vm987_vm8, %v974_v62, %v977_v30  ;;  %v694_v39 = vshll.u32 %v6225_v14, %v692_v20 }
  0xf2   :  { %v5119_v2 = vpop.eup %5118  ;;  %v617_v3 = vxor.u32 2147483648, %v5117_v47  ;;  %v993_v48 = vsel %vm989_vm11, %v977_v30, %v992_v61  ;;  %v996_v36 = vsel %vm990_vm12, %v983_v46, 920167782  ;;  %v999_v6 = vsel %vm987_vm8, %v977_v30, %v980_v43  ;;  %2604 = vperm.xlu1 %5106, %v2598_v59  }
  0xf3   :  { %v614_v11 = vxor.u32 2147483648, %v5119_v2  ;;  %v695_v45 = vshrl.u32 %v677_v1, %v693_v4  ;;  %v698_v52 = vadd.s32 127, %v697_v5  ;;  %v997_v50 = vsel %vm989_vm11, %v980_v43, %v996_v36 }
  0xf4   :  { %v618_v32 = vsel %vm616_vm1, %v617_v3, %v5119_v2  ;;  %v827_v38 = vsel %vm825_vm2, %v617_v3, %v5119_v2  ;;  %v998_v19 = vsel %vm988_vm9, %v995_v8, %v997_v50  ;;  %v1000_v60 = vsel %vm990_vm12, %v986_v7, 1326507024 }
  0xf5   :  { %v615_v49 = vsel %vm613_vm3, %v5117_v47, %v614_v11  ;;  %v824_v14 = vsel %vm822_vm4, %v5117_v47, %v614_v11  ;;  %v696_v13 = vor.u32 %v695_v45, %v694_v39  ;;  %v699_v16 = vshll.u32 %v698_v52, 23 }
  0xf6   :  { %v619_v1 = vsel %vm612_vm5, %v615_v49, %v618_v32  ;;  %v828_v34 = vsel %vm821_vm6, %v824_v14, %v827_v38  ;;  %v994_v10 = vsel %vm988_vm9, %v991_v15, %v993_v48  ;;  %v1001_v54 = vsel %vm989_vm11, %v983_v46, %v1000_v60  ;;  %2614 = vperm.xlu1 %5106, %v2600_v40  }
  0xf7   :  { %v6317_v62 = vsel %vm609_vm7, nan, %v619_v1  ;;  %v829_v30 = vsel %vm609_vm7, nan, %v828_v34  ;;  %v700_v9 = vor.u32 4788187, %v699_v16  ;;  %v703_v42 = vcvt.s32.f32 %v696_v13  ;;  %v3129_v13 = vld [vmem:[%s8931_s10 + $0x20] sm:$0xff] }
  0xf8   :  { %v1002_v55 = vsel %vm988_vm9, %v999_v6, %v1001_v54  ;;  %v6332_v43 = vmul.u32.u64.low %v6242_v0, %v998_v19  ;;  %v6333_v44 = vmul.u32.u64.high %v6242_v0, %v998_v19, %v6332_v43  ;;  %vm1070_vm13 = vcmp.gt.s32.totalorder %v6264_v18, 0 }
  0xf9   :  { %v701_v47 = vand.u32 2147483647, %v700_v9  ;;  %v6338_v20 = vmul.u32.u64.low %v6242_v0, %v1002_v55  ;;  %v6339_v7 = vmul.u32.u64.high %v6242_v0, %v1002_v55, %v6338_v20  ;;  %v1071_v46 = vsel %vm1070_vm13, %v6264_v18, 0 }
  0xfa   :  { %vm6347_vm14 = vcmp.le.f32.partialorder %v621_v25, 0.7853982  ;;  %v1073_v61 = vand.u32 31, %v1071_v46  ;;  %v6352_v2 = vpack.c.bf16 %v6190_v37, %v1374_v26  ;;  %v6355_v3 = vpack.c.bf16 %v6140_v51, %v1373_v58  ;;  %3135 = vperm.xlu1 %5106, %v3125_v21  }
  0xfb   :  { %v704_v4 = vmul.f32 %v703_v42, %v701_v47  ;;  %v710_v18 = vsel %vm6347_vm14, 0, %v6260_v22  ;;  %v1067_v5 = vor.u32 8388608, %v6246_v24  ;;  %v6362_v8 = vpack.c.bf16 %v829_v30, %v6145_v35  ;;  %v3127_v35 = vld [vmem:[%s8931_s10 + $0x10] sm:$0xff] }
  0xfc   :  { %v1010_v25 = vmul.u32 %v6242_v0, %v994_v10  ;;  %v1013_v59 = vadd.s32 1, %v6333_v44  ;;  %v6366_v11 = vshrl.u32 %v1071_v46, 5  ;;  %v1074_v37 = vsub.s32 32, %v1073_v61  ;;  %4908 = vmatprep.subr.bf16.mxu0 %v6352_v2 }
  0xfd   :  { %v705_v51 = vxor.u32 2147483648, %v704_v4  ;;  %vm1012_vm15 = vc.u32 %v6339_v7, %v6332_v43  ;;  %v1076_v22 = vshll.u32 %v5639_v23, %v1073_v61  ;;  %v1079_v24 = vshll.u32 %v5640_v27, %v1073_v61  ;;  %4910 = vmatpush1.bf16.msra.mxu0 %v6355_v3 }
  0xfe   :  { %v1014_v0 = vsel %vm1012_vm15, %v1013_v59, %v6333_v44  ;;  %v1077_v39 = vshrl.u32 %v5640_v27, %v1074_v37  ;;  %v1080_v48 = vshrl.u32 %v5641_v29, %v1074_v37  ;;  %v1082_v36 = vshll.u32 %v5641_v29, %v1073_v61  ;;  %3145 = vperm.xlu1 %5106, %v3127_v35   ;;  %v4841_v59 = vld [vmem:[%s8926_s5 + $0x80] sm:$0xff] }
  0xff   :  { %v706_v32 = vsel %vm623_vm0, %v705_v51, %v704_v4  ;;  %v1015_v45 = vadd.s32 %v1014_v0, %v1010_v25  ;;  %v1083_v52 = vshrl.u32 %v5642_v31, %v1074_v37  ;;  %v1085_v38 = vshll.u32 %v5642_v31, %v1073_v61 }
 0x100   :  { %v709_v49 = vsel %vm6347_vm14, %v5846_v17, %v706_v32  ;;  %v1078_v14 = vor.u32 %v1077_v39, %v1076_v22  ;;  %v1081_v50 = vor.u32 %v1080_v48, %v1079_v24  ;;  %v1086_v27 = vshrl.u32 %v5643_v33, %v1074_v37 }
 0x101   :  { %5120 = vcosq.f32 %v709_v49  ;;  %v1016_v6 = vadd.s32 536870912, %v1015_v45  ;;  %v1084_v29 = vor.u32 %v1083_v52, %v1082_v36  ;;  %v6389_v1 = vshll.u32 %v1067_v5, 8  ;;  %v4843_v36 = vld [vmem:[%s8926_s5 + $0x90] sm:$0xff] }
 0x102   :  { %5122 = vsinq.f32 %v709_v49  ;;  %v1087_v31 = vor.u32 %v1086_v27, %v1085_v38  ;;  %v1088_v16 = vshll.u32 %v5643_v33, %v1073_v61  ;;  %v1089_v34 = vshrl.u32 %v5644_v41, %v1074_v37  ;;  %3155 = vperm.xlu1 %5106, %v3129_v13   ;;  %v3131_v33 = vld [vmem:[%s8931_s10 + $0x30] sm:$0xff]  ;;  %v4845_v13 = vld [vmem:[%s8926_s5 + $0xa0] sm:$0xff] }
 0x103   :  { %v714_v40 = vadd.s32 3, %v710_v18  ;;  %v923_v30 = vand.u32 3, %v710_v18  ;;  %v6396_v19 = vshrl.u32 %v1016_v6, 30  ;;  %vm1091_vm0 = vcmp.lt.s32.totalorder %v6366_v11, 1 }
 0x104   :  { %v1075_v60 = vshrl.u32 %v5639_v23, %v1074_v37  ;;  %v1090_v9 = vor.u32 %v1089_v34, %v1088_v16  ;;  %vm1094_vm1 = vcmp.lt.s32.totalorder %v6366_v11, 4  ;;  %v1099_v42 = vsel %vm1091_vm0, %v1078_v14, %v1081_v50 }
 0x105   :  { %v1018_v41 = vshll.u32 %v6396_v19, 30  ;;  %vm1093_vm2 = vcmp.lt.s32.totalorder %v6366_v11, 3  ;;  %v1096_v10 = vsel %vm1094_vm1, %v1084_v29, 2102212464  ;;  %v1100_v54 = vsel %vm1094_vm1, %v1087_v31, 920167782 }
 0x106   :  { %vm1092_vm3 = vcmp.lt.s32.totalorder %v6366_v11, 2  ;;  %v1101_v23 = vsel %vm1093_vm2, %v1084_v29, %v1100_v54  ;;  %v1103_v26 = vsel %vm1091_vm0, %v1081_v50, %v1084_v29  ;;  %v1104_v58 = vsel %vm1094_vm1, %v1090_v9, 1326507024  ;;  %3165 = vperm.xlu1 %5106, %v3131_v33   ;;  %v4847_v33 = vld [vmem:[%s8926_s5 + $0xb0] sm:$0xff] }
 0x107   :  { %v1019_v55 = vsub.s32 %v1015_v45, %v1018_v41  ;;  %v1095_v44 = vsel %vm1091_vm0, %v1075_v60, %v1078_v14  ;;  %v1102_v47 = vsel %vm1092_vm3, %v1099_v42, %v1101_v23  ;;  %v1105_v20 = vsel %vm1093_vm2, %v1087_v31, %v1104_v58 }
 0x108   :  { %v1097_v46 = vsel %vm1093_vm2, %v1081_v50, %v1096_v10  ;;  %v1106_v21 = vsel %vm1092_vm3, %v1103_v26, %v1105_v20  ;;  %v6418_v15 = vmul.u32.u64.low %v6389_v1, %v1102_v47  ;;  %v6419_v61 = vmul.u32.u64.high %v6389_v1, %v1102_v47, %v6418_v15 }
 0x109   :  { %v715_v4 = vand.u32 3, %v714_v40  ;;  %v1021_v18 = vsub.s32 0, %v1019_v55  ;;  %v6423_v5 = vmul.u32.u64.low %v6389_v1, %v1106_v21  ;;  %v6424_v25 = vmul.u32.u64.high %v6389_v1, %v1106_v21, %v6423_v5 }
 0x10a   :  { %vm924_vm4 = vcmp.lt.s32.totalorder %v923_v30, 2  ;;  %v1098_v22 = vsel %vm1092_vm3, %v1095_v44, %v1097_v46  ;;  %vm925_vm5 = vcmp.eq.s32.totalorder %v923_v30, 0  ;;  %vm928_vm6 = vcmp.eq.s32.totalorder %v923_v30, 2  ;;  %3417 = vperm.xlu1 %5106, %v4841_v59   ;;  %v4867_v46 = vld [vmem:[%s8926_s5 + $0xd0] sm:$0xff]  ;;  %v4869_v59 = vld [vmem:[%s8926_s5 + $0xe0] sm:$0xff] }
 0x10b   :  { %v5121_v37 = vpop.eup %5120  ;;  %v4756_v51 = vmin.u32 %v1021_v18, %v1019_v55  ;;  %v1117_v0 = vadd.s32 1, %v6419_v61  ;;  %vm716_vm7 = vcmp.lt.s32.totalorder %v715_v4, 2  ;;  %vm720_vm8 = vcmp.eq.s32.totalorder %v715_v4, 2 }
 0x10c   :  { %v5123_v24 = vpop.eup %5122  ;;  %v721_v35 = vxor.u32 2147483648, %v5121_v37  ;;  %vm717_vm9 = vcmp.eq.s32.totalorder %v715_v4, 0  ;;  %v1114_v11 = vmul.u32 %v6389_v1, %v1098_v22  ;;  %vm1116_vm10 = vc.u32 %v6424_v25, %v6418_v15 }
 0x10d   :  { %v718_v39 = vxor.u32 2147483648, %v5123_v24  ;;  %v1023_v48 = vclz %v4756_v51  ;;  %vm713_vm11 = vweird.f32 %v5846_v17  ;;  %v1118_v27 = vsel %vm1116_vm10, %v1117_v0, %v6419_v61 }
 0x10e   :  { %v722_v32 = vsel %vm720_vm8, %v721_v35, %v5123_v24  ;;  %v930_v45 = vsel %vm928_vm6, %v721_v35, %v5123_v24  ;;  %3427 = vperm.xlu1 %5106, %v4843_v36   ;;  %v1119_v1 = vadd.s32 %v1118_v27, %v1114_v11  ;;  %v1011_v17 = vadd.s32 %v6332_v43, %v6339_v7  ;;  %v4865_v7 = vld [vmem:[%s8926_s5 + $0xc0] sm:$0xff] }
 0x10f   :  { %v719_v52 = vsel %vm717_vm9, %v5121_v37, %v718_v39  ;;  %v927_v38 = vsel %vm925_vm5, %v5121_v37, %v718_v39  ;;  %v4757_v49 = vadd.s32 4294967294, %v1023_v48  ;;  %v1041_v44 = vsub.s32 4, %v6396_v19  ;;  %v4889_v11 = vld [vmem:[%s8926_s5 + $0x100] sm:$0xff] }
 0x110   :  { %v723_v14 = vsel %vm716_vm7, %v719_v52, %v722_v32  ;;  %v931_v50 = vsel %vm924_vm4, %v927_v38, %v930_v45  ;;  %v1120_v40 = vadd.s32 536870912, %v1119_v1  ;;  %vm957_vm13 = vcmp.lt.s32.totalorder %v5832_v56, 0 }
 0x111   :  { %v6441_v6 = vsel %vm713_vm11, nan, %v723_v14  ;;  %v6443_v29 = vsel %vm713_vm11, nan, %v931_v50  ;;  %vm4758_vm12 = vcmp.lt.s32.totalorder %v4757_v49, 0  ;;  %v1042_v4 = vsel %vm957_vm13, %v1041_v44, %v6396_v19  ;;  %v4891_v50 = vld [vmem:[%s8926_s5 + $0x110] sm:$0xff] }
 0x112   :  { %v1026_v31 = vsel %vm4758_vm12, 0, %v4757_v49  ;;  %3437 = vperm.xlu1 %5106, %v4845_v13   ;;  %v6450_v42 = vshrl.u32 %v1120_v40, 30  ;;  %vm956_vm14 = vcmp.le.f32.partialorder %v955_v28, 0.7853982  ;;  %v1115_v19 = vadd.s32 %v6418_v15, %v6424_v25  ;;  %v4871_v28 = vld [vmem:[%s8926_s5 + $0xf0] sm:$0xff] }
 0x113   :  { %v1027_v16 = vsub.s32 32, %v1026_v31  ;;  %v1031_v34 = vsub.s32 4294967266, %v1026_v31  ;;  %v1028_v30 = vshll.u32 %v1019_v55, %v1026_v31  ;;  %v1044_v51 = vsel %vm956_vm14, 0, %v1042_v4 }
 0x114   :  { %v1122_v54 = vshll.u32 %v6450_v42, 30  ;;  %v1048_v0 = vadd.s32 3, %v1044_v51  ;;  %v1258_v38 = vand.u32 3, %v1044_v51  ;;  %vm1047_vm0 = vweird.f32 %v5832_v56 }
 0x115   :  { %v1029_v60 = vshrl.u32 %v1011_v17, %v1027_v16  ;;  %v1032_v9 = vadd.s32 127, %v1031_v34  ;;  %v1145_v17 = vsub.s32 4, %v6450_v42  ;;  %vm1060_vm7 = vcmp.le.f32.partialorder %v1059_v63, 0.7853982  ;;  %v4895_v63 = vld [vmem:[%s8926_s5 + $0x130] sm:$0xff] }
 0x116   :  { %3447 = vperm.xlu1 %5106, %v4847_v33   ;;  %v1123_v43 = vsub.s32 %v1119_v1, %v1122_v54  ;;  %v1049_v52 = vand.u32 3, %v1048_v0  ;;  %vm1259_vm2 = vcmp.lt.s32.totalorder %v1258_v38, 2  ;;  %vm1263_vm3 = vcmp.eq.s32.totalorder %v1258_v38, 2  ;;  %v1394_v0 = vld [vmem:[%s8923_s2 + $0x38] sm:$0xff] }
 0x117   :  { %v1030_v41 = vor.u32 %v1029_v60, %v1028_v30  ;;  %v1033_v10 = vshll.u32 %v1032_v9, 23  ;;  %vm1260_vm5 = vcmp.eq.s32.totalorder %v1258_v38, 0  ;;  %v4893_v9 = vld [vmem:[%s8926_s5 + $0x120] sm:$0xff]  ;;  %vm1061_vm8 = vcmp.lt.s32.totalorder %v5834_v57, 0 }
 0x118   :  { %v1125_v55 = vsub.s32 0, %v1123_v43  ;;  %vm1054_vm1 = vcmp.eq.s32.totalorder %v1049_v52, 2  ;;  %vm1051_vm4 = vcmp.eq.s32.totalorder %v1049_v52, 0  ;;  %vm1050_vm6 = vcmp.lt.s32.totalorder %v1049_v52, 2 }
 0x119   :  { %v1034_v23 = vor.u32 4788187, %v1033_v10  ;;  %v1037_v58 = vcvt.s32.f32 %v1030_v41 }
 0x11a   :  { %3820 = vperm.xlu1 %5106, %v4865_v7   ;;  %v4760_v20 = vmin.u32 %v1125_v55, %v1123_v43 }
 0x11b   :  { %v1035_v26 = vand.u32 2147483647, %v1034_v23  ;;  %v1146_v23 = vsel %vm1061_vm8, %v1145_v17, %v6450_v42  ;;  %v4608_v42 = vld [vmem:[%s8933_s12] sm:$0xff] }
 0x11c   :  { %v1127_v61 = vclz %v4760_v20 }
 0x11d   :  { %v1038_v47 = vmul.f32 %v1037_v58, %v1035_v26  ;;  %v1148_v26 = vsel %vm1060_vm7, 0, %v1146_v23 }
 0x11e   :  { %3830 = vperm.xlu1 %5106, %v4867_v46   ;;  %v4761_v5 = vadd.s32 4294967294, %v1127_v61  ;;  %v1152_v58 = vadd.s32 3, %v1148_v26  ;;  %v1361_v55 = vand.u32 3, %v1148_v26 }
 0x11f   :  { %v1039_v21 = vxor.u32 2147483648, %v1038_v47 }
 0x120   :  { %vm4762_vm15 = vcmp.lt.s32.totalorder %v4761_v5, 0  ;;  %vm1366_vm10 = vcmp.eq.s32.totalorder %v1361_v55, 2  ;;  %vm1363_vm12 = vcmp.eq.s32.totalorder %v1361_v55, 0 }
 0x121   :  { %v1040_v18 = vsel %vm957_vm13, %v1039_v21, %v1038_v47  ;;  %v1130_v22 = vsel %vm4762_vm15, 0, %v4761_v5  ;;  %vm1151_vm15 = vweird.f32 %v5834_v57 }
 0x122   :  { %v1043_v37 = vsel %vm956_vm14, %v5832_v56, %v1040_v18  ;;  %3840 = vperm.xlu1 %5106, %v4869_v59   ;;  %v1131_v24 = vsub.s32 32, %v1130_v22  ;;  %v1135_v35 = vsub.s32 4294967266, %v1130_v22  ;;  %v1132_v39 = vshll.u32 %v1123_v43, %v1130_v22 }
 0x123   :  { %5124 = vcosq.f32 %v1043_v37  ;;  %v1153_v56 = vand.u32 3, %v1152_v58  ;;  %vm1362_vm14 = vcmp.lt.s32.totalorder %v1361_v55, 2 }
 0x124   :  { %5126 = vsinq.f32 %v1043_v37  ;;  %v1133_v48 = vshrl.u32 %v1115_v19, %v1131_v24  ;;  %v1136_v36 = vadd.s32 127, %v1135_v35  ;;  %v6513_v24 = vpack.c.bf16 %v6443_v29, %v6194_v12  ;;  %v1388_v12 = vld [vmem:[%s8923_s2 + $0x8] sm:$0xff]  ;;  %v1391_v29 = vld [vmem:[%s8923_s2 + $0x20] sm:$0xff] }
 0x125   :  { %vm1158_vm9 = vcmp.eq.s32.totalorder %v1153_v56, 2  ;;  %vm1155_vm11 = vcmp.eq.s32.totalorder %v1153_v56, 0  ;;  %vm1154_vm13 = vcmp.lt.s32.totalorder %v1153_v56, 2  ;;  %v1392_v35 = vld [vmem:[%s8923_s2 + $0x28] sm:$0xff] }
 0x126   :  { %3850 = vperm.xlu1 %5106, %v4871_v28   ;;  %v1134_v32 = vor.u32 %v1133_v48, %v1132_v39  ;;  %v1137_v45 = vshll.u32 %v1136_v36, 23  ;;  %v1393_v28 = vld [vmem:[%s8923_s2 + $0x30] sm:$0xff]  ;;  %v1406_v39 = vpop.permute.xlu0 %1405 }
 0x128   :  { %v1138_v15 = vor.u32 4788187, %v1137_v45  ;;  %v1141_v14 = vcvt.s32.f32 %v1134_v32 }
 0x12a   :  { %4223 = vperm.xlu1 %5106, %v4889_v11   ;;  %v1139_v49 = vand.u32 2147483647, %v1138_v15 }
 0x12c   :  { %v1142_v31 = vmul.f32 %v1141_v14, %v1139_v49 }
 0x12d   :  { %v5125_v25 = vpop.eup %5124 }
 0x12e   :  { %v5127_v27 = vpop.eup %5126  ;;  %v1055_v1 = vxor.u32 2147483648, %v5125_v25  ;;  %4233 = vperm.xlu1 %5106, %v4891_v50   ;;  %v1143_v30 = vxor.u32 2147483648, %v1142_v31 }
 0x12f   :  { %v1052_v13 = vxor.u32 2147483648, %v5127_v27 }
 0x130   :  { %v1056_v16 = vsel %vm1054_vm1, %v1055_v1, %v5127_v27  ;;  %v1265_v34 = vsel %vm1263_vm3, %v1055_v1, %v5127_v27  ;;  %v1144_v54 = vsel %vm1061_vm8, %v1143_v30, %v1142_v31 }
 0x131   :  { %v1053_v40 = vsel %vm1051_vm4, %v5125_v25, %v1052_v13  ;;  %v1262_v60 = vsel %vm1260_vm5, %v5125_v25, %v1052_v13  ;;  %v1147_v7 = vsel %vm1060_vm7, %v5834_v57, %v1144_v54  ;;  %v1387_v57 = vld [vmem:[%s8923_s2] sm:$0xff] }
 0x132   :  { %v1057_v33 = vsel %vm1050_vm6, %v1053_v40, %v1056_v16  ;;  %v1266_v41 = vsel %vm1259_vm2, %v1262_v60, %v1265_v34  ;;  %4243 = vperm.xlu1 %5106, %v4893_v9   ;;  %5128 = vcosq.f32 %v1147_v7  ;;  %v1421_v40 = vpop.permute.xlu0 %1420 }
 0x133   :  { %v1058_v10 = vsel %vm1047_vm0, nan, %v1057_v33  ;;  %v1267_v43 = vsel %vm1047_vm0, nan, %v1266_v41  ;;  %5130 = vsinq.f32 %v1147_v7  ;;  %vm1443_vm0 = vcmask 457728  }
 0x134   :  { %1371 = vst [vmem:[#allocation2 + $0x60] sm:$0xff] %v1267_v43  ;;  %v6508_v19 = vpack.c.bf16 %v1058_v10, %v6317_v62  ;;  %v1389_v62 = vld [vmem:[%s8923_s2 + $0x10] sm:$0xff] }
 0x136   :  { %4253 = vperm.xlu1 %5106, %v4895_v63  }
 0x13a   :  { %4612 = vperm.xlu1 %5106, %v4608_v42   ;;  %v1411_v11 = vpop.permute.xlu1 %1410 }
 0x13c   :  { %v5129_v44 = vpop.eup %5128 }
 0x13d   :  { %v5131_v47 = vpop.eup %5130  ;;  %v1159_v20 = vxor.u32 2147483648, %v5129_v44 }
 0x13e   :  { %v1156_v46 = vxor.u32 2147483648, %v5131_v47  ;;  %v1416_v13 = vpop.permute.xlu1 %1415 }
 0x13f   :  { %v1160_v21 = vsel %vm1158_vm9, %v1159_v20, %v5131_v47  ;;  %v1368_v61 = vsel %vm1366_vm10, %v1159_v20, %v5131_v47  ;;  %v1431_v47 = vpop.permute.xlu0 %1430 }
 0x140   :  { %v1157_v4 = vsel %vm1155_vm11, %v5129_v44, %v1156_v46  ;;  %v1365_v18 = vsel %vm1363_vm12, %v5129_v44, %v1156_v46 }
 0x141   :  { %v1161_v5 = vsel %vm1154_vm13, %v1157_v4, %v1160_v21  ;;  %v1369_v59 = vsel %vm1362_vm14, %v1365_v18, %v1368_v61 }
 0x142   :  { %v1162_v37 = vsel %vm1151_vm15, nan, %v1161_v5  ;;  %v1370_v51 = vsel %vm1151_vm15, nan, %v1369_v59  ;;  %v1426_v23 = vpop.permute.xlu1 %1425 }
 0x143   :  { %1372 = vst [vmem:[#allocation2 + $0x68] sm:$0xff] %v1370_v51  ;;  %v6505_v22 = vpack.c.bf16 %v1162_v37, %v6441_v6  ;;  %v1390_v6 = vld [vmem:[%s8923_s2 + $0x18] sm:$0xff] }
 0x145   :  { %4912 = vmatprep.subr.bf16.mxu0 %v6505_v22 }
 0x146   :  { %4914 = vmatpush1.bf16.msra.mxu0 %v6508_v19 }
 0x147   :  { %4916 = vmatprep.subr.bf16.mxu0 %v6513_v24 }
 0x14a   :  { %4918 = vmatpush1.bf16.msra.mxu0 %v6362_v8 }
 0x14b   :  { %1480 = vmatprep.subr.mxu0 %v1370_v51 }
 0x14e   :  { %1481 = vmatpush1.msra.mxu0 %v1267_v43 }
 0x14f   :  { %4771 = vmatmul.mubr.msk.f32.vlgmr.msra.gmra.mrb[0].mxu0 %vm1443_vm0, %v1387_v57 }
 0x150   :  { %1538 = vmatprep.mubr.f32.mxu0 %v5645_v53 }
 0x153   :  { %4772 = vmatmul.mubr.msk.f32.gmra.mrb[2].mxu0 %vm1443_vm0, %v1388_v12 }
 0x154   :  { %1544 = vmatprep.mubr.f32.mxu0 %v5645_v53 }
 0x157   :  { %4773 = vmatmul.mubr.msk.f32.gmra.mrb[4].mxu0 %vm1443_vm0, %v1389_v62  ;;  %v1436_v62 = vpop.permute.xlu1 %1435 }
 0x158   :  { %1550 = vmatprep.mubr.f32.mxu0 %v5645_v53 }
 0x15b   :  { %4774 = vmatmul.mubr.msk.f32.gmra.mrb[6].mxu0 %vm1443_vm0, %v1390_v6 }
 0x15c   :  { %1556 = vmatprep.mubr.f32.mxu0 %v5645_v53 }
 0x15f   :  { %4775 = vmatmul.mubr.msk.f32.gmra.mrb[8].mxu0 %vm1443_vm0, %v1391_v29 }
 0x160   :  { %1562 = vmatprep.mubr.f32.mxu0 %v5645_v53 }
 0x163   :  { %4776 = vmatmul.mubr.msk.f32.gmra.mrb[10].mxu0 %vm1443_vm0, %v1392_v35 }
 0x164   :  { %1568 = vmatprep.mubr.f32.mxu0 %v5645_v53 }
 0x167   :  { %4777 = vmatmul.mubr.msk.f32.gmra.mrb[12].mxu0 %vm1443_vm0, %v1393_v28 }
 0x168   :  { %1574 = vmatprep.mubr.f32.mxu0 %v5645_v53 }
 0x16b   :  { %4778 = vmatmul.mubr.msk.f32.gmra.mrb[14].mxu0 %vm1443_vm0, %v1394_v0 }
 0x16c   :  { %2337 = vmatprep.mubr.f32.mxu0 %v5645_v53 }
 0x222   :  { %v1534_v48 = vpop.f32.mrb[0].mxu0 }
 0x223   :  { %v6558_v36 = vadd.f32 %v1534_v48, %v1406_v39  ;;  %v1536_v32 = vpop.f32.mrb[1].mxu0 }
 0x224   :  { %v6560_v45 = vadd.f32 %v1536_v32, %v1406_v39 }
 0x225   :  { %v1597_v52 = vmul.f32 1.442695, %v6558_v36  ;;  %vm1581_vm4 = vcmp.gt.f32.partialorder %v6558_v36, 20.0 }
 0x226   :  { %v1599_v38 = vmul.f32 1.442695, %v6560_v45  ;;  %v1540_v15 = vpop.f32.mrb[2].mxu0  ;;  %vm1582_vm1 = vcmp.gt.f32.partialorder %v6560_v45, 20.0 }
 0x227   :  { %5132 = vpow2.f32 %v1597_v52  ;;  %v6564_v25 = vadd.f32 %v1540_v15, %v1411_v11  ;;  %v1542_v49 = vpop.f32.mrb[3].mxu0 }
 0x228   :  { %5134 = vpow2.f32 %v1599_v38  ;;  %v6566_v14 = vadd.f32 %v1542_v49, %v1411_v11 }
 0x229   :  { %v1601_v50 = vmul.f32 1.442695, %v6564_v25  ;;  %vm1583_vm6 = vcmp.gt.f32.partialorder %v6564_v25, 20.0 }
 0x22a   :  { %v1603_v27 = vmul.f32 1.442695, %v6566_v14  ;;  %v1546_v1 = vpop.f32.mrb[4].mxu0  ;;  %vm1584_vm2 = vcmp.gt.f32.partialorder %v6566_v14, 20.0 }
 0x22b   :  { %v1548_v31 = vpop.f32.mrb[5].mxu0  ;;  %v6573_v30 = vadd.f32 %v1546_v1, %v1416_v13 }
 0x22c   :  { %5136 = vpow2.f32 %v1603_v27  ;;  %v6570_v17 = vadd.f32 %v1548_v31, %v1416_v13 }
 0x22d   :  { %5138 = vpow2.f32 %v1601_v50  ;;  %v1605_v43 = vmul.f32 1.442695, %v6573_v30  ;;  %vm1585_vm12 = vcmp.gt.f32.partialorder %v6573_v30, 20.0 }
 0x22e   :  { %v1607_v16 = vmul.f32 1.442695, %v6570_v17  ;;  %v1552_v34 = vpop.f32.mrb[6].mxu0  ;;  %vm1586_vm9 = vcmp.gt.f32.partialorder %v6570_v17, 20.0 }
 0x22f   :  { %v1554_v60 = vpop.f32.mrb[7].mxu0  ;;  %v6581_v7 = vadd.f32 %v1552_v34, %v1421_v40 }
 0x230   :  { %v6575_v9 = vadd.f32 %v1554_v60, %v1421_v40  ;;  %5140 = vpow2.f32 %v1607_v16  ;;  %v1441_v40 = vpop.permute.xlu0 %1440 }
 0x231   :  { %v6577_v33 = vpop.eup %5132  ;;  %v1609_v20 = vmul.f32 1.442695, %v6581_v7  ;;  %vm1587_vm13 = vcmp.gt.f32.partialorder %v6581_v7, 20.0 }
 0x232   :  { %v5135_v41 = vpop.eup %5134  ;;  %v1558_v10 = vpop.f32.mrb[8].mxu0  ;;  %v1629_v54 = vadd.f32 1.0, %v6577_v33  ;;  %v1611_v58 = vmul.f32 1.442695, %v6575_v9  ;;  %v1632_v59 = vmul.f32 -0.5, %v6577_v33  ;;  %vm1588_vm10 = vcmp.gt.f32.partialorder %v6575_v9, 20.0 }
 0x233   :  { %v1560_v63 = vpop.f32.mrb[9].mxu0  ;;  %v1638_v26 = vadd.f32 1.0, %v5135_v41  ;;  %v6591_v46 = vadd.f32 %v1558_v10, %v1426_v23  ;;  %v1641_v5 = vmul.f32 -0.5, %v5135_v41  ;;  %v1644_v35 = vand.u32 2147483647, %v5135_v41 }
 0x234   :  { %v6584_v42 = vadd.f32 %v1560_v63, %v1426_v23  ;;  %v1633_v11 = vadd.f32 1.0, %v1632_v59  ;;  %v1635_v16 = vand.u32 2147483647, %v6577_v33 }
 0x235   :  { %5142 = vlog2.f32 %v1638_v26  ;;  %v1613_v6 = vmul.f32 1.442695, %v6591_v46  ;;  %v1642_v48 = vadd.f32 1.0, %v1641_v5  ;;  %vm6616_vm3 = vcmp.lt.f32.partialorder %v1644_v35, 0.0004427343 }
 0x236   :  { %v6586_v56 = vpop.eup %5136  ;;  %v1564_v55 = vpop.f32.mrb[10].mxu0  ;;  %5144 = vlog2.f32 %v1629_v54  ;;  %v1615_v4 = vmul.f32 1.442695, %v6584_v42  ;;  %vm6641_vm7 = vcmp.lt.f32.partialorder %v1635_v16, 0.0004427343 }
 0x237   :  { %v6588_v44 = vpop.eup %5138  ;;  %5146 = vpow2.f32 %v1605_v43  ;;  %v1566_v21 = vpop.f32.mrb[11].mxu0  ;;  %v1656_v61 = vadd.f32 1.0, %v6586_v56  ;;  %v6598_v37 = vadd.f32 %v1564_v55, %v1431_v47  ;;  %v1659_v28 = vmul.f32 -0.5, %v6586_v56 }
 0x238   :  { %5148 = vpow2.f32 %v1611_v58  ;;  %v6595_v18 = vadd.f32 %v1566_v21, %v1431_v47  ;;  %v1647_v57 = vadd.f32 1.0, %v6588_v44  ;;  %v1650_v52 = vmul.f32 -0.5, %v6588_v44 }
 0x239   :  { %5150 = vlog2.f32 %v1656_v61  ;;  %v1617_v38 = vmul.f32 1.442695, %v6598_v37  ;;  %v1662_v49 = vand.u32 2147483647, %v6586_v56  ;;  %v1660_v31 = vadd.f32 1.0, %v1659_v28 }
 0x23a   :  { %v1570_v51 = vpop.f32.mrb[12].mxu0  ;;  %v6601_v12 = vpop.eup %5140  ;;  %5152 = vpow2.f32 %v1609_v20  ;;  %v1619_v0 = vmul.f32 1.442695, %v6595_v18  ;;  %v1643_v54 = vmul.f32 %v5135_v41, %v1642_v48  ;;  %v1651_v26 = vadd.f32 1.0, %v1650_v52 }
 0x23b   :  { %v1572_v29 = vpop.f32.mrb[13].mxu0  ;;  %5154 = vpow2.f32 %v1615_v4  ;;  %v6606_v39 = vadd.f32 %v1570_v51, %v1436_v62  ;;  %v1674_v50 = vadd.f32 1.0, %v6601_v12  ;;  %vm6632_vm5 = vcmp.lt.f32.partialorder %v1662_v49, 0.0004427343 }
 0x23c   :  { %v6608_v32 = vadd.f32 %v1572_v29, %v1436_v62  ;;  %5156 = vlog2.f32 %v1647_v57  ;;  %v1634_v41 = vmul.f32 %v6577_v33, %v1633_v11  ;;  %v1661_v61 = vmul.f32 %v6586_v56, %v1660_v31 }
 0x23d   :  { %5158 = vpow2.f32 %v1613_v6  ;;  %v1621_v60 = vmul.f32 1.442695, %v6606_v39  ;;  %v1653_v51 = vand.u32 2147483647, %v6588_v44  ;;  %v1677_v57 = vmul.f32 -0.5, %v6601_v12 }
 0x23e   :  { %v1576_v15 = vpop.f32.mrb[14].mxu0  ;;  %5160 = vpow2.f32 %v1619_v0  ;;  %v1623_v43 = vmul.f32 1.442695, %v6608_v32  ;;  %v1652_v6 = vmul.f32 %v6588_v44, %v1651_v26 }
 0x23f   :  { %v5143_v27 = vpop.eup %5142  ;;  %v1578_v1 = vpop.f32.mrb[15].mxu0  ;;  %5162 = vlog2.f32 %v1674_v50  ;;  %v6630_v55 = vadd.f32 %v1576_v15, %v1441_v40  ;;  %vm1654_vm8 = vcmp.lt.f32.partialorder %v1653_v51, 0.0004427343 }
 0x240   :  { %v5145_v34 = vpop.eup %5144  ;;  %v1640_v10 = vmul.f32 0.6931472, %v5143_v27  ;;  %v6625_v63 = vadd.f32 %v1578_v1, %v1441_v40  ;;  %5164 = vpow2.f32 %v1617_v38 }
 0x241   :  { %v6622_v23 = vpop.eup %5146  ;;  %v1631_v4 = vmul.f32 0.6931472, %v5145_v34  ;;  %5166 = vpow2.f32 %v1621_v60  ;;  %v1625_v35 = vmul.f32 1.442695, %v6630_v55 }
 0x242   :  { %v6628_v58 = vpop.eup %5148  ;;  %v1646_v21 = vsel %vm6616_vm3, %v1643_v54, %v1640_v10  ;;  %5168 = vpow2.f32 %v1623_v43  ;;  %v1627_v33 = vmul.f32 1.442695, %v6625_v63  ;;  %v1665_v48 = vadd.f32 1.0, %v6622_v23 }
 0x243   :  { %v5151_v20 = vpop.eup %5150  ;;  %v1692_v56 = vadd.f32 1.0, %v6628_v58  ;;  %v1774_v0 = vsel %vm1582_vm1, %v6560_v45, %v1646_v21  ;;  %v1637_v52 = vsel %vm6641_vm7, %v1634_v41, %v1631_v4  ;;  %v1695_v38 = vmul.f32 -0.5, %v6628_v58 }
 0x244   :  { %v1658_v59 = vmul.f32 0.6931472, %v5151_v20  ;;  %v6647_v62 = vpop.eup %5152  ;;  %v1668_v50 = vmul.f32 -0.5, %v6622_v23  ;;  %v1678_v45 = vadd.f32 1.0, %v1677_v57  ;;  %v1773_v31 = vsel %vm1581_vm4, %v6558_v36, %v1637_v52 }
 0x245   :  { %v6652_v29 = vpop.eup %5154  ;;  %5170 = vlog2.f32 %v1692_v56  ;;  %v1683_v1 = vadd.f32 1.0, %v6647_v62  ;;  %v1686_v16 = vmul.f32 -0.5, %v6647_v62  ;;  %v1680_v10 = vand.u32 2147483647, %v6601_v12 }
 0x246   :  { %v1664_v28 = vsel %vm6632_vm5, %v1661_v61, %v1658_v59  ;;  %v5157_v11 = vpop.eup %5156  ;;  %5172 = vlog2.f32 %v1665_v48  ;;  %v1710_v34 = vadd.f32 1.0, %v6652_v29  ;;  %v1698_v54 = vand.u32 2147483647, %v6628_v58 }
 0x247   :  { %v1776_v44 = vsel %vm1584_vm2, %v6566_v14, %v1664_v28  ;;  %v1649_v49 = vmul.f32 0.6931472, %v5157_v11  ;;  %v6668_v27 = vpop.eup %5158  ;;  %5174 = vpow2.f32 %v1627_v33  ;;  %v1696_v36 = vadd.f32 1.0, %v1695_v38 }
 0x248   :  { %v4919_v15 = vpack.c.bf16 %v1776_v44, %v1774_v0  ;;  %v6671_v13 = vpop.eup %5160  ;;  %5176 = vlog2.f32 %v1683_v1  ;;  %v1669_v47 = vadd.f32 1.0, %v1668_v50  ;;  %v1687_v61 = vadd.f32 1.0, %v1686_v16 }
 0x249   :  { %v1655_v14 = vsel %vm1654_vm8, %v1652_v6, %v1649_v49  ;;  %v5163_v40 = vpop.eup %5162  ;;  %5178 = vlog2.f32 %v1710_v34  ;;  %v1728_v20 = vadd.f32 1.0, %v6671_v13  ;;  %v1689_v4 = vand.u32 2147483647, %v6647_v62 }
 0x24a   :  { %4920 = vmatprep.subr.bf16.mxu1 %v4919_v15  ;;  %v1775_v60 = vsel %vm1583_vm6, %v6564_v25, %v1655_v14  ;;  %v6684_v43 = vpop.eup %5164  ;;  %5180 = vpow2.f32 %v1625_v35  ;;  %v1676_v41 = vmul.f32 0.6931472, %v5163_v40  ;;  %v1671_v25 = vand.u32 2147483647, %v6622_v23 }
 0x24b   :  { %v4921_v26 = vpack.c.bf16 %v1775_v60, %v1773_v31  ;;  %v6688_v21 = vpop.eup %5166  ;;  %v1701_v5 = vadd.f32 1.0, %v6668_v27  ;;  %v1679_v51 = vmul.f32 %v6601_v12, %v1678_v45  ;;  %vm6696_vm11 = vcmp.lt.f32.partialorder %v1680_v10, 0.0004427343 }
 0x24c   :  { %v6693_v59 = vpop.eup %5168  ;;  %v1713_v33 = vmul.f32 -0.5, %v6652_v29  ;;  %5182 = vlog2.f32 %v1728_v20  ;;  %v1697_v6 = vmul.f32 %v6628_v58, %v1696_v36  ;;  %vm6704_vm14 = vcmp.lt.f32.partialorder %v1698_v54, 0.0004427343 }
 0x24d   :  { %4922 = vmatpush1.bf16.msra.mxu1 %v4921_v26  ;;  %v1670_v35 = vmul.f32 %v6622_v23, %v1669_v47  ;;  %5184 = vlog2.f32 %v1701_v5  ;;  %v1682_v28 = vsel %vm6696_vm11, %v1679_v51, %v1676_v41  ;;  %v1716_v0 = vand.u32 2147483647, %v6652_v29 }
 0x24e   :  { %v1731_v48 = vmul.f32 -0.5, %v6671_v13  ;;  %v1719_v11 = vadd.f32 1.0, %v6684_v43  ;;  %vm6714_vm15 = vcmp.lt.f32.partialorder %v1671_v25, 0.0004427343  ;;  %v1688_v38 = vmul.f32 %v6647_v62, %v1687_v61 }
 0x24f   :  { %v5171_v12 = vpop.eup %5170  ;;  %vm6719_vm1 = vcmp.lt.f32.partialorder %v1689_v4, 0.0004427343  ;;  %v1714_v50 = vadd.f32 1.0, %v1713_v33  ;;  %v1734_v45 = vand.u32 2147483647, %v6671_v13  ;;  %vm1590_vm2 = vcmp.gt.f32.partialorder %v6584_v42, 20.0 }
 0x250   :  { %v5173_v44 = vpop.eup %5172  ;;  %v1694_v52 = vmul.f32 0.6931472, %v5171_v12  ;;  %5186 = vlog2.f32 %v1719_v11  ;;  %v1778_v62 = vsel %vm1586_vm9, %v6570_v17, %v1682_v28  ;;  %v1704_v14 = vmul.f32 -0.5, %v6668_v27 }
 0x251   :  { %v6723_v15 = vpop.eup %5174  ;;  %v1667_v49 = vmul.f32 0.6931472, %v5173_v44  ;;  %v1746_v31 = vadd.f32 1.0, %v6693_v59  ;;  %vm6737_vm3 = vcmp.lt.f32.partialorder %v1716_v0, 0.0004427343  ;;  %v1732_v60 = vadd.f32 1.0, %v1731_v48 }
 0x252   :  { %v1700_v1 = vsel %vm6704_vm14, %v1697_v6, %v1694_v52  ;;  %v5177_v16 = vpop.eup %5176  ;;  %v1722_v10 = vmul.f32 -0.5, %v6684_v43  ;;  %v1715_v20 = vmul.f32 %v6652_v29, %v1714_v50  ;;  %vm6747_vm4 = vcmp.lt.f32.partialorder %v1734_v45, 0.0004427343 }
 0x253   :  { %v1780_v34 = vsel %vm1588_vm10, %v6575_v9, %v1700_v1  ;;  %v5179_v54 = vpop.eup %5178  ;;  %v1673_v17 = vsel %vm6714_vm15, %v1670_v35, %v1667_v49  ;;  %v1685_v36 = vmul.f32 0.6931472, %v5177_v16  ;;  %5188 = vlog2.f32 %v1746_v31 }
 0x254   :  { %v4923_v26 = vpack.c.bf16 %v1780_v34, %v1778_v62  ;;  %v6744_v47 = vpop.eup %5180  ;;  %v1712_v41 = vmul.f32 0.6931472, %v5179_v54  ;;  %v1764_v25 = vadd.f32 1.0, %v6723_v15  ;;  %v1705_v4 = vadd.f32 1.0, %v1704_v14 }
 0x255   :  { %v1691_v61 = vsel %vm6719_vm1, %v1688_v38, %v1685_v36  ;;  %v1707_v5 = vand.u32 2147483647, %v6668_v27  ;;  %v1737_v51 = vadd.f32 1.0, %v6688_v21  ;;  %v1777_v29 = vsel %vm1585_vm12, %v6573_v30, %v1673_v17 }
 0x256   :  { %4924 = vmatprep.subr.bf16.mxu1 %v4923_v26  ;;  %v5183_v57 = vpop.eup %5182  ;;  %v1779_v33 = vsel %vm1587_vm13, %v6581_v7, %v1691_v61  ;;  %v1733_v6 = vmul.f32 %v6671_v13, %v1732_v60  ;;  %v1723_v56 = vadd.f32 1.0, %v1722_v10  ;;  %v1718_v28 = vsel %vm6737_vm3, %v1715_v20, %v1712_v41 }
 0x257   :  { %v5185_v35 = vpop.eup %5184  ;;  %v4925_v12 = vpack.c.bf16 %v1779_v33, %v1777_v29  ;;  %v1730_v0 = vmul.f32 0.6931472, %v5183_v57  ;;  %5190 = vlog2.f32 %v1764_v25  ;;  %v1725_v11 = vand.u32 2147483647, %v6684_v43 }
 0x258   :  { %v1703_v48 = vmul.f32 0.6931472, %v5185_v35  ;;  %v1749_v44 = vmul.f32 -0.5, %v6693_v59  ;;  %5192 = vlog2.f32 %v1737_v51  ;;  %vm1592_vm5 = vcmp.gt.f32.partialorder %v6595_v18, 20.0 }
 0x259   :  { %4926 = vmatpush1.bf16.msra.mxu1 %v4925_v12  ;;  %v1736_v30 = vsel %vm6747_vm4, %v1733_v6, %v1730_v0  ;;  %v1706_v7 = vmul.f32 %v6668_v27, %v1705_v4  ;;  %v1755_v13 = vadd.f32 1.0, %v6744_v47  ;;  %v1782_v58 = vsel %vm1590_vm2, %v6584_v42, %v1718_v28  ;;  %v1793_v28 = vld [vmem:[%s8925_s4 + $0x20] sm:$0xff]  ;;  %v1794_v0 = vld [vmem:[%s8925_s4 + $0x28] sm:$0xff] }
 0x25a   :  { %v5187_v52 = vpop.eup %5186  ;;  %v1784_v38 = vsel %vm1592_vm5, %v6595_v18, %v1736_v30  ;;  %vm6776_vm6 = vcmp.lt.f32.partialorder %v1707_v5, 0.0004427343  ;;  %v1767_v49 = vmul.f32 -0.5, %v6723_v15  ;;  %v1724_v1 = vmul.f32 %v6684_v43, %v1723_v56 }
 0x25b   :  { %v4927_v50 = vpack.c.bf16 %v1784_v38, %v1782_v58  ;;  %v1709_v45 = vsel %vm6776_vm6, %v1706_v7, %v1703_v48  ;;  %v1721_v27 = vmul.f32 0.6931472, %v5187_v52  ;;  %vm1589_vm7 = vcmp.gt.f32.partialorder %v6591_v46, 20.0  ;;  %v1795_v48 = vld [vmem:[%s8925_s4 + $0x30] sm:$0xff]  ;;  %v1813_v58 = vpop.permute.xlu0 %1812 }
 0x25c   :  { %vm1726_vm8 = vcmp.lt.f32.partialorder %v1725_v11, 0.0004427343  ;;  %v1750_v62 = vadd.f32 1.0, %v1749_v44  ;;  %5194 = vlog2.f32 %v1755_v13  ;;  %vm1591_vm9 = vcmp.gt.f32.partialorder %v6598_v37, 20.0  ;;  %v1796_v11 = vld [vmem:[%s8925_s4 + $0x38] sm:$0xff]  ;;  %v1808_v44 = vpop.permute.xlu1 %1807 }
 0x25d   :  { %v5189_v42 = vpop.eup %5188  ;;  %4928 = vmatprep.subr.bf16.mxu1 %v4927_v50  ;;  %v1727_v18 = vsel %vm1726_vm8, %v1724_v1, %v1721_v27  ;;  %v1752_v14 = vand.u32 2147483647, %v6693_v59  ;;  %v1740_v31 = vmul.f32 -0.5, %v6688_v21  ;;  %v1781_v16 = vsel %vm1589_vm7, %v6591_v46, %v1709_v45 }
 0x25e   :  { %v1783_v34 = vsel %vm1591_vm9, %v6598_v37, %v1727_v18  ;;  %v1748_v40 = vmul.f32 0.6931472, %v5189_v42  ;;  %v1768_v43 = vadd.f32 1.0, %v1767_v49  ;;  %v1770_v10 = vand.u32 2147483647, %v6723_v15 }
 0x25f   :  { %v4929_v60 = vpack.c.bf16 %v1783_v34, %v1781_v16  ;;  %v1758_v54 = vmul.f32 -0.5, %v6744_v47  ;;  %v1751_v26 = vmul.f32 %v6693_v59, %v1750_v62  ;;  %vm1753_vm10 = vcmp.lt.f32.partialorder %v1752_v14, 0.0004427343 }
 0x260   :  { %v1741_v36 = vadd.f32 1.0, %v1740_v31  ;;  %v1769_v46 = vmul.f32 %v6723_v15, %v1768_v43  ;;  %v1743_v37 = vand.u32 2147483647, %v6688_v21  ;;  %vm1771_vm11 = vcmp.lt.f32.partialorder %v1770_v10, 0.0004427343  ;;  %v1818_v27 = vpop.permute.xlu1 %1817  ;;  %v1823_v31 = vpop.permute.xlu0 %1822 }
 0x261   :  { %v5191_v17 = vpop.eup %5190  ;;  %4930 = vmatpush1.bf16.msra.mxu1 %v4929_v60  ;;  %v1754_v20 = vsel %vm1753_vm10, %v1751_v26, %v1748_v40  ;;  %v1759_v61 = vadd.f32 1.0, %v1758_v54  ;;  %vm1594_vm12 = vcmp.gt.f32.partialorder %v6608_v32, 20.0  ;;  %vm1596_vm13 = vcmp.gt.f32.partialorder %v6625_v63, 20.0 }
 0x262   :  { %v5193_v41 = vpop.eup %5192  ;;  %v1766_v9 = vmul.f32 0.6931472, %v5191_v17  ;;  %v1761_v59 = vand.u32 2147483647, %v6744_v47  ;;  %v1786_v5 = vsel %vm1594_vm12, %v6608_v32, %v1754_v20  ;;  %v1742_v57 = vmul.f32 %v6688_v21, %v1741_v36  ;;  %v1789_v21 = vld [vmem:[%s8925_s4] sm:$0xff] }
 0x263   :  { %v1739_v25 = vmul.f32 0.6931472, %v5193_v41  ;;  %vm1744_vm14 = vcmp.lt.f32.partialorder %v1743_v37, 0.0004427343  ;;  %v1760_v56 = vmul.f32 %v6744_v47, %v1759_v61  ;;  %vm1593_vm1 = vcmp.gt.f32.partialorder %v6606_v39, 20.0  ;;  %v1790_v47 = vld [vmem:[%s8925_s4 + $0x8] sm:$0xff] }
 0x264   :  { %v1772_v4 = vsel %vm1771_vm11, %v1769_v46, %v1766_v9  ;;  %vm1762_vm15 = vcmp.lt.f32.partialorder %v1761_v59, 0.0004427343  ;;  %vm1595_vm2 = vcmp.gt.f32.partialorder %v6630_v55, 20.0  ;;  %vm1845_vm3 = vcmask 523264   ;;  %v1828_v10 = vpop.permute.xlu1 %1827  ;;  %v1833_v37 = vpop.permute.xlu0 %1832 }
 0x265   :  { %v1788_v51 = vsel %vm1596_vm13, %v6625_v63, %v1772_v4  ;;  %v1745_v33 = vsel %vm1744_vm14, %v1742_v57, %v1739_v25 }
 0x266   :  { %v5195_v29 = vpop.eup %5194  ;;  %v4931_v15 = vpack.c.bf16 %v1788_v51, %v1786_v5  ;;  %v1785_v32 = vsel %vm1593_vm1, %v6606_v39, %v1745_v33  ;;  %v1791_v39 = vld [vmem:[%s8925_s4 + $0x10] sm:$0xff] }
 0x267   :  { %v1757_v6 = vmul.f32 0.6931472, %v5195_v29 }
 0x268   :  { %4932 = vmatprep.subr.bf16.mxu1 %v4931_v15 }
 0x269   :  { %v1763_v35 = vsel %vm1762_vm15, %v1760_v56, %v1757_v6  ;;  %v1838_v6 = vpop.permute.xlu1 %1837 }
 0x26a   :  { %v1787_v63 = vsel %vm1595_vm2, %v6630_v55, %v1763_v35  ;;  %v1792_v55 = vld [vmem:[%s8925_s4 + $0x18] sm:$0xff] }
 0x26b   :  { %v4933_v12 = vpack.c.bf16 %v1787_v63, %v1785_v32 }
 0x26d   :  { %4934 = vmatpush1.bf16.msra.mxu1 %v4933_v12 }
 0x270   :  { %4779 = vmatmul.mubr.msk.f32.vlgmr.msra.gmra.mrb[0].mxu1 %vm1845_vm3, %v1789_v21 }
 0x271   :  { %1940 = vmatprep.mubr.f32.mxu1 %v5645_v53 }
 0x274   :  { %4780 = vmatmul.mubr.msk.f32.gmra.mrb[2].mxu1 %vm1845_vm3, %v1790_v47 }
 0x275   :  { %1946 = vmatprep.mubr.f32.mxu1 %v5645_v53 }
 0x278   :  { %4781 = vmatmul.mubr.msk.f32.gmra.mrb[4].mxu1 %vm1845_vm3, %v1791_v39 }
 0x279   :  { %1952 = vmatprep.mubr.f32.mxu1 %v5645_v53 }
 0x27c   :  { %4782 = vmatmul.mubr.msk.f32.gmra.mrb[6].mxu1 %vm1845_vm3, %v1792_v55 }
 0x27d   :  { %1958 = vmatprep.mubr.f32.mxu1 %v5645_v53 }
 0x280   :  { %4783 = vmatmul.mubr.msk.f32.gmra.mrb[8].mxu1 %vm1845_vm3, %v1793_v28 }
 0x281   :  { %1964 = vmatprep.mubr.f32.mxu1 %v5645_v53 }
 0x284   :  { %4784 = vmatmul.mubr.msk.f32.gmra.mrb[10].mxu1 %vm1845_vm3, %v1794_v0 }
 0x285   :  { %1970 = vmatprep.mubr.f32.mxu1 %v5645_v53 }
 0x288   :  { %4785 = vmatmul.mubr.msk.f32.gmra.mrb[12].mxu1 %vm1845_vm3, %v1795_v48 }
 0x289   :  { %1976 = vmatprep.mubr.f32.mxu1 %v5645_v53 }
 0x28c   :  { %4786 = vmatmul.mubr.msk.f32.gmra.mrb[14].mxu1 %vm1845_vm3, %v1796_v11 }
 0x28d   :  { %2698 = vmatprep.mubr.f32.mxu1 %v5645_v53 }
 0x343   :  { %v1936_v30 = vpop.f32.mrb[0].mxu1 }
 0x344   :  { %v6846_v7 = vadd.f32 %v1936_v30, %v1808_v44  ;;  %v1938_v13 = vpop.f32.mrb[1].mxu1 }
 0x345   :  { %v6851_v50 = vadd.f32 %v1938_v13, %v1808_v44 }
 0x346   :  { %v1999_v52 = vmul.f32 1.442695, %v6846_v7  ;;  %vm1983_vm4 = vcmp.gt.f32.partialorder %v6846_v7, 20.0 }
 0x347   :  { %v1942_v38 = vpop.f32.mrb[2].mxu1  ;;  %v2001_v18 = vmul.f32 1.442695, %v6851_v50  ;;  %vm1984_vm1 = vcmp.gt.f32.partialorder %v6851_v50, 20.0 }
 0x348   :  { %5196 = vpow2.f32 %v1999_v52  ;;  %v6849_v23 = vadd.f32 %v1942_v38, %v1813_v58  ;;  %v1944_v49 = vpop.f32.mrb[3].mxu1 }
 0x349   :  { %v6864_v26 = vadd.f32 %v1944_v49, %v1813_v58  ;;  %v1843_v49 = vpop.permute.xlu0 %1842 }
 0x34a   :  { %v2003_v45 = vmul.f32 1.442695, %v6849_v23  ;;  %vm1985_vm5 = vcmp.gt.f32.partialorder %v6849_v23, 20.0 }
 0x34b   :  { %v1948_v1 = vpop.f32.mrb[4].mxu1  ;;  %v2005_v61 = vmul.f32 1.442695, %v6864_v26  ;;  %vm1986_vm2 = vcmp.gt.f32.partialorder %v6864_v26, 20.0 }
 0x34c   :  { %5198 = vpow2.f32 %v2003_v45  ;;  %v6854_v62 = vadd.f32 %v1948_v1, %v1818_v27  ;;  %v1950_v42 = vpop.f32.mrb[5].mxu1 }
 0x34d   :  { %v6870_v9 = vadd.f32 %v1950_v42, %v1818_v27 }
 0x34e   :  { %v2007_v14 = vmul.f32 1.442695, %v6854_v62  ;;  %vm1987_vm8 = vcmp.gt.f32.partialorder %v6854_v62, 20.0 }
 0x34f   :  { %v1954_v16 = vpop.f32.mrb[6].mxu1  ;;  %v2009_v15 = vmul.f32 1.442695, %v6870_v9 }
 0x350   :  { %5200 = vpow2.f32 %v2007_v14  ;;  %v6858_v34 = vadd.f32 %v1954_v16, %v1823_v31  ;;  %v1956_v40 = vpop.f32.mrb[7].mxu1 }
 0x351   :  { %5202 = vpow2.f32 %v2001_v18  ;;  %v6877_v51 = vadd.f32 %v1956_v40, %v1823_v31 }
 0x352   :  { %v6860_v43 = vpop.eup %5196  ;;  %v2011_v60 = vmul.f32 1.442695, %v6858_v34  ;;  %vm1989_vm9 = vcmp.gt.f32.partialorder %v6858_v34, 20.0 }
 0x353   :  { %v2031_v54 = vadd.f32 1.0, %v6860_v43  ;;  %v1960_v17 = vpop.f32.mrb[8].mxu1  ;;  %v2034_v29 = vmul.f32 -0.5, %v6860_v43  ;;  %v2037_v12 = vand.u32 2147483647, %v6860_v43 }
 0x354   :  { %5204 = vpow2.f32 %v2011_v60  ;;  %v6866_v36 = vadd.f32 %v1960_v17, %v1828_v10  ;;  %v1962_v41 = vpop.f32.mrb[9].mxu1  ;;  %v2013_v55 = vmul.f32 1.442695, %v6877_v51 }
 0x355   :  { %5206 = vlog2.f32 %v2031_v54  ;;  %v6885_v35 = vadd.f32 %v1962_v41, %v1828_v10  ;;  %v2035_v0 = vadd.f32 1.0, %v2034_v29  ;;  %vm6904_vm6 = vcmp.lt.f32.partialorder %v2037_v12, 0.0004427343 }
 0x356   :  { %v6868_v20 = vpop.eup %5198  ;;  %v2015_v46 = vmul.f32 1.442695, %v6866_v36  ;;  %vm1991_vm13 = vcmp.gt.f32.partialorder %v6866_v36, 20.0 }
 0x357   :  { %v2049_v25 = vadd.f32 1.0, %v6868_v20  ;;  %v1966_v4 = vpop.f32.mrb[10].mxu1  ;;  %v2052_v21 = vmul.f32 -0.5, %v6868_v20  ;;  %v2055_v48 = vand.u32 2147483647, %v6868_v20  ;;  %v2036_v40 = vmul.f32 %v6860_v43, %v2035_v0 }
 0x358   :  { %5208 = vpow2.f32 %v2015_v46  ;;  %v6875_v59 = vadd.f32 %v1966_v4, %v1833_v37  ;;  %v1968_v5 = vpop.f32.mrb[11].mxu1  ;;  %v2017_v13 = vmul.f32 1.442695, %v6885_v35 }
 0x359   :  { %5210 = vlog2.f32 %v2049_v25  ;;  %v2053_v1 = vadd.f32 1.0, %v2052_v21  ;;  %v6909_v14 = vadd.f32 %v1968_v5, %v1833_v37  ;;  %vm6916_vm7 = vcmp.lt.f32.partialorder %v2055_v48, 0.0004427343 }
 0x35a   :  { %v6879_v57 = vpop.eup %5200  ;;  %v2019_v33 = vmul.f32 1.442695, %v6875_v59  ;;  %5212 = vpow2.f32 %v2005_v61  ;;  %vm1993_vm14 = vcmp.gt.f32.partialorder %v6875_v59, 20.0 }
 0x35b   :  { %v2067_v56 = vadd.f32 1.0, %v6879_v57  ;;  %v1972_v32 = vpop.f32.mrb[12].mxu1  ;;  %v6887_v63 = vpop.eup %5202  ;;  %v2070_v18 = vmul.f32 -0.5, %v6879_v57  ;;  %v2054_v43 = vmul.f32 %v6868_v20, %v2053_v1  ;;  %v2073_v61 = vand.u32 2147483647, %v6879_v57 }
 0x35c   :  { %5214 = vpow2.f32 %v2019_v33  ;;  %v6891_v47 = vadd.f32 %v1972_v32, %v1838_v6  ;;  %v1974_v39 = vpop.f32.mrb[13].mxu1  ;;  %v2040_v58 = vadd.f32 1.0, %v6887_v63  ;;  %v2043_v38 = vmul.f32 -0.5, %v6887_v63 }
 0x35d   :  { %5216 = vlog2.f32 %v2067_v56  ;;  %v6920_v10 = vadd.f32 %v1974_v39, %v1838_v6  ;;  %v2071_v5 = vadd.f32 1.0, %v2070_v18  ;;  %v2021_v29 = vmul.f32 1.442695, %v6909_v14 }
 0x35e   :  { %v6894_v28 = vpop.eup %5204  ;;  %5218 = vpow2.f32 %v2009_v15  ;;  %v2023_v11 = vmul.f32 1.442695, %v6891_v47  ;;  %v6924_v46 = vadd.f32 1.0, %v2043_v38  ;;  %vm6965_vm10 = vcmp.lt.f32.partialorder %v2073_v61, 0.0004427343 }
 0x35f   :  { %v5207_v44 = vpop.eup %5206  ;;  %v2085_v30 = vadd.f32 1.0, %v6894_v28  ;;  %v1978_v52 = vpop.f32.mrb[14].mxu1  ;;  %v2088_v17 = vmul.f32 -0.5, %v6894_v28  ;;  %v2091_v20 = vand.u32 2147483647, %v6894_v28 }
 0x360   :  { %v2033_v45 = vmul.f32 0.6931472, %v5207_v44  ;;  %5220 = vpow2.f32 %v2023_v11  ;;  %v1980_v42 = vpop.f32.mrb[15].mxu1  ;;  %v6911_v31 = vadd.f32 %v1978_v52, %v1843_v49  ;;  %v2025_v56 = vmul.f32 1.442695, %v6920_v10 }
 0x361   :  { %5222 = vlog2.f32 %v2085_v30  ;;  %v2089_v39 = vadd.f32 1.0, %v2088_v17  ;;  %v6957_v44 = vadd.f32 %v1980_v42, %v1843_v49  ;;  %v2072_v52 = vmul.f32 %v6879_v57, %v2071_v5 }
 0x362   :  { %v6913_v16 = vpop.eup %5208  ;;  %5224 = vpow2.f32 %v2013_v55  ;;  %v2039_v37 = vsel %vm6904_vm6, %v2036_v40, %v2033_v45  ;;  %v2027_v15 = vmul.f32 1.442695, %v6911_v31  ;;  %vm6969_vm11 = vcmp.lt.f32.partialorder %v2091_v20, 0.0004427343 }
 0x363   :  { %v5211_v54 = vpop.eup %5210  ;;  %v2103_v41 = vadd.f32 1.0, %v6913_v16  ;;  %5226 = vpow2.f32 %v2017_v13  ;;  %v6945_v12 = vsel %vm1983_vm4, %v6846_v7, %v2039_v37  ;;  %v2106_v7 = vmul.f32 -0.5, %v6913_v16 }
 0x364   :  { %v2051_v25 = vmul.f32 0.6931472, %v5211_v54  ;;  %v6930_v4 = vpop.eup %5212  ;;  %v2109_v30 = vand.u32 2147483647, %v6913_v16  ;;  %v2090_v45 = vmul.f32 %v6894_v28, %v2089_v39  ;;  %v2046_v1 = vand.u32 2147483647, %v6887_v63 }
 0x365   :  { %5228 = vlog2.f32 %v2103_v41  ;;  %v2107_v54 = vadd.f32 1.0, %v2106_v7  ;;  %v2029_v28 = vmul.f32 1.442695, %v6957_v44  ;;  %vm1990_vm6 = vcmp.gt.f32.partialorder %v6877_v51, 20.0 }
 0x366   :  { %v6934_v33 = vpop.eup %5214  ;;  %v2057_v6 = vsel %vm6916_vm7, %v2054_v43, %v2051_v25  ;;  %5230 = vlog2.f32 %v2040_v58  ;;  %vm6983_vm12 = vcmp.lt.f32.partialorder %v2109_v30, 0.0004427343  ;;  %v2061_v43 = vmul.f32 -0.5, %v6930_v4 }
 0x367   :  { %v5217_v32 = vpop.eup %5216  ;;  %v6950_v21 = vsel %vm1985_vm5, %v6849_v23, %v2057_v6  ;;  %v2121_v55 = vadd.f32 1.0, %v6934_v33  ;;  %5232 = vpow2.f32 %v2027_v15  ;;  %v2058_v23 = vadd.f32 1.0, %v6930_v4 }
 0x368   :  { %v6953_v0 = vpop.eup %5218  ;;  %v4937_v48 = vpack.c.bf16 %v6950_v21, %v6945_v12  ;;  %v2069_v11 = vmul.f32 0.6931472, %v5217_v32  ;;  %v2124_v40 = vmul.f32 -0.5, %v6934_v33  ;;  %v2127_v25 = vand.u32 2147483647, %v6934_v33 }
 0x369   :  { %5234 = vlog2.f32 %v2121_v55  ;;  %v2076_v41 = vadd.f32 1.0, %v6953_v0  ;;  %vm7005_vm15 = vcmp.lt.f32.partialorder %v2046_v1, 0.0004427343  ;;  %v2079_v55 = vmul.f32 -0.5, %v6953_v0 }
 0x36a   :  { %v6962_v13 = vpop.eup %5220  ;;  %5236 = vpow2.f32 %v2021_v29  ;;  %v2075_v57 = vsel %vm6965_vm10, %v2072_v52, %v2069_v11  ;;  %v2125_v32 = vadd.f32 1.0, %v2124_v40  ;;  %vm7019_vm4 = vcmp.lt.f32.partialorder %v2127_v25, 0.0004427343 }
 0x36b   :  { %v5223_v49 = vpop.eup %5222  ;;  %v2139_v27 = vadd.f32 1.0, %v6962_v13  ;;  %5238 = vpow2.f32 %v2025_v56  ;;  %v6998_v5 = vsel %vm1987_vm8, %v6854_v62, %v2075_v57  ;;  %v2108_v62 = vmul.f32 %v6913_v16, %v2107_v54 }
 0x36c   :  { %v6976_v42 = vpop.eup %5224  ;;  %v2087_v18 = vmul.f32 0.6931472, %v5223_v49  ;;  %5240 = vlog2.f32 %v2058_v23  ;;  %v2062_v30 = vadd.f32 1.0, %v2061_v43  ;;  %v2045_v16 = vmul.f32 %v6887_v63, %v6924_v46 }
 0x36d   :  { %v6981_v60 = vpop.eup %5226  ;;  %5242 = vlog2.f32 %v2139_v27  ;;  %v2094_v39 = vadd.f32 1.0, %v6976_v42  ;;  %v2064_v49 = vand.u32 2147483647, %v6930_v4  ;;  %v2126_v57 = vmul.f32 %v6934_v33, %v2125_v32 }
 0x36e   :  { %v2093_v37 = vsel %vm6969_vm11, %v2090_v45, %v2087_v18  ;;  %5244 = vlog2.f32 %v2076_v41  ;;  %v2112_v23 = vadd.f32 1.0, %v6981_v60  ;;  %v2145_v18 = vand.u32 2147483647, %v6962_v13 }
 0x36f   :  { %v5229_v61 = vpop.eup %5228  ;;  %v7003_v29 = vsel %vm1989_vm9, %v6858_v34, %v2093_v37  ;;  %v2142_v34 = vmul.f32 -0.5, %v6962_v13  ;;  %5246 = vpow2.f32 %v2029_v28  ;;  %v2080_v28 = vadd.f32 1.0, %v2079_v55 }
 0x370   :  { %v5231_v6 = vpop.eup %5230  ;;  %v4941_v20 = vpack.c.bf16 %v7003_v29, %v6998_v5  ;;  %v2105_v56 = vmul.f32 0.6931472, %v5229_v61  ;;  %5248 = vlog2.f32 %v2094_v39  ;;  %v2097_v41 = vmul.f32 -0.5, %v6976_v42 }
 0x371   :  { %v7017_v11 = vpop.eup %5232  ;;  %v2042_v38 = vmul.f32 0.6931472, %v5231_v6  ;;  %v2143_v54 = vadd.f32 1.0, %v2142_v34  ;;  %v2063_v17 = vmul.f32 %v6930_v4, %v2062_v30  ;;  %vm1988_vm5 = vcmp.gt.f32.partialorder %v6870_v9, 20.0 }
 0x372   :  { %v2157_v58 = vadd.f32 1.0, %v7017_v11  ;;  %v2111_v27 = vsel %vm6983_vm12, %v2108_v62, %v2105_v56  ;;  %v2160_v37 = vmul.f32 -0.5, %v7017_v11  ;;  %vm2065_vm7 = vcmp.lt.f32.partialorder %v2064_v49, 0.0004427343 }
 0x373   :  { %v5235_v52 = vpop.eup %5234  ;;  %v7046_v33 = vsel %vm1991_vm13, %v6866_v36, %v2111_v27  ;;  %v2048_v43 = vsel %vm7005_vm15, %v2045_v16, %v2042_v38  ;;  %v2082_v56 = vand.u32 2147483647, %v6953_v0  ;;  %v2081_v62 = vmul.f32 %v6953_v0, %v2080_v28 }
 0x374   :  { %v7028_v45 = vpop.eup %5236  ;;  %v2123_v1 = vmul.f32 0.6931472, %v5235_v52  ;;  %5250 = vlog2.f32 %v2157_v58  ;;  %v2098_v34 = vadd.f32 1.0, %v2097_v41  ;;  %vm1995_vm8 = vcmp.gt.f32.partialorder %v6891_v47, 20.0 }
 0x375   :  { %v7034_v40 = vpop.eup %5238  ;;  %5252 = vlog2.f32 %v2112_v23  ;;  %v2130_v32 = vadd.f32 1.0, %v7028_v45  ;;  %v2161_v15 = vadd.f32 1.0, %v2160_v37  ;;  %v2176_v55 = vsel %vm1984_vm1, %v6851_v50, %v2048_v43 }
 0x376   :  { %v5241_v63 = vpop.eup %5240  ;;  %v2129_v46 = vsel %vm7019_vm4, %v2126_v57, %v2123_v1  ;;  %v2115_v0 = vmul.f32 -0.5, %v6981_v60  ;;  %v2144_v16 = vmul.f32 %v6962_v13, %v2143_v54  ;;  %vm7072_vm9 = vcmp.lt.f32.partialorder %v2145_v18, 0.0004427343 }
 0x377   :  { %v7051_v25 = vsel %vm1993_vm14, %v6875_v59, %v2129_v46  ;;  %v2060_v61 = vmul.f32 0.6931472, %v5241_v63  ;;  %v5243_v4 = vpop.eup %5242  ;;  %v2100_v59 = vand.u32 2147483647, %v6976_v42  ;;  %5254 = vlog2.f32 %v2130_v32 }
 0x378   :  { %v4945_v6 = vpack.c.bf16 %v7051_v25, %v7046_v33  ;;  %v5245_v36 = vpop.eup %5244  ;;  %v2141_v52 = vmul.f32 0.6931472, %v5243_v4  ;;  %vm7076_vm10 = vcmp.lt.f32.partialorder %v2082_v56, 0.0004427343  ;;  %v2163_v27 = vand.u32 2147483647, %v7017_v11 }
 0x379   :  { %v2066_v39 = vsel %vm2065_vm7, %v2063_v17, %v2060_v61  ;;  %v2078_v30 = vmul.f32 0.6931472, %v5245_v36  ;;  %v7068_v23 = vpop.eup %5246  ;;  %v2099_v28 = vmul.f32 %v6976_v42, %v2098_v34  ;;  %vm2101_vm11 = vcmp.lt.f32.partialorder %v2100_v59, 0.0004427343  ;;  %v4788_v33 = vld [vmem:[%s8925_s4 + $0x48] sm:$0xff]  ;;  %v4791_v25 = vld [vmem:[%s8925_s4 + $0x60] sm:$0xff] }
 0x37a   :  { %v2178_v7 = vsel %vm1986_vm2, %v6864_v26, %v2066_v39  ;;  %v5249_v38 = vpop.eup %5248  ;;  %v2148_v26 = vadd.f32 1.0, %v7034_v40  ;;  %v2133_v13 = vmul.f32 -0.5, %v7028_v45  ;;  %v2166_v18 = vadd.f32 1.0, %v7068_v23 }
 0x37b   :  { %v4935_v58 = vpack.c.bf16 %v2178_v7, %v2176_v55  ;;  %v2084_v1 = vsel %vm7076_vm10, %v2081_v62, %v2078_v30  ;;  %v2096_v57 = vmul.f32 0.6931472, %v5249_v38  ;;  %v2147_v41 = vsel %vm7072_vm9, %v2144_v16, %v2141_v52 }
 0x37c   :  { %5256 = vlog2.f32 %v2148_v26  ;;  %v2162_v63 = vmul.f32 %v7017_v11, %v2161_v15  ;;  %v2116_v37 = vadd.f32 1.0, %v2115_v0  ;;  %v2180_v12 = vsel %vm1988_vm5, %v6870_v9, %v2084_v1  ;;  %v4793_v26 = vld [vmem:[%s8925_s4 + $0x70] sm:$0xff]  ;;  %v2212_v1 = vpop.permute.xlu1 %2211 }
 0x37d   :  { %4936 = vmatprep.subr.bf16.mxu0 %v4935_v58  ;;  %v2102_v46 = vsel %vm2101_vm11, %v2099_v28, %v2096_v57  ;;  %5258 = vlog2.f32 %v2166_v18  ;;  %vm2164_vm12 = vcmp.lt.f32.partialorder %v2163_v27, 0.0004427343  ;;  %v2118_v43 = vand.u32 2147483647, %v6981_v60  ;;  %v4794_v27 = vld [vmem:[%s8925_s4 + $0x78] sm:$0xff] }
 0x37e   :  { %4938 = vmatpush1.bf16.msra.mxu0 %v4937_v48  ;;  %v5251_v54 = vpop.eup %5250  ;;  %v2182_v21 = vsel %vm1990_vm6, %v6877_v51, %v2102_v46  ;;  %v2151_v61 = vmul.f32 -0.5, %v7034_v40  ;;  %vm1997_vm13 = vcmp.gt.f32.partialorder %v6911_v31, 20.0  ;;  %v2134_v56 = vadd.f32 1.0, %v2133_v13 }
 0x37f   :  { %v5253_v17 = vpop.eup %5252  ;;  %v2159_v42 = vmul.f32 0.6931472, %v5251_v54  ;;  %v4939_v48 = vpack.c.bf16 %v2182_v21, %v2180_v12  ;;  %v2187_v9 = vsel %vm1995_vm8, %v6891_v47, %v2147_v41  ;;  %v2136_v51 = vand.u32 2147483647, %v7028_v45  ;;  %v2217_v54 = vpop.permute.xlu0 %2216 }
 0x380   :  { %v2114_v4 = vmul.f32 0.6931472, %v5253_v17  ;;  %v2169_v36 = vmul.f32 -0.5, %v7068_v23  ;;  %v2117_v62 = vmul.f32 %v6981_v60, %v2116_v37  ;;  %vm2119_vm14 = vcmp.lt.f32.partialorder %v2118_v43, 0.0004427343 }
 0x381   :  { %v2165_v11 = vsel %vm2164_vm12, %v2162_v63, %v2159_v42  ;;  %4940 = vmatprep.subr.bf16.mxu0 %v4939_v48  ;;  %v5255_v34 = vpop.eup %5254  ;;  %v2152_v59 = vadd.f32 1.0, %v2151_v61  ;;  %v2135_v47 = vmul.f32 %v7028_v45, %v2134_v56  ;;  %vm2137_vm15 = vcmp.lt.f32.partialorder %v2136_v51, 0.0004427343  ;;  %v2222_v42 = vpop.permute.xlu1 %2221 }
 0x382   :  { %v2189_v32 = vsel %vm1997_vm13, %v6911_v31, %v2165_v11  ;;  %4942 = vmatpush1.bf16.msra.mxu0 %v4941_v20  ;;  %v2120_v15 = vsel %vm2119_vm14, %v2117_v62, %v2114_v4  ;;  %v2132_v55 = vmul.f32 0.6931472, %v5255_v34  ;;  %v2154_v31 = vand.u32 2147483647, %v7034_v40 }
 0x383   :  { %v4949_v39 = vpack.c.bf16 %v2189_v32, %v2187_v9  ;;  %v2170_v7 = vadd.f32 1.0, %v2169_v36  ;;  %vm1992_vm1 = vcmp.gt.f32.partialorder %v6885_v35, 20.0  ;;  %vm1994_vm2 = vcmp.gt.f32.partialorder %v6909_v14, 20.0  ;;  %v2227_v11 = vpop.permute.xlu0 %2226 }
 0x384   :  { %v2138_v5 = vsel %vm2137_vm15, %v2135_v47, %v2132_v55  ;;  %v2172_v29 = vand.u32 2147483647, %v7068_v23  ;;  %v2184_v60 = vsel %vm1992_vm1, %v6885_v35, %v2120_v15  ;;  %v2153_v58 = vmul.f32 %v7034_v40, %v2152_v59 }
 0x385   :  { %v2186_v20 = vsel %vm1994_vm2, %v6909_v14, %v2138_v5  ;;  %vm2155_vm4 = vcmp.lt.f32.partialorder %v2154_v31, 0.0004427343  ;;  %v2171_v49 = vmul.f32 %v7068_v23, %v2170_v7  ;;  %vm1996_vm6 = vcmp.gt.f32.partialorder %v6920_v10, 20.0  ;;  %v4787_v23 = vld [vmem:[%s8925_s4 + $0x40] sm:$0xff]  ;;  %v2232_v36 = vpop.permute.xlu1 %2231 }
 0x386   :  { %v5257_v30 = vpop.eup %5256  ;;  %v4943_v0 = vpack.c.bf16 %v2186_v20, %v2184_v60  ;;  %vm2173_vm5 = vcmp.lt.f32.partialorder %v2172_v29, 0.0004427343  ;;  %vm1998_vm7 = vcmp.gt.f32.partialorder %v6957_v44, 20.0 }
 0x387   :  { %v2150_v52 = vmul.f32 0.6931472, %v5257_v30  ;;  %v5259_v45 = vpop.eup %5258  ;;  %v2237_v7 = vpop.permute.xlu0 %2236 }
 0x388   :  { %v2168_v16 = vmul.f32 0.6931472, %v5259_v45  ;;  %4944 = vmatprep.subr.bf16.mxu0 %v4943_v0 }
 0x389   :  { %v2156_v38 = vsel %vm2155_vm4, %v2153_v58, %v2150_v52  ;;  %4946 = vmatpush1.bf16.msra.mxu0 %v4945_v6  ;;  %v4792_v6 = vld [vmem:[%s8925_s4 + $0x68] sm:$0xff] }
 0x38a   :  { %v2174_v35 = vsel %vm2173_vm5, %v2171_v49, %v2168_v16  ;;  %v2188_v14 = vsel %vm1996_vm6, %v6920_v10, %v2156_v38  ;;  %v4789_v10 = vld [vmem:[%s8925_s4 + $0x50] sm:$0xff]  ;;  %v2242_v16 = vpop.permute.xlu1 %2241 }
 0x38b   :  { %v2190_v40 = vsel %vm1998_vm7, %v6957_v44, %v2174_v35  ;;  %v4790_v44 = vld [vmem:[%s8925_s4 + $0x58] sm:$0xff] }
 0x38c   :  { %v4947_v50 = vpack.c.bf16 %v2190_v40, %v2188_v14 }
 0x38e   :  { %4948 = vmatprep.subr.bf16.mxu0 %v4947_v50 }
 0x38f   :  { %4950 = vmatpush1.bf16.msra.mxu0 %v4949_v39 }
 0x392   :  { %4803 = vmatmul.mubr.msk.f32.vlgmr.msra.gmra.mrb[16].mxu0 %vm1845_vm3, %v4787_v23 }
 0x393   :  { %2343 = vmatprep.mubr.f32.mxu0 %v5645_v53 }
 0x396   :  { %4804 = vmatmul.mubr.msk.f32.gmra.mrb[18].mxu0 %vm1845_vm3, %v4788_v33 }
 0x397   :  { %2349 = vmatprep.mubr.f32.mxu0 %v5645_v53 }
 0x39a   :  { %4805 = vmatmul.mubr.msk.f32.gmra.mrb[20].mxu0 %vm1845_vm3, %v4789_v10 }
 0x39b   :  { %2355 = vmatprep.mubr.f32.mxu0 %v5645_v53 }
 0x39e   :  { %4806 = vmatmul.mubr.msk.f32.gmra.mrb[22].mxu0 %vm1845_vm3, %v4790_v44 }
 0x39f   :  { %2361 = vmatprep.mubr.f32.mxu0 %v5645_v53 }
 0x3a2   :  { %4807 = vmatmul.mubr.msk.f32.gmra.mrb[24].mxu0 %vm1845_vm3, %v4791_v25 }
 0x3a3   :  { %2367 = vmatprep.mubr.f32.mxu0 %v5645_v53 }
 0x3a6   :  { %4808 = vmatmul.mubr.msk.f32.gmra.mrb[26].mxu0 %vm1845_vm3, %v4792_v6 }
 0x3a7   :  { %2373 = vmatprep.mubr.f32.mxu0 %v5645_v53 }
 0x3aa   :  { %4809 = vmatmul.mubr.msk.f32.gmra.mrb[28].mxu0 %vm1845_vm3, %v4793_v26 }
 0x3ab   :  { %2379 = vmatprep.mubr.f32.mxu0 %v5645_v53 }
 0x3ae   :  { %4810 = vmatmul.mubr.msk.f32.gmra.mrb[30].mxu0 %vm1845_vm3, %v4794_v27 }
 0x3af   :  { %3543 = vmatprep.mubr.f32.mxu0 %v5645_v53 }
 0x465   :  { %v2339_v57 = vpop.f32.mrb[16].mxu0 }
 0x466   :  { %v7168_v28 = vadd.f32 %v2339_v57, %v2212_v1  ;;  %v2341_v13 = vpop.f32.mrb[17].mxu0 }
 0x467   :  { %v7173_v37 = vadd.f32 %v2341_v13, %v2212_v1 }
 0x468   :  { %v2402_v18 = vmul.f32 1.442695, %v7168_v28  ;;  %vm2386_vm8 = vcmp.gt.f32.partialorder %v7168_v28, 20.0 }
 0x469   :  { %v2345_v41 = vpop.f32.mrb[18].mxu0  ;;  %v2404_v43 = vmul.f32 1.442695, %v7173_v37  ;;  %vm2387_vm6 = vcmp.gt.f32.partialorder %v7173_v37, 20.0 }
 0x46a   :  { %5260 = vpow2.f32 %v2402_v18  ;;  %v7171_v63 = vadd.f32 %v2345_v41, %v2217_v54  ;;  %v2347_v46 = vpop.f32.mrb[19].mxu0 }
 0x46b   :  { %v7186_v62 = vadd.f32 %v2347_v46, %v2217_v54  ;;  %v2247_v46 = vpop.permute.xlu0 %2246 }
 0x46c   :  { %v2406_v17 = vmul.f32 1.442695, %v7171_v63  ;;  %vm2388_vm9 = vcmp.gt.f32.partialorder %v7171_v63, 20.0 }
 0x46d   :  { %v2351_v12 = vpop.f32.mrb[20].mxu0  ;;  %v2408_v5 = vmul.f32 1.442695, %v7186_v62  ;;  %vm2389_vm7 = vcmp.gt.f32.partialorder %v7186_v62, 20.0 }
 0x46e   :  { %5262 = vpow2.f32 %v2406_v17  ;;  %v7176_v21 = vadd.f32 %v2351_v12, %v2222_v42  ;;  %v2353_v48 = vpop.f32.mrb[21].mxu0 }
 0x46f   :  { %v7192_v47 = vadd.f32 %v2353_v48, %v2222_v42 }
 0x470   :  { %v2410_v61 = vmul.f32 1.442695, %v7176_v21  ;;  %vm2390_vm12 = vcmp.gt.f32.partialorder %v7176_v21, 20.0 }
 0x471   :  { %v2357_v4 = vpop.f32.mrb[22].mxu0  ;;  %v2412_v0 = vmul.f32 1.442695, %v7192_v47 }
 0x472   :  { %5264 = vpow2.f32 %v2410_v61  ;;  %v7180_v56 = vadd.f32 %v2357_v4, %v2227_v11  ;;  %v2359_v9 = vpop.f32.mrb[23].mxu0 }
 0x473   :  { %5266 = vpow2.f32 %v2404_v43  ;;  %v7199_v52 = vadd.f32 %v2359_v9, %v2227_v11 }
 0x474   :  { %v7182_v32 = vpop.eup %5260  ;;  %v2414_v51 = vmul.f32 1.442695, %v7180_v56  ;;  %vm2392_vm13 = vcmp.gt.f32.partialorder %v7180_v56, 20.0 }
 0x475   :  { %v2434_v39 = vadd.f32 1.0, %v7182_v32  ;;  %v2363_v34 = vpop.f32.mrb[24].mxu0  ;;  %v2437_v45 = vmul.f32 -0.5, %v7182_v32  ;;  %v2440_v50 = vand.u32 2147483647, %v7182_v32 }
 0x476   :  { %5268 = vpow2.f32 %v2414_v51  ;;  %v7188_v59 = vadd.f32 %v2363_v34, %v2232_v36  ;;  %v2365_v15 = vpop.f32.mrb[25].mxu0  ;;  %v2416_v44 = vmul.f32 1.442695, %v7199_v52 }
 0x477   :  { %5270 = vlog2.f32 %v2434_v39  ;;  %v7207_v35 = vadd.f32 %v2365_v15, %v2232_v36  ;;  %v2438_v6 = vadd.f32 1.0, %v2437_v45  ;;  %vm7226_vm10 = vcmp.lt.f32.partialorder %v2440_v50, 0.0004427343 }
 0x478   :  { %v7190_v55 = vpop.eup %5262  ;;  %v2418_v31 = vmul.f32 1.442695, %v7188_v59  ;;  %vm2394_vm2 = vcmp.gt.f32.partialorder %v7188_v59, 20.0 }
 0x479   :  { %v2452_v30 = vadd.f32 1.0, %v7190_v55  ;;  %v2369_v29 = vpop.f32.mrb[26].mxu0  ;;  %v2455_v23 = vmul.f32 -0.5, %v7190_v55  ;;  %v2458_v26 = vand.u32 2147483647, %v7190_v55  ;;  %v2439_v9 = vmul.f32 %v7182_v32, %v2438_v6 }
 0x47a   :  { %5272 = vpow2.f32 %v2418_v31  ;;  %v7197_v60 = vadd.f32 %v2369_v29, %v2237_v7  ;;  %v2371_v20 = vpop.f32.mrb[27].mxu0  ;;  %v2420_v13 = vmul.f32 1.442695, %v7207_v35 }
 0x47b   :  { %5274 = vlog2.f32 %v2452_v30  ;;  %v2456_v12 = vadd.f32 1.0, %v2455_v23  ;;  %v7231_v61 = vadd.f32 %v2371_v20, %v2237_v7  ;;  %vm7238_vm11 = vcmp.lt.f32.partialorder %v2458_v26, 0.0004427343 }
 0x47c   :  { %v7201_v58 = vpop.eup %5264  ;;  %v2422_v38 = vmul.f32 1.442695, %v7197_v60  ;;  %5276 = vpow2.f32 %v2408_v5  ;;  %vm2396_vm4 = vcmp.gt.f32.partialorder %v7197_v60, 20.0 }
 0x47d   :  { %v2470_v49 = vadd.f32 1.0, %v7201_v58  ;;  %v2375_v14 = vpop.f32.mrb[28].mxu0  ;;  %v7209_v40 = vpop.eup %5266  ;;  %v2473_v43 = vmul.f32 -0.5, %v7201_v58  ;;  %v2457_v32 = vmul.f32 %v7190_v55, %v2456_v12  ;;  %v2476_v5 = vand.u32 2147483647, %v7201_v58 }
 0x47e   :  { %5278 = vpow2.f32 %v2422_v38  ;;  %v7213_v33 = vadd.f32 %v2375_v14, %v2242_v16  ;;  %v2377_v10 = vpop.f32.mrb[29].mxu0  ;;  %v2443_v54 = vadd.f32 1.0, %v7209_v40  ;;  %v2446_v41 = vmul.f32 -0.5, %v7209_v40 }
 0x47f   :  { %5280 = vlog2.f32 %v2470_v49  ;;  %v7242_v36 = vadd.f32 %v2377_v10, %v2242_v16  ;;  %v2474_v20 = vadd.f32 1.0, %v2473_v43  ;;  %v2424_v45 = vmul.f32 1.442695, %v7231_v61 }
 0x480   :  { %v7216_v25 = vpop.eup %5268  ;;  %5282 = vpow2.f32 %v2412_v0  ;;  %v2426_v27 = vmul.f32 1.442695, %v7213_v33  ;;  %v7246_v31 = vadd.f32 1.0, %v2446_v41  ;;  %vm7287_vm14 = vcmp.lt.f32.partialorder %v2476_v5, 0.0004427343 }
 0x481   :  { %v5271_v1 = vpop.eup %5270  ;;  %v2488_v57 = vadd.f32 1.0, %v7216_v25  ;;  %v2381_v18 = vpop.f32.mrb[30].mxu0  ;;  %v2491_v34 = vmul.f32 -0.5, %v7216_v25  ;;  %v2494_v55 = vand.u32 2147483647, %v7216_v25 }
 0x482   :  { %v2436_v17 = vmul.f32 0.6931472, %v5271_v1  ;;  %5284 = vpow2.f32 %v2426_v27  ;;  %v2383_v48 = vpop.f32.mrb[31].mxu0  ;;  %v7233_v11 = vadd.f32 %v2381_v18, %v2247_v46  ;;  %v2428_v49 = vmul.f32 1.442695, %v7242_v36 }
 0x483   :  { %5286 = vlog2.f32 %v2488_v57  ;;  %v2492_v10 = vadd.f32 1.0, %v2491_v34  ;;  %v7279_v1 = vadd.f32 %v2383_v48, %v2247_v46  ;;  %v2475_v18 = vmul.f32 %v7201_v58, %v2474_v20 }
 0x484   :  { %v7235_v4 = vpop.eup %5272  ;;  %5288 = vpow2.f32 %v2416_v44  ;;  %v2442_v7 = vsel %vm7226_vm10, %v2439_v9, %v2436_v17  ;;  %v2430_v0 = vmul.f32 1.442695, %v7233_v11  ;;  %vm7291_vm15 = vcmp.lt.f32.partialorder %v2494_v55, 0.0004427343 }
 0x485   :  { %v5275_v39 = vpop.eup %5274  ;;  %v2506_v15 = vadd.f32 1.0, %v7235_v4  ;;  %5290 = vpow2.f32 %v2420_v13  ;;  %v7267_v50 = vsel %vm2386_vm8, %v7168_v28, %v2442_v7  ;;  %v2509_v28 = vmul.f32 -0.5, %v7235_v4 }
 0x486   :  { %v2454_v30 = vmul.f32 0.6931472, %v5275_v39  ;;  %v7252_v29 = vpop.eup %5276  ;;  %v2512_v57 = vand.u32 2147483647, %v7235_v4  ;;  %v2493_v17 = vmul.f32 %v7216_v25, %v2492_v10  ;;  %v2449_v12 = vand.u32 2147483647, %v7209_v40 }
 0x487   :  { %5292 = vlog2.f32 %v2506_v15  ;;  %v2510_v39 = vadd.f32 1.0, %v2509_v28  ;;  %v2432_v25 = vmul.f32 1.442695, %v7279_v1  ;;  %vm2393_vm10 = vcmp.gt.f32.partialorder %v7199_v52, 20.0 }
 0x488   :  { %v7256_v38 = vpop.eup %5278  ;;  %v2460_v16 = vsel %vm7238_vm11, %v2457_v32, %v2454_v30  ;;  %5294 = vlog2.f32 %v2443_v54  ;;  %vm7305_vm1 = vcmp.lt.f32.partialorder %v2512_v57, 0.0004427343  ;;  %v2464_v32 = vmul.f32 -0.5, %v7252_v29 }
 0x489   :  { %v5281_v14 = vpop.eup %5280  ;;  %v7272_v23 = vsel %vm2388_vm9, %v7171_v63, %v2460_v16  ;;  %v2524_v44 = vadd.f32 1.0, %v7256_v38  ;;  %5296 = vpow2.f32 %v2430_v0  ;;  %v2461_v63 = vadd.f32 1.0, %v7252_v29 }
 0x48a   :  { %v7275_v6 = vpop.eup %5282  ;;  %v4953_v26 = vpack.c.bf16 %v7272_v23, %v7267_v50  ;;  %v2472_v27 = vmul.f32 0.6931472, %v5281_v14  ;;  %v2527_v9 = vmul.f32 -0.5, %v7256_v38  ;;  %v2530_v30 = vand.u32 2147483647, %v7256_v38 }
 0x48b   :  { %5298 = vlog2.f32 %v2524_v44  ;;  %v2479_v15 = vadd.f32 1.0, %v7275_v6  ;;  %vm7327_vm5 = vcmp.lt.f32.partialorder %v2449_v12, 0.0004427343  ;;  %v2482_v44 = vmul.f32 -0.5, %v7275_v6 }
 0x48c   :  { %v7284_v13 = vpop.eup %5284  ;;  %5300 = vpow2.f32 %v2424_v45  ;;  %v2478_v58 = vsel %vm7287_vm14, %v2475_v18, %v2472_v27  ;;  %v2528_v14 = vadd.f32 1.0, %v2527_v9  ;;  %vm7341_vm8 = vcmp.lt.f32.partialorder %v2530_v30, 0.0004427343 }
 0x48d   :  { %v5287_v46 = vpop.eup %5286  ;;  %v2542_v42 = vadd.f32 1.0, %v7284_v13  ;;  %5302 = vpow2.f32 %v2428_v49  ;;  %v7320_v20 = vsel %vm2390_vm12, %v7176_v21, %v2478_v58  ;;  %v2511_v21 = vmul.f32 %v7235_v4, %v2510_v39 }
 0x48e   :  { %v7298_v48 = vpop.eup %5288  ;;  %v2490_v43 = vmul.f32 0.6931472, %v5287_v46  ;;  %5304 = vlog2.f32 %v2461_v63  ;;  %v2465_v57 = vadd.f32 1.0, %v2464_v32  ;;  %v2448_v4 = vmul.f32 %v7209_v40, %v7246_v31 }
 0x48f   :  { %v7303_v51 = vpop.eup %5290  ;;  %5306 = vlog2.f32 %v2542_v42  ;;  %v2497_v10 = vadd.f32 1.0, %v7298_v48  ;;  %v2467_v46 = vand.u32 2147483647, %v7252_v29  ;;  %v2529_v58 = vmul.f32 %v7256_v38, %v2528_v14 }
 0x490   :  { %v2496_v7 = vsel %vm7291_vm15, %v2493_v17, %v2490_v43  ;;  %5308 = vlog2.f32 %v2479_v15  ;;  %v2515_v63 = vadd.f32 1.0, %v7303_v51  ;;  %v2548_v43 = vand.u32 2147483647, %v7284_v13 }
 0x491   :  { %v5293_v5 = vpop.eup %5292  ;;  %v7325_v45 = vsel %vm2392_vm13, %v7180_v56, %v2496_v7  ;;  %v2545_v56 = vmul.f32 -0.5, %v7284_v13  ;;  %5310 = vpow2.f32 %v2432_v25  ;;  %v2483_v25 = vadd.f32 1.0, %v2482_v44 }
 0x492   :  { %v5295_v16 = vpop.eup %5294  ;;  %v4957_v55 = vpack.c.bf16 %v7325_v45, %v7320_v20  ;;  %v2508_v49 = vmul.f32 0.6931472, %v5293_v5  ;;  %5312 = vlog2.f32 %v2497_v10  ;;  %v2500_v15 = vmul.f32 -0.5, %v7298_v48 }
 0x493   :  { %v7339_v27 = vpop.eup %5296  ;;  %v2445_v41 = vmul.f32 0.6931472, %v5295_v16  ;;  %v2546_v39 = vadd.f32 1.0, %v2545_v56  ;;  %v2466_v34 = vmul.f32 %v7252_v29, %v2465_v57  ;;  %vm2391_vm9 = vcmp.gt.f32.partialorder %v7192_v47, 20.0 }
 0x494   :  { %v2560_v54 = vadd.f32 1.0, %v7339_v27  ;;  %v2514_v42 = vsel %vm7305_vm1, %v2511_v21, %v2508_v49  ;;  %v2563_v7 = vmul.f32 -0.5, %v7339_v27  ;;  %vm2468_vm11 = vcmp.lt.f32.partialorder %v2467_v46, 0.0004427343 }
 0x495   :  { %v5299_v18 = vpop.eup %5298  ;;  %v7368_v38 = vsel %vm2394_vm2, %v7188_v59, %v2514_v42  ;;  %v2451_v32 = vsel %vm7327_vm5, %v2448_v4, %v2445_v41  ;;  %v2485_v49 = vand.u32 2147483647, %v7275_v6  ;;  %v2484_v21 = vmul.f32 %v7275_v6, %v2483_v25 }
 0x496   :  { %v7350_v17 = vpop.eup %5300  ;;  %v2526_v12 = vmul.f32 0.6931472, %v5299_v18  ;;  %5314 = vlog2.f32 %v2560_v54  ;;  %v2501_v56 = vadd.f32 1.0, %v2500_v15  ;;  %vm2398_vm12 = vcmp.gt.f32.partialorder %v7213_v33, 20.0 }
 0x497   :  { %v7356_v9 = vpop.eup %5302  ;;  %5316 = vlog2.f32 %v2515_v63  ;;  %v2533_v14 = vadd.f32 1.0, %v7350_v17  ;;  %v2564_v0 = vadd.f32 1.0, %v2563_v7  ;;  %v2579_v44 = vsel %vm2387_vm6, %v7173_v37, %v2451_v32 }
 0x498   :  { %v5305_v40 = vpop.eup %5304  ;;  %v2532_v31 = vsel %vm7341_vm8, %v2529_v58, %v2526_v12  ;;  %v2518_v6 = vmul.f32 -0.5, %v7303_v51  ;;  %v2547_v4 = vmul.f32 %v7284_v13, %v2546_v39  ;;  %vm7394_vm13 = vcmp.lt.f32.partialorder %v2548_v43, 0.0004427343 }
 0x499   :  { %v7373_v30 = vsel %vm2396_vm4, %v7197_v60, %v2532_v31  ;;  %v2463_v5 = vmul.f32 0.6931472, %v5305_v40  ;;  %v5307_v29 = vpop.eup %5306  ;;  %v2503_v60 = vand.u32 2147483647, %v7298_v48  ;;  %5318 = vlog2.f32 %v2533_v14 }
 0x49a   :  { %v4961_v16 = vpack.c.bf16 %v7373_v30, %v7368_v38  ;;  %v5309_v59 = vpop.eup %5308  ;;  %v2544_v18 = vmul.f32 0.6931472, %v5307_v29  ;;  %vm7398_vm14 = vcmp.lt.f32.partialorder %v2485_v49, 0.0004427343  ;;  %v2566_v42 = vand.u32 2147483647, %v7339_v27 }
 0x49b   :  { %v2469_v10 = vsel %vm2468_vm11, %v2466_v34, %v2463_v5  ;;  %v2481_v57 = vmul.f32 0.6931472, %v5309_v59  ;;  %v7390_v63 = vpop.eup %5310  ;;  %v2502_v25 = vmul.f32 %v7298_v48, %v2501_v56  ;;  %vm2504_vm15 = vcmp.lt.f32.partialorder %v2503_v60, 0.0004427343  ;;  %v2838_v38 = vld [vmem:[%s8930_s9 + $0x18] sm:$0xff]  ;;  %v2839_v30 = vld [vmem:[%s8930_s9 + $0x20] sm:$0xff] }
 0x49c   :  { %v2581_v28 = vsel %vm2389_vm7, %v7186_v62, %v2469_v10  ;;  %v5313_v41 = vpop.eup %5312  ;;  %v2551_v62 = vadd.f32 1.0, %v7356_v9  ;;  %v2536_v13 = vmul.f32 -0.5, %v7350_v17  ;;  %v2569_v43 = vadd.f32 1.0, %v7390_v63 }
 0x49d   :  { %v4951_v54 = vpack.c.bf16 %v2581_v28, %v2579_v44  ;;  %v2487_v12 = vsel %vm7398_vm14, %v2484_v21, %v2481_v57  ;;  %v2499_v58 = vmul.f32 0.6931472, %v5313_v41  ;;  %v2550_v15 = vsel %vm7394_vm13, %v2547_v4, %v2544_v18 }
 0x49e   :  { %5320 = vlog2.f32 %v2551_v62  ;;  %v2565_v40 = vmul.f32 %v7339_v27, %v2564_v0  ;;  %v2519_v7 = vadd.f32 1.0, %v2518_v6  ;;  %v2583_v50 = vsel %vm2391_vm9, %v7192_v47, %v2487_v12  ;;  %v2841_v62 = vld [vmem:[%s8930_s9 + $0x30] sm:$0xff]  ;;  %v2605_v12 = vpop.permute.xlu1 %2604 }
 0x49f   :  { %4952 = vmatprep.subr.bf16.mxu1 %v4951_v54  ;;  %v2505_v31 = vsel %vm2504_vm15, %v2502_v25, %v2499_v58  ;;  %5322 = vlog2.f32 %v2569_v43  ;;  %vm2567_vm1 = vcmp.lt.f32.partialorder %v2566_v42, 0.0004427343  ;;  %v2521_v32 = vand.u32 2147483647, %v7303_v51  ;;  %v2842_v42 = vld [vmem:[%s8930_s9 + $0x38] sm:$0xff] }
 0x4a0   :  { %4954 = vmatpush1.bf16.msra.mxu1 %v4953_v26  ;;  %v5315_v39 = vpop.eup %5314  ;;  %v2585_v23 = vsel %vm2393_vm10, %v7199_v52, %v2505_v31  ;;  %v2554_v5 = vmul.f32 -0.5, %v7356_v9  ;;  %vm2400_vm2 = vcmp.gt.f32.partialorder %v7233_v11, 20.0  ;;  %v2537_v49 = vadd.f32 1.0, %v2536_v13 }
 0x4a1   :  { %v5317_v34 = vpop.eup %5316  ;;  %v2562_v48 = vmul.f32 0.6931472, %v5315_v39  ;;  %v4955_v26 = vpack.c.bf16 %v2585_v23, %v2583_v50  ;;  %v2590_v47 = vsel %vm2398_vm12, %v7213_v33, %v2550_v15  ;;  %v2539_v52 = vand.u32 2147483647, %v7350_v17  ;;  %v2610_v15 = vpop.permute.xlu0 %2609 }
 0x4a2   :  { %v2517_v29 = vmul.f32 0.6931472, %v5317_v34  ;;  %v2572_v59 = vmul.f32 -0.5, %v7390_v63  ;;  %v2520_v21 = vmul.f32 %v7303_v51, %v2519_v7  ;;  %vm2522_vm4 = vcmp.lt.f32.partialorder %v2521_v32, 0.0004427343  ;;  %v2615_v23 = vpop.permute.xlu1 %2614 }
 0x4a3   :  { %v2568_v27 = vsel %vm2567_vm1, %v2565_v40, %v2562_v48  ;;  %4956 = vmatprep.subr.bf16.mxu1 %v4955_v26  ;;  %v5319_v56 = vpop.eup %5318  ;;  %v2555_v60 = vadd.f32 1.0, %v2554_v5  ;;  %v2538_v33 = vmul.f32 %v7350_v17, %v2537_v49  ;;  %vm2540_vm5 = vcmp.lt.f32.partialorder %v2539_v52, 0.0004427343 }
 0x4a4   :  { %v2592_v14 = vsel %vm2400_vm2, %v7233_v11, %v2568_v27  ;;  %4958 = vmatpush1.bf16.msra.mxu1 %v4957_v55  ;;  %v2523_v0 = vsel %vm2522_vm4, %v2520_v21, %v2517_v29  ;;  %v2535_v44 = vmul.f32 0.6931472, %v5319_v56  ;;  %v2557_v11 = vand.u32 2147483647, %v7356_v9 }
 0x4a5   :  { %v4965_v10 = vpack.c.bf16 %v2592_v14, %v2590_v47  ;;  %v2573_v28 = vadd.f32 1.0, %v2572_v59  ;;  %vm2395_vm6 = vcmp.gt.f32.partialorder %v7207_v35, 20.0  ;;  %vm2397_vm7 = vcmp.gt.f32.partialorder %v7231_v61, 20.0  ;;  %v2620_v47 = vpop.permute.xlu0 %2619 }
 0x4a6   :  { %v2541_v20 = vsel %vm2540_vm5, %v2538_v33, %v2535_v44  ;;  %v2575_v45 = vand.u32 2147483647, %v7390_v63  ;;  %v2587_v51 = vsel %vm2395_vm6, %v7207_v35, %v2523_v0  ;;  %v2556_v54 = vmul.f32 %v7356_v9, %v2555_v60 }
 0x4a7   :  { %v2589_v55 = vsel %vm2397_vm7, %v7231_v61, %v2541_v20  ;;  %vm2558_vm8 = vcmp.lt.f32.partialorder %v2557_v11, 0.0004427343  ;;  %v2574_v46 = vmul.f32 %v7390_v63, %v2573_v28  ;;  %vm2399_vm10 = vcmp.gt.f32.partialorder %v7242_v36, 20.0  ;;  %v2594_v63 = vld [vmem:[%s8927_s6] sm:$0xff] }
 0x4a8   :  { %v5321_v57 = vpop.eup %5320  ;;  %v4959_v6 = vpack.c.bf16 %v2589_v55, %v2587_v51  ;;  %vm2576_vm9 = vcmp.lt.f32.partialorder %v2575_v45, 0.0004427343  ;;  %vm2401_vm11 = vcmp.gt.f32.partialorder %v7279_v1, 20.0  ;;  %vm3005_vm6 = vcmask 1040384  }
 0x4a9   :  { %v2553_v18 = vmul.f32 0.6931472, %v5321_v57  ;;  %v5323_v17 = vpop.eup %5322 }
 0x4aa   :  { %v2571_v4 = vmul.f32 0.6931472, %v5323_v17  ;;  %4960 = vmatprep.subr.bf16.mxu1 %v4959_v6 }
 0x4ab   :  { %v2559_v41 = vsel %vm2558_vm8, %v2556_v54, %v2553_v18  ;;  %4962 = vmatpush1.bf16.msra.mxu1 %v4961_v16  ;;  %v2840_v16 = vld [vmem:[%s8930_s9 + $0x28] sm:$0xff] }
 0x4ac   :  { %v2577_v35 = vsel %vm2576_vm9, %v2574_v46, %v2571_v4  ;;  %v2591_v61 = vsel %vm2399_vm10, %v7242_v36, %v2559_v41  ;;  %v2595_v36 = vld [vmem:[%s8927_s6 + $0x8] sm:$0xff] }
 0x4ad   :  { %v2593_v9 = vsel %vm2401_vm11, %v7279_v1, %v2577_v35  ;;  %v2837_v1 = vld [vmem:[%s8930_s9 + $0x10] sm:$0xff] }
 0x4ae   :  { %v4963_v37 = vpack.c.bf16 %v2593_v9, %v2591_v61 }
 0x4b0   :  { %4964 = vmatprep.subr.bf16.mxu1 %v4963_v37 }
 0x4b1   :  { %4966 = vmatpush1.bf16.msra.mxu1 %v4965_v10 }
 0x4b2   :  { %4968 = vmatprep.subr.bf16.mxu1 %v6352_v2  ;;  %v2596_v2 = vld [vmem:[%s8927_s6 + $0x10] sm:$0xff] }
 0x4b4   :  { %4811 = vmatmul.mubr.msk.f32.vlgmr.msra.gmra.mrb[16].mxu1 %vm1845_vm3, %v2594_v63 }
 0x4b5   :  { %4970 = vmatpush1.bf16.msra.mxu1 %v6355_v3  ;;  %2704 = vmatprep.mubr.f32.mxu1 %v5645_v53  ;;  %v2597_v3 = vld [vmem:[%s8927_s6 + $0x18] sm:$0x1] }
 0x4b6   :  { %4972 = vmatprep.subr.bf16.mxu1 %v6505_v22  ;;  %v5612_v22 = vld [vmem:[#allocation2 + $0x68] sm:$0xff] }
 0x4b8   :  { %4812 = vmatmul.mubr.msk.f32.gmra.mrb[18].mxu1 %vm1845_vm3, %v2595_v36 }
 0x4b9   :  { %4974 = vmatpush1.bf16.msra.mxu1 %v6508_v19  ;;  %2710 = vmatprep.mubr.f32.mxu1 %v5645_v53  ;;  %v5613_v19 = vld [vmem:[#allocation2 + $0x60] sm:$0xff] }
 0x4ba   :  { %4976 = vmatprep.subr.bf16.mxu1 %v6513_v24  ;;  %v2835_v24 = vld [vmem:[%s8930_s9] sm:$0xff] }
 0x4bc   :  { %4813 = vmatmul.mubr.msk.f32.gmra.mrb[20].mxu1 %vm1845_vm3, %v2596_v2 }
 0x4bd   :  { %4978 = vmatpush1.bf16.msra.mxu1 %v6362_v8  ;;  %2716 = vmatprep.mubr.f32.mxu1 %v5645_v53  ;;  %v2836_v8 = vld [vmem:[%s8930_s9 + $0x8] sm:$0xff] }
 0x4be   :  { %2879 = vmatprep.subr.mxu1 %v5612_v22 }
 0x4c0   :  { %4814 = vmatmul.mubr.msk.f32.gmra.mrb[22].mxu1 %vm1845_vm3, %v2597_v3 }
 0x4c1   :  { %2880 = vmatpush1.msra.mxu1 %v5613_v19  ;;  %2931 = vmatprep.mubr.f32.mxu1 %v5645_v53 }
 0x4c4   :  { %4815 = vmatmul.mubr.msk.f32.vlgmr.msra.gmra.mrb[24].mxu1 %vm1443_vm0, %v2835_v24 }
 0x4c5   :  { %2937 = vmatprep.mubr.f32.mxu1 %v5645_v53 }
 0x4c8   :  { %4816 = vmatmul.mubr.msk.f32.gmra.mrb[26].mxu1 %vm1443_vm0, %v2836_v8 }
 0x4c9   :  { %2943 = vmatprep.mubr.f32.mxu1 %v5645_v53 }
 0x4cc   :  { %4817 = vmatmul.mubr.msk.f32.gmra.mrb[28].mxu1 %vm1443_vm0, %v2837_v1 }
 0x4cd   :  { %2949 = vmatprep.mubr.f32.mxu1 %v5645_v53 }
 0x4d0   :  { %4818 = vmatmul.mubr.msk.f32.gmra.mrb[30].mxu1 %vm1443_vm0, %v2838_v38 }
 0x4d1   :  { %2955 = vmatprep.mubr.f32.mxu1 %v5645_v53 }
 0x4d4   :  { %4819 = vmatmul.mubr.msk.f32.gmra.mrb[32].mxu1 %vm1443_vm0, %v2839_v30 }
 0x4d5   :  { %2961 = vmatprep.mubr.f32.mxu1 %v5645_v53 }
 0x4d8   :  { %4820 = vmatmul.mubr.msk.f32.gmra.mrb[34].mxu1 %vm1443_vm0, %v2840_v16 }
 0x4d9   :  { %2967 = vmatprep.mubr.f32.mxu1 %v5645_v53 }
 0x4dc   :  { %4821 = vmatmul.mubr.msk.f32.gmra.mrb[36].mxu1 %vm1443_vm0, %v2841_v62 }
 0x4dd   :  { %2973 = vmatprep.mubr.f32.mxu1 %v5645_v53 }
 0x4e0   :  { %4822 = vmatmul.mubr.msk.f32.gmra.mrb[38].mxu1 %vm1443_vm0, %v2842_v42 }
 0x4e1   :  { %3076 = vmatprep.mubr.f32.mxu1 %v5645_v53 }
 0x587   :  { %v2700_v58 = vpop.f32.mrb[16].mxu1 }
 0x588   :  { %v7516_v25 = vadd.f32 %v2700_v58, %v2605_v12  ;;  %v2702_v13 = vpop.f32.mrb[17].mxu1 }
 0x589   :  { %v7518_v43 = vadd.f32 %v2702_v13, %v2605_v12 }
 0x58a   :  { %v2731_v39 = vmul.f32 1.442695, %v7516_v25  ;;  %vm2723_vm0 = vcmp.gt.f32.partialorder %v7516_v25, 20.0 }
 0x58b   :  { %v2733_v40 = vmul.f32 1.442695, %v7518_v43  ;;  %v2706_v31 = vpop.f32.mrb[18].mxu1  ;;  %vm2724_vm12 = vcmp.gt.f32.partialorder %v7518_v43, 20.0 }
 0x58c   :  { %5324 = vpow2.f32 %v2731_v39  ;;  %v7522_v7 = vadd.f32 %v2706_v31, %v2610_v15  ;;  %v2708_v34 = vpop.f32.mrb[19].mxu1  ;;  %v3141_v39 = vpop.permute.xlu0 %3140 }
 0x58d   :  { %5326 = vpow2.f32 %v2733_v40  ;;  %v7524_v48 = vadd.f32 %v2708_v34, %v2610_v15 }
 0x58e   :  { %v2735_v50 = vmul.f32 1.442695, %v7522_v7  ;;  %vm2725_vm13 = vcmp.gt.f32.partialorder %v7522_v7, 20.0 }
 0x58f   :  { %v2737_v26 = vmul.f32 1.442695, %v7524_v48  ;;  %v2712_v32 = vpop.f32.mrb[20].mxu1  ;;  %vm2726_vm14 = vcmp.gt.f32.partialorder %v7524_v48, 20.0 }
 0x590   :  { %5328 = vpow2.f32 %v2735_v50  ;;  %v7528_v5 = vadd.f32 %v2712_v32, %v2615_v23  ;;  %v2714_v27 = vpop.f32.mrb[21].mxu1 }
 0x591   :  { %5330 = vpow2.f32 %v2737_v26  ;;  %v7530_v29 = vadd.f32 %v2714_v27, %v2615_v23 }
 0x592   :  { %v2739_v49 = vmul.f32 1.442695, %v7528_v5  ;;  %vm2727_vm7 = vcmp.gt.f32.partialorder %v7528_v5, 20.0 }
 0x593   :  { %v2741_v14 = vmul.f32 1.442695, %v7530_v29  ;;  %v2718_v52 = vpop.f32.mrb[22].mxu1 }
 0x594   :  { %5332 = vpow2.f32 %v2739_v49  ;;  %v7534_v59 = vadd.f32 %v2718_v52, %v2620_v47  ;;  %v2720_v10 = vpop.f32.mrb[23].mxu1 }
 0x595   :  { %5334 = vpow2.f32 %v2741_v14  ;;  %v7536_v21 = vadd.f32 %v2720_v10, %v2620_v47 }
 0x596   :  { %v5325_v56 = vpop.eup %5324  ;;  %v2743_v60 = vmul.f32 1.442695, %v7534_v59  ;;  %vm2729_vm9 = vcmp.gt.f32.partialorder %v7534_v59, 20.0 }
 0x597   :  { %v5327_v0 = vpop.eup %5326  ;;  %v2747_v44 = vadd.f32 1.0, %v5325_v56  ;;  %v2745_v33 = vmul.f32 1.442695, %v7536_v21  ;;  %v2750_v45 = vmul.f32 -0.5, %v5325_v56  ;;  %v2753_v41 = vand.u32 2147483647, %v5325_v56 }
 0x598   :  { %5336 = vpow2.f32 %v2743_v60  ;;  %v2756_v11 = vadd.f32 1.0, %v5327_v0  ;;  %v2759_v18 = vmul.f32 -0.5, %v5327_v0  ;;  %v2762_v37 = vand.u32 2147483647, %v5327_v0 }
 0x599   :  { %5338 = vlog2.f32 %v2747_v44  ;;  %v2751_v6 = vadd.f32 1.0, %v2750_v45  ;;  %vm7555_vm15 = vcmp.lt.f32.partialorder %v2753_v41, 0.0004427343 }
 0x59a   :  { %v5329_v28 = vpop.eup %5328  ;;  %5340 = vpow2.f32 %v2745_v33  ;;  %v2760_v9 = vadd.f32 1.0, %v2759_v18  ;;  %vm7562_vm1 = vcmp.lt.f32.partialorder %v2762_v37, 0.0004427343 }
 0x59b   :  { %v5331_v57 = vpop.eup %5330  ;;  %v2765_v20 = vadd.f32 1.0, %v5329_v28  ;;  %5342 = vlog2.f32 %v2756_v11  ;;  %v2768_v4 = vmul.f32 -0.5, %v5329_v28  ;;  %v2771_v36 = vand.u32 2147483647, %v5329_v28 }
 0x59c   :  { %v2774_v51 = vadd.f32 1.0, %v5331_v57  ;;  %v2777_v35 = vmul.f32 -0.5, %v5331_v57  ;;  %v2752_v19 = vmul.f32 %v5325_v56, %v2751_v6  ;;  %v2761_v42 = vmul.f32 %v5327_v0, %v2760_v9 }
 0x59d   :  { %5344 = vlog2.f32 %v2765_v20  ;;  %v2769_v8 = vadd.f32 1.0, %v2768_v4  ;;  %v2780_v58 = vand.u32 2147483647, %v5331_v57  ;;  %vm7566_vm2 = vcmp.lt.f32.partialorder %v2771_v36, 0.0004427343 }
 0x59e   :  { %v7540_v55 = vpop.eup %5332  ;;  %5346 = vlog2.f32 %v2774_v51  ;;  %v2778_v30 = vadd.f32 1.0, %v2777_v35 }
 0x59f   :  { %v7542_v54 = vpop.eup %5334  ;;  %v2783_v17 = vadd.f32 1.0, %v7540_v55  ;;  %v2786_v1 = vmul.f32 -0.5, %v7540_v55  ;;  %v2770_v23 = vmul.f32 %v5329_v28, %v2769_v8  ;;  %v2789_v26 = vand.u32 2147483647, %v7540_v55 }
 0x5a0   :  { %v2792_v46 = vadd.f32 1.0, %v7542_v54  ;;  %v2795_v62 = vmul.f32 -0.5, %v7542_v54  ;;  %v2779_v47 = vmul.f32 %v5331_v57, %v2778_v30  ;;  %vm2781_vm4 = vcmp.lt.f32.partialorder %v2780_v58, 0.0004427343  ;;  %v2833_v30 = vld [vmem:[%s8929_s8 + $0x30] sm:$0xff] }
 0x5a1   :  { %5348 = vlog2.f32 %v2783_v17  ;;  %v2787_v32 = vadd.f32 1.0, %v2786_v1  ;;  %v2798_v51 = vand.u32 2147483647, %v7542_v54  ;;  %vm7594_vm5 = vcmp.lt.f32.partialorder %v2789_v26, 0.0004427343 }
 0x5a2   :  { %v7546_v61 = vpop.eup %5336  ;;  %5350 = vlog2.f32 %v2792_v46  ;;  %v2796_v52 = vadd.f32 1.0, %v2795_v62  ;;  %v3136_v62 = vpop.permute.xlu1 %3135 }
 0x5a3   :  { %v5339_v63 = vpop.eup %5338  ;;  %v2801_v2 = vadd.f32 1.0, %v7546_v61  ;;  %v2804_v15 = vmul.f32 -0.5, %v7546_v61  ;;  %vm2799_vm8 = vcmp.lt.f32.partialorder %v2798_v51, 0.0004427343 }
 0x5a4   :  { %v7553_v3 = vpop.eup %5340  ;;  %v2749_v22 = vmul.f32 0.6931472, %v5339_v63  ;;  %v2797_v46 = vmul.f32 %v7542_v54, %v2796_v52 }
 0x5a5   :  { %5352 = vlog2.f32 %v2801_v2  ;;  %v2810_v38 = vadd.f32 1.0, %v7553_v3  ;;  %v5343_v16 = vpop.eup %5342  ;;  %v2813_v10 = vmul.f32 -0.5, %v7553_v3  ;;  %v2805_v44 = vadd.f32 1.0, %v2804_v15 }
 0x5a6   :  { %v2758_v40 = vmul.f32 0.6931472, %v5343_v16  ;;  %v2755_v34 = vsel %vm7555_vm15, %v2752_v19, %v2749_v22  ;;  %vm2980_vm15 = vcmask 203776   ;;  %v2834_v16 = vld [vmem:[%s8929_s8 + $0x38] sm:$0xff] }
 0x5a7   :  { %v5345_v13 = vpop.eup %5344  ;;  %5354 = vlog2.f32 %v2810_v38  ;;  %v2819_v60 = vsel %vm2723_vm0, %v7516_v25, %v2755_v34  ;;  %v2807_v25 = vand.u32 2147483647, %v7546_v61  ;;  %v2814_v6 = vadd.f32 1.0, %v2813_v10  ;;  %v2832_v38 = vld [vmem:[%s8929_s8 + $0x28] sm:$0xff] }
 0x5a8   :  { %v5347_v31 = vpop.eup %5346  ;;  %v2767_v50 = vmul.f32 0.6931472, %v5345_v13  ;;  %v2764_v27 = vsel %vm7562_vm1, %v2761_v42, %v2758_v40  ;;  %v2806_v9 = vmul.f32 %v7546_v61, %v2805_v44  ;;  %vm2728_vm0 = vcmp.gt.f32.partialorder %v7530_v29, 20.0 }
 0x5a9   :  { %v2776_v49 = vmul.f32 0.6931472, %v5347_v31  ;;  %v2820_v20 = vsel %vm2724_vm12, %v7518_v43, %v2764_v27  ;;  %v2816_v43 = vand.u32 2147483647, %v7553_v3  ;;  %vm2808_vm10 = vcmp.lt.f32.partialorder %v2807_v25, 0.0004427343 }
 0x5aa   :  { %v2773_v14 = vsel %vm7566_vm2, %v2770_v23, %v2767_v50  ;;  %v2815_v2 = vmul.f32 %v7553_v3, %v2814_v6  ;;  %vm2730_vm12 = vcmp.gt.f32.partialorder %v7536_v21, 20.0  ;;  %v2831_v3 = vld [vmem:[%s8929_s8 + $0x20] sm:$0xff]  ;;  %v3146_v23 = vpop.permute.xlu1 %3145 }
 0x5ab   :  { %v5349_v56 = vpop.eup %5348  ;;  %v2821_v0 = vsel %vm2725_vm13, %v7522_v7, %v2773_v14  ;;  %v2782_v33 = vsel %vm2781_vm4, %v2779_v47, %v2776_v49  ;;  %v2788_v7 = vmul.f32 %v7540_v55, %v2787_v32  ;;  %vm2817_vm11 = vcmp.lt.f32.partialorder %v2816_v43, 0.0004427343  ;;  %v3151_v14 = vpop.permute.xlu0 %3150 }
 0x5ac   :  { %v5351_v11 = vpop.eup %5350  ;;  %v4981_v28 = vpack.c.bf16 %v2821_v0, %v2819_v60  ;;  %v2785_v57 = vmul.f32 0.6931472, %v5349_v56  ;;  %v2822_v45 = vsel %vm2726_vm14, %v7524_v48, %v2782_v33  ;;  %vm5646_vm13 = vmmov 1  }
 0x5ad   :  { %v4979_v18 = vpack.c.bf16 %v2822_v45, %v2820_v20  ;;  %v2794_v17 = vmul.f32 0.6931472, %v5351_v11  ;;  %vm4984_vm14 = vmpackc.low %vm3005_vm6, %vm5646_vm13 }
 0x5ae   :  { %v2791_v48 = vsel %vm7594_vm5, %v2788_v7, %v2785_v57  ;;  %v3156_v44 = vpop.permute.xlu1 %3155 }
 0x5af   :  { %v5353_v41 = vpop.eup %5352  ;;  %4980 = vmatprep.subr.bf16.mxu1 %v4979_v18  ;;  %v2800_v37 = vsel %vm2799_vm8, %v2797_v46, %v2794_v17  ;;  %v2823_v22 = vsel %vm2727_vm7, %v7528_v5, %v2791_v48  ;;  %v2827_v5 = vld [vmem:[%s8929_s8] sm:$0xff]  ;;  %v3161_v18 = vpop.permute.xlu0 %3160 }
 0x5b0   :  { %v2803_v35 = vmul.f32 0.6931472, %v5353_v41  ;;  %4982 = vmatpush1.bf16.msra.mxu1 %v4981_v28  ;;  %v2824_v24 = vsel %vm2728_vm0, %v7530_v29, %v2800_v37  ;;  %v2828_v29 = vld [vmem:[%s8929_s8 + $0x8] sm:$0xff] }
 0x5b1   :  { %v5355_v55 = vpop.eup %5354 }
 0x5b2   :  { %v2809_v63 = vsel %vm2808_vm10, %v2806_v9, %v2803_v35  ;;  %v2812_v36 = vmul.f32 0.6931472, %v5355_v55  ;;  %v3166_v55 = vpop.permute.xlu1 %3165 }
 0x5b3   :  { %v2825_v54 = vsel %vm2729_vm9, %v7534_v59, %v2809_v63  ;;  %v2829_v59 = vld [vmem:[%s8929_s8 + $0x10] sm:$0xff] }
 0x5b4   :  { %v4986_v61 = vpack.c.bf16 %v2825_v54, %v2823_v22  ;;  %v2818_v19 = vsel %vm2817_vm11, %v2815_v2, %v2812_v36 }
 0x5b5   :  { %v2826_v8 = vsel %vm2730_vm12, %v7536_v21, %v2818_v19  ;;  %v2830_v21 = vld [vmem:[%s8929_s8 + $0x18] sm:$0xff] }
 0x5b6   :  { %v4983_v1 = vpack.c.bf16 %v2826_v8, %v2824_v24 }
 0x5b8   :  { %4985 = vmatprep.subr.msk.bf16.mxu1 %vm4984_vm14, %v4983_v1 }
 0x5b9   :  { %4988 = vmatpush1.bf16.msk.msra.mxu1 %vm4984_vm14, %v4986_v61 }
 0x5bc   :  { %4825 = vmatmul.mubr.msk.f32.vlgmr.msra.gmra.mrb[24].mxu1 %vm2980_vm15, %v2827_v5 }
 0x5bd   :  { %3082 = vmatprep.mubr.f32.mxu1 %v5645_v53 }
 0x5c0   :  { %4826 = vmatmul.mubr.msk.f32.gmra.mrb[26].mxu1 %vm2980_vm15, %v2828_v29 }
 0x5c1   :  { %3088 = vmatprep.mubr.f32.mxu1 %v5645_v53 }
 0x5c4   :  { %4827 = vmatmul.mubr.msk.f32.gmra.mrb[28].mxu1 %vm2980_vm15, %v2829_v59 }
 0x5c5   :  { %3094 = vmatprep.mubr.f32.mxu1 %v5645_v53 }
 0x5c8   :  { %4828 = vmatmul.mubr.msk.f32.gmra.mrb[30].mxu1 %vm2980_vm15, %v2830_v21 }
 0x5c9   :  { %3100 = vmatprep.mubr.f32.mxu1 %v5645_v53 }
 0x5cc   :  { %4829 = vmatmul.mubr.msk.f32.gmra.mrb[32].mxu1 %vm2980_vm15, %v2831_v3 }
 0x5cd   :  { %3106 = vmatprep.mubr.f32.mxu1 %v5645_v53 }
 0x5d0   :  { %4830 = vmatmul.mubr.msk.f32.gmra.mrb[34].mxu1 %vm2980_vm15, %v2832_v38 }
 0x5d1   :  { %3112 = vmatprep.mubr.f32.mxu1 %v5645_v53 }
 0x5d4   :  { %4831 = vmatmul.mubr.msk.f32.gmra.mrb[36].mxu1 %vm2980_vm15, %v2833_v30 }
 0x5d5   :  { %3118 = vmatprep.mubr.f32.mxu1 %v5645_v53 }
 0x5d8   :  { %4832 = vmatmul.mubr.msk.f32.gmra.mrb[38].mxu1 %vm2980_vm15, %v2834_v16 }
 0x5d9   :  { %4349 = vmatprep.mubr.f32.mxu1 %v5645_v53 }
 0x68f   :  { %v3078_v42 = vpop.f32.mrb[24].mxu1 }
 0x690   :  { %v7653_v12 = vadd.f32 %v3136_v62, %v3078_v42  ;;  %v3080_v58 = vpop.f32.mrb[25].mxu1 }
 0x691   :  { %v7658_v34 = vadd.f32 %v3136_v62, %v3080_v58  ;;  %v3171_v62 = vpop.permute.xlu0 %3170 }
 0x692   :  { %v3205_v13 = vmul.f32 1.442695, %v7653_v12  ;;  %vm3189_vm1 = vcmp.gt.f32.partialorder %v7653_v12, 20.0 }
 0x693   :  { %v3084_v15 = vpop.f32.mrb[26].mxu1  ;;  %v3207_v49 = vmul.f32 1.442695, %v7658_v34  ;;  %vm3190_vm13 = vcmp.gt.f32.partialorder %v7658_v34, 20.0 }
 0x694   :  { %5356 = vpow2.f32 %v3205_v13  ;;  %v7656_v40 = vadd.f32 %v3141_v39, %v3084_v15  ;;  %v3086_v31 = vpop.f32.mrb[27].mxu1 }
 0x695   :  { %v7671_v11 = vadd.f32 %v3141_v39, %v3086_v31 }
 0x696   :  { %v3209_v50 = vmul.f32 1.442695, %v7656_v40  ;;  %vm3191_vm2 = vcmp.gt.f32.partialorder %v7656_v40, 20.0 }
 0x697   :  { %v3090_v26 = vpop.f32.mrb[28].mxu1  ;;  %v3211_v17 = vmul.f32 1.442695, %v7671_v11  ;;  %vm3192_vm14 = vcmp.gt.f32.partialorder %v7671_v11, 20.0 }
 0x698   :  { %5358 = vpow2.f32 %v3209_v50  ;;  %v7661_v32 = vadd.f32 %v3146_v23, %v3090_v26  ;;  %v3092_v27 = vpop.f32.mrb[29].mxu1 }
 0x699   :  { %v7677_v51 = vadd.f32 %v3146_v23, %v3092_v27 }
 0x69a   :  { %v3213_v47 = vmul.f32 1.442695, %v7661_v32  ;;  %vm3193_vm6 = vcmp.gt.f32.partialorder %v7661_v32, 20.0 }
 0x69b   :  { %v3096_v52 = vpop.f32.mrb[30].mxu1  ;;  %v3215_v35 = vmul.f32 1.442695, %v7677_v51 }
 0x69c   :  { %5360 = vpow2.f32 %v3213_v47  ;;  %v7665_v10 = vadd.f32 %v3151_v14, %v3096_v52  ;;  %v3098_v56 = vpop.f32.mrb[31].mxu1 }
 0x69d   :  { %5362 = vpow2.f32 %v3207_v49  ;;  %v7684_v43 = vadd.f32 %v3151_v14, %v3098_v56 }
 0x69e   :  { %v7667_v60 = vpop.eup %5356  ;;  %v3217_v0 = vmul.f32 1.442695, %v7665_v10  ;;  %vm3195_vm7 = vcmp.gt.f32.partialorder %v7665_v10, 20.0 }
 0x69f   :  { %v3237_v33 = vadd.f32 1.0, %v7667_v60  ;;  %v3102_v28 = vpop.f32.mrb[32].mxu1  ;;  %v3240_v46 = vmul.f32 -0.5, %v7667_v60  ;;  %v3243_v22 = vand.u32 2147483647, %v7667_v60 }
 0x6a0   :  { %5364 = vpow2.f32 %v3217_v0  ;;  %v7673_v57 = vadd.f32 %v3156_v44, %v3102_v28  ;;  %v3104_v20 = vpop.f32.mrb[33].mxu1  ;;  %v3219_v24 = vmul.f32 1.442695, %v7684_v43 }
 0x6a1   :  { %5366 = vlog2.f32 %v3237_v33  ;;  %v7692_v63 = vadd.f32 %v3156_v44, %v3104_v20  ;;  %v3241_v1 = vadd.f32 1.0, %v3240_v46  ;;  %vm7711_vm4 = vcmp.lt.f32.partialorder %v3243_v22, 0.0004427343 }
 0x6a2   :  { %v7675_v45 = vpop.eup %5358  ;;  %v3221_v25 = vmul.f32 1.442695, %v7673_v57  ;;  %vm3197_vm11 = vcmp.gt.f32.partialorder %v7673_v57, 20.0 }
 0x6a3   :  { %v3255_v7 = vadd.f32 1.0, %v7675_v45  ;;  %v3108_v6 = vpop.f32.mrb[34].mxu1  ;;  %v3258_v54 = vmul.f32 -0.5, %v7675_v45  ;;  %v3261_v5 = vand.u32 2147483647, %v7675_v45  ;;  %v3242_v26 = vmul.f32 %v7667_v60, %v3241_v1 }
 0x6a4   :  { %5368 = vpow2.f32 %v3221_v25  ;;  %v7682_v41 = vadd.f32 %v3161_v18, %v3108_v6  ;;  %v3110_v4 = vpop.f32.mrb[35].mxu1  ;;  %v3223_v3 = vmul.f32 1.442695, %v7692_v63 }
 0x6a5   :  { %5370 = vlog2.f32 %v3255_v7  ;;  %v3259_v13 = vadd.f32 1.0, %v3258_v54  ;;  %v7716_v31 = vadd.f32 %v3161_v18, %v3110_v4  ;;  %vm7723_vm5 = vcmp.lt.f32.partialorder %v3261_v5, 0.0004427343 }
 0x6a6   :  { %v7686_v48 = vpop.eup %5360  ;;  %v3225_v9 = vmul.f32 1.442695, %v7682_v41  ;;  %5372 = vpow2.f32 %v3211_v17  ;;  %vm3199_vm0 = vcmp.gt.f32.partialorder %v7682_v41, 20.0 }
 0x6a7   :  { %v3273_v37 = vadd.f32 1.0, %v7686_v48  ;;  %v3114_v36 = vpop.f32.mrb[36].mxu1  ;;  %v7694_v2 = vpop.eup %5362  ;;  %v3276_v15 = vmul.f32 -0.5, %v7686_v48  ;;  %v3260_v60 = vmul.f32 %v7675_v45, %v3259_v13  ;;  %v3279_v33 = vand.u32 2147483647, %v7686_v48 }
 0x6a8   :  { %5374 = vpow2.f32 %v3225_v9  ;;  %v7698_v61 = vadd.f32 %v3166_v55, %v3114_v36  ;;  %v3116_v19 = vpop.f32.mrb[37].mxu1  ;;  %v3246_v30 = vadd.f32 1.0, %v7694_v2  ;;  %v3249_v16 = vmul.f32 -0.5, %v7694_v2 }
 0x6a9   :  { %5376 = vlog2.f32 %v3273_v37  ;;  %v7727_v49 = vadd.f32 %v3166_v55, %v3116_v19  ;;  %v3277_v20 = vadd.f32 1.0, %v3276_v15  ;;  %v3227_v25 = vmul.f32 1.442695, %v7716_v31 }
 0x6aa   :  { %v7701_v8 = vpop.eup %5364  ;;  %5378 = vpow2.f32 %v3215_v35  ;;  %v3229_v29 = vmul.f32 1.442695, %v7698_v61  ;;  %v7731_v56 = vadd.f32 1.0, %v3249_v16  ;;  %vm7772_vm8 = vcmp.lt.f32.partialorder %v3279_v33, 0.0004427343 }
 0x6ab   :  { %v5367_v59 = vpop.eup %5366  ;;  %v3291_v21 = vadd.f32 1.0, %v7701_v8  ;;  %v3120_v38 = vpop.f32.mrb[38].mxu1  ;;  %v3294_v14 = vmul.f32 -0.5, %v7701_v8  ;;  %v3297_v45 = vand.u32 2147483647, %v7701_v8  ;;  %v3278_v1 = vmul.f32 %v7686_v48, %v3277_v20 }
 0x6ac   :  { %v3239_v42 = vmul.f32 0.6931472, %v5367_v59  ;;  %5380 = vpow2.f32 %v3229_v29  ;;  %v3122_v39 = vpop.f32.mrb[39].mxu1  ;;  %v7718_v50 = vadd.f32 %v3171_v62, %v3120_v38  ;;  %v3231_v6 = vmul.f32 1.442695, %v7727_v49 }
 0x6ad   :  { %5382 = vlog2.f32 %v3291_v21  ;;  %v3295_v9 = vadd.f32 1.0, %v3294_v14  ;;  %v7764_v54 = vadd.f32 %v3171_v62, %v3122_v39  ;;  %vm7776_vm9 = vcmp.lt.f32.partialorder %v3297_v45, 0.0004427343 }
 0x6ae   :  { %v7720_v23 = vpop.eup %5368  ;;  %5384 = vpow2.f32 %v3219_v24  ;;  %v3245_v0 = vsel %vm7711_vm4, %v3242_v26, %v3239_v42  ;;  %v3233_v18 = vmul.f32 1.442695, %v7718_v50  ;;  %v3252_v38 = vand.u32 2147483647, %v7694_v2 }
 0x6af   :  { %v5371_v47 = vpop.eup %5370  ;;  %v3309_v52 = vadd.f32 1.0, %v7720_v23  ;;  %5386 = vpow2.f32 %v3223_v3  ;;  %v7752_v46 = vsel %vm3189_vm1, %v7653_v12, %v3245_v0  ;;  %v3312_v12 = vmul.f32 -0.5, %v7720_v23 }
 0x6b0   :  { %v3257_v44 = vmul.f32 0.6931472, %v5371_v47  ;;  %v7737_v28 = vpop.eup %5372  ;;  %v3315_v19 = vand.u32 2147483647, %v7720_v23  ;;  %v3296_v21 = vmul.f32 %v7701_v8, %v3295_v9  ;;  %v3235_v8 = vmul.f32 1.442695, %v7764_v54 }
 0x6b1   :  { %5388 = vlog2.f32 %v3309_v52  ;;  %v3313_v58 = vadd.f32 1.0, %v3312_v12  ;;  %v3267_v27 = vmul.f32 -0.5, %v7737_v28  ;;  %vm7812_vm12 = vcmp.lt.f32.partialorder %v3252_v38, 0.0004427343 }
 0x6b2   :  { %v7741_v7 = vpop.eup %5374  ;;  %v3263_v17 = vsel %vm7723_vm5, %v3260_v60, %v3257_v44  ;;  %5390 = vlog2.f32 %v3246_v30  ;;  %vm7790_vm10 = vcmp.lt.f32.partialorder %v3315_v19, 0.0004427343  ;;  %v3270_v12 = vand.u32 2147483647, %v7737_v28 }
 0x6b3   :  { %v5377_v4 = vpop.eup %5376  ;;  %v7757_v35 = vsel %vm3191_vm2, %v7656_v40, %v3263_v17  ;;  %v3327_v55 = vadd.f32 1.0, %v7741_v7  ;;  %5392 = vpow2.f32 %v3233_v18  ;;  %v3264_v40 = vadd.f32 1.0, %v7737_v28 }
 0x6b4   :  { %v7760_v37 = vpop.eup %5378  ;;  %v4991_v36 = vpack.c.bf16 %v7757_v35, %v7752_v46  ;;  %v3275_v22 = vmul.f32 0.6931472, %v5377_v4  ;;  %v3330_v62 = vmul.f32 -0.5, %v7741_v7  ;;  %v3333_v26 = vand.u32 2147483647, %v7741_v7 }
 0x6b5   :  { %5394 = vlog2.f32 %v3327_v55  ;;  %v3282_v39 = vadd.f32 1.0, %v7760_v37  ;;  %v3285_v18 = vmul.f32 -0.5, %v7760_v37  ;;  %vm3194_vm1 = vcmp.gt.f32.partialorder %v7677_v51, 20.0 }
 0x6b6   :  { %v7769_v24 = vpop.eup %5380  ;;  %5396 = vpow2.f32 %v3227_v25  ;;  %v3281_v48 = vsel %vm7772_vm8, %v3278_v1, %v3275_v22  ;;  %v3331_v20 = vadd.f32 1.0, %v3330_v62  ;;  %vm7826_vm15 = vcmp.lt.f32.partialorder %v3333_v26, 0.0004427343 }
 0x6b7   :  { %v5383_v59 = vpop.eup %5382  ;;  %v3345_v3 = vadd.f32 1.0, %v7769_v24  ;;  %5398 = vpow2.f32 %v3231_v6  ;;  %v7805_v14 = vsel %vm3193_vm6, %v7661_v32, %v3281_v48  ;;  %v3314_v32 = vmul.f32 %v7720_v23, %v3313_v58 }
 0x6b8   :  { %v7783_v30 = vpop.eup %5384  ;;  %v3293_v16 = vmul.f32 0.6931472, %v5383_v59  ;;  %5400 = vlog2.f32 %v3264_v40  ;;  %v3268_v6 = vadd.f32 1.0, %v3267_v27  ;;  %v3251_v23 = vmul.f32 %v7694_v2, %v7731_v56 }
 0x6b9   :  { %v7788_v42 = vpop.eup %5386  ;;  %5402 = vlog2.f32 %v3345_v3  ;;  %v3300_v25 = vadd.f32 1.0, %v7783_v30  ;;  %v3332_v5 = vmul.f32 %v7741_v7, %v3331_v20  ;;  %v3351_v29 = vand.u32 2147483647, %v7769_v24 }
 0x6ba   :  { %v3299_v15 = vsel %vm7776_vm9, %v3296_v21, %v3293_v16  ;;  %5404 = vlog2.f32 %v3282_v39  ;;  %v3318_v4 = vadd.f32 1.0, %v7788_v42  ;;  %v3286_v3 = vadd.f32 1.0, %v3285_v18 }
 0x6bb   :  { %v5389_v47 = vpop.eup %5388  ;;  %v7810_v52 = vsel %vm3195_vm7, %v7665_v10, %v3299_v15  ;;  %v3348_v10 = vmul.f32 -0.5, %v7769_v24  ;;  %5406 = vpow2.f32 %v3235_v8  ;;  %v3303_v38 = vmul.f32 -0.5, %v7783_v30 }
 0x6bc   :  { %v5391_v44 = vpop.eup %5390  ;;  %v4995_v60 = vpack.c.bf16 %v7810_v52, %v7805_v14  ;;  %v3311_v33 = vmul.f32 0.6931472, %v5389_v47  ;;  %5408 = vlog2.f32 %v3300_v25  ;;  %v3269_v16 = vmul.f32 %v7737_v28, %v3268_v6 }
 0x6bd   :  { %v7824_v17 = vpop.eup %5392  ;;  %v3248_v22 = vmul.f32 0.6931472, %v5391_v44  ;;  %v3349_v21 = vadd.f32 1.0, %v3348_v10  ;;  %vm3196_vm2 = vcmp.gt.f32.partialorder %v7684_v43, 20.0  ;;  %vm3271_vm4 = vcmp.lt.f32.partialorder %v3270_v12, 0.0004427343 }
 0x6be   :  { %v3363_v55 = vadd.f32 1.0, %v7824_v17  ;;  %v3317_v40 = vsel %vm7790_vm10, %v3314_v32, %v3311_v33  ;;  %v3366_v48 = vmul.f32 -0.5, %v7824_v17  ;;  %v3288_v39 = vand.u32 2147483647, %v7760_v37 }
 0x6bf   :  { %v5395_v9 = vpop.eup %5394  ;;  %v7853_v7 = vsel %vm3197_vm11, %v7673_v57, %v3317_v40  ;;  %v3254_v58 = vsel %vm7812_vm12, %v3251_v23, %v3248_v22  ;;  %v3287_v27 = vmul.f32 %v7760_v37, %v3286_v3  ;;  %v3304_v47 = vadd.f32 1.0, %v3303_v38 }
 0x6c0   :  { %v7835_v19 = vpop.eup %5396  ;;  %v3329_v1 = vmul.f32 0.6931472, %v5395_v9  ;;  %5410 = vlog2.f32 %v3363_v55  ;;  %vm3201_vm5 = vcmp.gt.f32.partialorder %v7698_v61, 20.0  ;;  %v3367_v0 = vadd.f32 1.0, %v3366_v48 }
 0x6c1   :  { %v7841_v59 = vpop.eup %5398  ;;  %5412 = vlog2.f32 %v3318_v4  ;;  %v3336_v15 = vadd.f32 1.0, %v7835_v19  ;;  %v3382_v44 = vsel %vm3190_vm13, %v7658_v34, %v3254_v58  ;;  %v3321_v37 = vmul.f32 -0.5, %v7788_v42 }
 0x6c2   :  { %v5401_v2 = vpop.eup %5400  ;;  %v3335_v56 = vsel %vm7826_vm15, %v3332_v5, %v3329_v1  ;;  %v3350_v45 = vmul.f32 %v7769_v24, %v3349_v21  ;;  %vm7879_vm6 = vcmp.lt.f32.partialorder %v3351_v29, 0.0004427343  ;;  %vm7883_vm7 = vcmp.lt.f32.partialorder %v3288_v39, 0.0004427343 }
 0x6c3   :  { %v7858_v62 = vsel %vm3199_vm0, %v7682_v41, %v3335_v56  ;;  %v3266_v13 = vmul.f32 0.6931472, %v5401_v2  ;;  %v5403_v28 = vpop.eup %5402  ;;  %v3306_v41 = vand.u32 2147483647, %v7783_v30  ;;  %5414 = vlog2.f32 %v3336_v15 }
 0x6c4   :  { %v4999_v8 = vpack.c.bf16 %v7858_v62, %v7853_v7  ;;  %v5405_v57 = vpop.eup %5404  ;;  %v3347_v32 = vmul.f32 0.6931472, %v5403_v28  ;;  %v3369_v4 = vand.u32 2147483647, %v7824_v17  ;;  %v3305_v22 = vmul.f32 %v7783_v30, %v3304_v47  ;;  %v4834_v7 = vld [vmem:[%s8925_s4 + $0x88] sm:$0xff]  ;;  %v4837_v62 = vld [vmem:[%s8925_s4 + $0xa0] sm:$0xff] }
 0x6c5   :  { %v3272_v26 = vsel %vm3271_vm4, %v3269_v16, %v3266_v13  ;;  %v3284_v20 = vmul.f32 0.6931472, %v5405_v57  ;;  %v7875_v25 = vpop.eup %5406  ;;  %vm3307_vm8 = vcmp.lt.f32.partialorder %v3306_v41, 0.0004427343  ;;  %v3339_v24 = vmul.f32 -0.5, %v7835_v19 }
 0x6c6   :  { %v3384_v33 = vsel %vm3192_vm14, %v7671_v11, %v3272_v26  ;;  %v5409_v18 = vpop.eup %5408  ;;  %v3354_v11 = vadd.f32 1.0, %v7841_v59  ;;  %v3372_v23 = vadd.f32 1.0, %v7875_v25  ;;  %v3353_v40 = vsel %vm7879_vm6, %v3350_v45, %v3347_v32 }
 0x6c7   :  { %v4989_v10 = vpack.c.bf16 %v3384_v33, %v3382_v44  ;;  %v3290_v9 = vsel %vm7883_vm7, %v3287_v27, %v3284_v20  ;;  %v3302_v55 = vmul.f32 0.6931472, %v5409_v18  ;;  %v3368_v1 = vmul.f32 %v7824_v17, %v3367_v0  ;;  %v3418_v18 = vpop.permute.xlu1 %3417 }
 0x6c8   :  { %5416 = vlog2.f32 %v3354_v11  ;;  %v3322_v29 = vadd.f32 1.0, %v3321_v37  ;;  %v3386_v46 = vsel %vm3194_vm1, %v7677_v51, %v3290_v9  ;;  %vm3370_vm9 = vcmp.lt.f32.partialorder %v3369_v4, 0.0004427343  ;;  %v4840_v37 = vld [vmem:[%s8925_s4 + $0xb8] sm:$0xff]  ;;  %v3423_v4 = vpop.permute.xlu0 %3422 }
 0x6c9   :  { %4990 = vmatprep.subr.bf16.mxu0 %v4989_v10  ;;  %v3308_v5 = vsel %vm3307_vm8, %v3305_v22, %v3302_v55  ;;  %5418 = vlog2.f32 %v3372_v23  ;;  %v3324_v3 = vand.u32 2147483647, %v7788_v42  ;;  %v3357_v38 = vmul.f32 -0.5, %v7841_v59  ;;  %v4839_v10 = vld [vmem:[%s8925_s4 + $0xb0] sm:$0xff] }
 0x6ca   :  { %4992 = vmatpush1.bf16.msra.mxu0 %v4991_v36  ;;  %v5411_v12 = vpop.eup %5410  ;;  %v3388_v35 = vsel %vm3196_vm2, %v7684_v43, %v3308_v5  ;;  %vm3203_vm10 = vcmp.gt.f32.partialorder %v7718_v50, 20.0  ;;  %v3340_v56 = vadd.f32 1.0, %v3339_v24  ;;  %v3393_v51 = vsel %vm3201_vm5, %v7698_v61, %v3353_v40 }
 0x6cb   :  { %v5413_v21 = vpop.eup %5412  ;;  %v3365_v30 = vmul.f32 0.6931472, %v5411_v12  ;;  %v4993_v36 = vpack.c.bf16 %v3388_v35, %v3386_v46  ;;  %v3342_v43 = vand.u32 2147483647, %v7835_v19  ;;  %v3375_v16 = vmul.f32 -0.5, %v7875_v25  ;;  %v3428_v12 = vpop.permute.xlu1 %3427 }
 0x6cc   :  { %v3320_v2 = vmul.f32 0.6931472, %v5413_v21  ;;  %v3323_v13 = vmul.f32 %v7788_v42, %v3322_v29  ;;  %vm3325_vm11 = vcmp.lt.f32.partialorder %v3324_v3, 0.0004427343  ;;  %v3358_v39 = vadd.f32 1.0, %v3357_v38 }
 0x6cd   :  { %v3371_v17 = vsel %vm3370_vm9, %v3368_v1, %v3365_v30  ;;  %4994 = vmatprep.subr.bf16.mxu0 %v4993_v36  ;;  %v5415_v28 = vpop.eup %5414  ;;  %v3341_v61 = vmul.f32 %v7835_v19, %v3340_v56  ;;  %vm3343_vm0 = vcmp.lt.f32.partialorder %v3342_v43, 0.0004427343  ;;  %v3376_v26 = vadd.f32 1.0, %v3375_v16  ;;  %v3433_v30 = vpop.permute.xlu0 %3432 }
 0x6ce   :  { %v3395_v48 = vsel %vm3203_vm10, %v7718_v50, %v3371_v17  ;;  %4996 = vmatpush1.bf16.msra.mxu0 %v4995_v60  ;;  %v3326_v15 = vsel %vm3325_vm11, %v3323_v13, %v3320_v2  ;;  %v3338_v57 = vmul.f32 0.6931472, %v5415_v28  ;;  %v3360_v50 = vand.u32 2147483647, %v7841_v59 }
 0x6cf   :  { %v5003_v58 = vpack.c.bf16 %v3395_v48, %v3393_v51  ;;  %vm3198_vm12 = vcmp.gt.f32.partialorder %v7692_v63, 20.0  ;;  %vm3200_vm13 = vcmp.gt.f32.partialorder %v7716_v31, 20.0  ;;  %v3378_v52 = vand.u32 2147483647, %v7875_v25  ;;  %v3438_v17 = vpop.permute.xlu1 %3437 }
 0x6d0   :  { %v3344_v14 = vsel %vm3343_vm0, %v3341_v61, %v3338_v57  ;;  %v3390_v42 = vsel %vm3198_vm12, %v7692_v63, %v3326_v15  ;;  %v3359_v41 = vmul.f32 %v7841_v59, %v3358_v39  ;;  %vm3361_vm14 = vcmp.lt.f32.partialorder %v3360_v50, 0.0004427343 }
 0x6d1   :  { %v3392_v60 = vsel %vm3200_vm13, %v7716_v31, %v3344_v14  ;;  %v3377_v20 = vmul.f32 %v7875_v25, %v3376_v26  ;;  %vm3379_vm15 = vcmp.lt.f32.partialorder %v3378_v52, 0.0004427343  ;;  %vm3202_vm1 = vcmp.gt.f32.partialorder %v7727_v49, 20.0  ;;  %v4833_v25 = vld [vmem:[%s8925_s4 + $0x80] sm:$0xff]  ;;  %v3443_v28 = vpop.permute.xlu0 %3442 }
 0x6d2   :  { %v5417_v27 = vpop.eup %5416  ;;  %v4997_v0 = vpack.c.bf16 %v3392_v60, %v3390_v42  ;;  %vm3204_vm2 = vcmp.gt.f32.partialorder %v7764_v54, 20.0 }
 0x6d3   :  { %v3356_v47 = vmul.f32 0.6931472, %v5417_v27  ;;  %v5419_v19 = vpop.eup %5418  ;;  %v3448_v60 = vpop.permute.xlu1 %3447 }
 0x6d4   :  { %v3374_v33 = vmul.f32 0.6931472, %v5419_v19  ;;  %4998 = vmatprep.subr.bf16.mxu0 %v4997_v0 }
 0x6d5   :  { %v3362_v44 = vsel %vm3361_vm14, %v3359_v41, %v3356_v47  ;;  %5000 = vmatpush1.bf16.msra.mxu0 %v4999_v8  ;;  %v4838_v8 = vld [vmem:[%s8925_s4 + $0xa8] sm:$0xff] }
 0x6d6   :  { %v3380_v63 = vsel %vm3379_vm15, %v3377_v20, %v3374_v33  ;;  %v3394_v31 = vsel %vm3202_vm1, %v7727_v49, %v3362_v44  ;;  %v4835_v49 = vld [vmem:[%s8925_s4 + $0x90] sm:$0xff] }
 0x6d7   :  { %v3396_v59 = vsel %vm3204_vm2, %v7764_v54, %v3380_v63  ;;  %v4836_v54 = vld [vmem:[%s8925_s4 + $0x98] sm:$0xff] }
 0x6d8   :  { %v5001_v32 = vpack.c.bf16 %v3396_v59, %v3394_v31 }
 0x6da   :  { %5002 = vmatprep.subr.bf16.mxu0 %v5001_v32 }
 0x6db   :  { %5004 = vmatpush1.bf16.msra.mxu0 %v5003_v58 }
 0x6de   :  { %4849 = vmatmul.mubr.msk.f32.vlgmr.msra.gmra.mrb[32].mxu0 %vm1845_vm3, %v4833_v25 }
 0x6df   :  { %3549 = vmatprep.mubr.f32.mxu0 %v5645_v53 }
 0x6e2   :  { %4850 = vmatmul.mubr.msk.f32.gmra.mrb[34].mxu0 %vm1845_vm3, %v4834_v7 }
 0x6e3   :  { %3555 = vmatprep.mubr.f32.mxu0 %v5645_v53 }
 0x6e6   :  { %4851 = vmatmul.mubr.msk.f32.gmra.mrb[36].mxu0 %vm1845_vm3, %v4835_v49 }
 0x6e7   :  { %3561 = vmatprep.mubr.f32.mxu0 %v5645_v53 }
 0x6ea   :  { %4852 = vmatmul.mubr.msk.f32.gmra.mrb[38].mxu0 %vm1845_vm3, %v4836_v54 }
 0x6eb   :  { %3567 = vmatprep.mubr.f32.mxu0 %v5645_v53 }
 0x6ee   :  { %4853 = vmatmul.mubr.msk.f32.gmra.mrb[40].mxu0 %vm1845_vm3, %v4837_v62 }
 0x6ef   :  { %3573 = vmatprep.mubr.f32.mxu0 %v5645_v53 }
 0x6f2   :  { %4854 = vmatmul.mubr.msk.f32.gmra.mrb[42].mxu0 %vm1845_vm3, %v4838_v8 }
 0x6f3   :  { %3579 = vmatprep.mubr.f32.mxu0 %v5645_v53 }
 0x6f6   :  { %4855 = vmatmul.mubr.msk.f32.gmra.mrb[44].mxu0 %vm1845_vm3, %v4839_v10 }
 0x6f7   :  { %3585 = vmatprep.mubr.f32.mxu0 %v5645_v53 }
 0x6fa   :  { %4856 = vmatmul.mubr.msk.f32.gmra.mrb[46].mxu0 %vm1845_vm3, %v4840_v37 }
 0x6fb   :  { %3946 = vmatprep.mubr.f32.mxu0 %v5645_v53 }
 0x7b1   :  { %v3545_v45 = vpop.f32.mrb[32].mxu0 }
 0x7b2   :  { %v7975_v6 = vadd.f32 %v3545_v45, %v3418_v18  ;;  %v3547_v34 = vpop.f32.mrb[33].mxu0 }
 0x7b3   :  { %v7980_v24 = vadd.f32 %v3547_v34, %v3418_v18  ;;  %v3453_v18 = vpop.permute.xlu0 %3452 }
 0x7b4   :  { %v3608_v11 = vmul.f32 1.442695, %v7975_v6  ;;  %vm3592_vm4 = vcmp.gt.f32.partialorder %v7975_v6, 20.0 }
 0x7b5   :  { %v3551_v9 = vpop.f32.mrb[34].mxu0  ;;  %v3610_v29 = vmul.f32 1.442695, %v7980_v24  ;;  %vm3593_vm15 = vcmp.gt.f32.partialorder %v7980_v24, 20.0 }
 0x7b6   :  { %5420 = vpow2.f32 %v3608_v11  ;;  %v7978_v55 = vadd.f32 %v3551_v9, %v3423_v4  ;;  %v3553_v22 = vpop.f32.mrb[35].mxu0 }
 0x7b7   :  { %v7993_v56 = vadd.f32 %v3553_v22, %v3423_v4 }
 0x7b8   :  { %v3612_v23 = vmul.f32 1.442695, %v7978_v55  ;;  %vm3594_vm5 = vcmp.gt.f32.partialorder %v7978_v55, 20.0 }
 0x7b9   :  { %v3557_v40 = vpop.f32.mrb[36].mxu0  ;;  %v3614_v15 = vmul.f32 1.442695, %v7993_v56  ;;  %vm3595_vm1 = vcmp.gt.f32.partialorder %v7993_v56, 20.0 }
 0x7ba   :  { %5422 = vpow2.f32 %v3612_v23  ;;  %v7983_v1 = vadd.f32 %v3557_v40, %v3428_v12  ;;  %v3559_v5 = vpop.f32.mrb[37].mxu0 }
 0x7bb   :  { %v7999_v58 = vadd.f32 %v3559_v5, %v3428_v12 }
 0x7bc   :  { %v3616_v21 = vmul.f32 1.442695, %v7983_v1  ;;  %vm3596_vm8 = vcmp.gt.f32.partialorder %v7983_v1, 20.0 }
 0x7bd   :  { %v3563_v46 = vpop.f32.mrb[38].mxu0  ;;  %v3618_v52 = vmul.f32 1.442695, %v7999_v58 }
 0x7be   :  { %5424 = vpow2.f32 %v3616_v21  ;;  %v7987_v35 = vadd.f32 %v3563_v46, %v3433_v30  ;;  %v3565_v36 = vpop.f32.mrb[39].mxu0 }
 0x7bf   :  { %5426 = vpow2.f32 %v3610_v29  ;;  %v8006_v26 = vadd.f32 %v3565_v36, %v3433_v30 }
 0x7c0   :  { %v7989_v3 = vpop.eup %5420  ;;  %v3620_v38 = vmul.f32 1.442695, %v7987_v35  ;;  %vm3598_vm9 = vcmp.gt.f32.partialorder %v7987_v35, 20.0 }
 0x7c1   :  { %v3640_v2 = vadd.f32 1.0, %v7989_v3  ;;  %v3569_v51 = vpop.f32.mrb[40].mxu0  ;;  %v3643_v14 = vmul.f32 -0.5, %v7989_v3  ;;  %v3646_v44 = vand.u32 2147483647, %v7989_v3 }
 0x7c2   :  { %5428 = vpow2.f32 %v3620_v38  ;;  %v7995_v48 = vadd.f32 %v3569_v51, %v3438_v17  ;;  %v3571_v43 = vpop.f32.mrb[41].mxu0  ;;  %v3622_v31 = vmul.f32 1.442695, %v8006_v26 }
 0x7c3   :  { %5430 = vlog2.f32 %v3640_v2  ;;  %v8014_v41 = vadd.f32 %v3571_v43, %v3438_v17  ;;  %v3644_v32 = vadd.f32 1.0, %v3643_v14  ;;  %vm8033_vm6 = vcmp.lt.f32.partialorder %v3646_v44, 0.0004427343 }
 0x7c4   :  { %v7997_v16 = vpop.eup %5422  ;;  %v3624_v13 = vmul.f32 1.442695, %v7995_v48  ;;  %vm3600_vm12 = vcmp.gt.f32.partialorder %v7995_v48, 20.0 }
 0x7c5   :  { %v3658_v39 = vadd.f32 1.0, %v7997_v16  ;;  %v3575_v57 = vpop.f32.mrb[42].mxu0  ;;  %v3661_v33 = vmul.f32 -0.5, %v7997_v16  ;;  %v3664_v25 = vand.u32 2147483647, %v7997_v16  ;;  %v3645_v40 = vmul.f32 %v7989_v3, %v3644_v32 }
 0x7c6   :  { %5432 = vpow2.f32 %v3624_v13  ;;  %v8004_v61 = vadd.f32 %v3575_v57, %v3443_v28  ;;  %v3577_v50 = vpop.f32.mrb[43].mxu0  ;;  %v3626_v62 = vmul.f32 1.442695, %v8014_v41 }
 0x7c7   :  { %5434 = vlog2.f32 %v3658_v39  ;;  %v3662_v11 = vadd.f32 1.0, %v3661_v33  ;;  %v8038_v22 = vadd.f32 %v3577_v50, %v3443_v28  ;;  %vm8045_vm7 = vcmp.lt.f32.partialorder %v3664_v25, 0.0004427343 }
 0x7c8   :  { %v8008_v27 = vpop.eup %5424  ;;  %v3628_v42 = vmul.f32 1.442695, %v8004_v61  ;;  %5436 = vpow2.f32 %v3614_v15  ;;  %vm3602_vm13 = vcmp.gt.f32.partialorder %v8004_v61, 20.0 }
 0x7c9   :  { %v3676_v47 = vadd.f32 1.0, %v8008_v27  ;;  %v3581_v19 = vpop.f32.mrb[44].mxu0  ;;  %v8016_v0 = vpop.eup %5426  ;;  %v3679_v9 = vmul.f32 -0.5, %v8008_v27  ;;  %v3663_v3 = vmul.f32 %v7997_v16, %v3662_v11  ;;  %v3682_v2 = vand.u32 2147483647, %v8008_v27 }
 0x7ca   :  { %5438 = vpow2.f32 %v3628_v42  ;;  %v8020_v20 = vadd.f32 %v3581_v19, %v3448_v60  ;;  %v3583_v63 = vpop.f32.mrb[45].mxu0  ;;  %v3649_v10 = vadd.f32 1.0, %v8016_v0  ;;  %v3652_v37 = vmul.f32 -0.5, %v8016_v0 }
 0x7cb   :  { %5440 = vlog2.f32 %v3676_v47  ;;  %v8049_v29 = vadd.f32 %v3583_v63, %v3448_v60  ;;  %v3680_v43 = vadd.f32 1.0, %v3679_v9  ;;  %v3630_v13 = vmul.f32 1.442695, %v8038_v22 }
 0x7cc   :  { %v8023_v59 = vpop.eup %5428  ;;  %5442 = vpow2.f32 %v3618_v52  ;;  %v3632_v7 = vmul.f32 1.442695, %v8020_v20  ;;  %v8053_v36 = vadd.f32 1.0, %v3652_v37  ;;  %vm8094_vm10 = vcmp.lt.f32.partialorder %v3682_v2, 0.0004427343 }
 0x7cd   :  { %v5431_v49 = vpop.eup %5430  ;;  %v3694_v54 = vadd.f32 1.0, %v8023_v59  ;;  %v3587_v8 = vpop.f32.mrb[46].mxu0  ;;  %v3697_v30 = vmul.f32 -0.5, %v8023_v59  ;;  %v3700_v16 = vand.u32 2147483647, %v8023_v59  ;;  %v3681_v32 = vmul.f32 %v8008_v27, %v3680_v43 }
 0x7ce   :  { %v3642_v45 = vmul.f32 0.6931472, %v5431_v49  ;;  %5444 = vpow2.f32 %v3632_v7  ;;  %v3589_v4 = vpop.f32.mrb[47].mxu0  ;;  %v8040_v23 = vadd.f32 %v3587_v8, %v3453_v18  ;;  %v3634_v57 = vmul.f32 1.442695, %v8049_v29 }
 0x7cf   :  { %5446 = vlog2.f32 %v3694_v54  ;;  %v3698_v42 = vadd.f32 1.0, %v3697_v30  ;;  %v8086_v33 = vadd.f32 %v3589_v4, %v3453_v18  ;;  %vm8098_vm11 = vcmp.lt.f32.partialorder %v3700_v16, 0.0004427343 }
 0x7d0   :  { %v8042_v12 = vpop.eup %5432  ;;  %5448 = vpow2.f32 %v3622_v31  ;;  %v3648_v38 = vsel %vm8033_vm6, %v3645_v40, %v3642_v45  ;;  %v3636_v28 = vmul.f32 1.442695, %v8040_v23  ;;  %v3655_v8 = vand.u32 2147483647, %v8016_v0 }
 0x7d1   :  { %v5435_v21 = vpop.eup %5434  ;;  %v3712_v46 = vadd.f32 1.0, %v8042_v12  ;;  %5450 = vpow2.f32 %v3626_v62  ;;  %v8074_v14 = vsel %vm3592_vm4, %v7975_v6, %v3648_v38  ;;  %v3715_v6 = vmul.f32 -0.5, %v8042_v12 }
 0x7d2   :  { %v3660_v17 = vmul.f32 0.6931472, %v5435_v21  ;;  %v8059_v51 = vpop.eup %5436  ;;  %v3718_v63 = vand.u32 2147483647, %v8042_v12  ;;  %v3699_v54 = vmul.f32 %v8023_v59, %v3698_v42  ;;  %v3638_v59 = vmul.f32 1.442695, %v8086_v33 }
 0x7d3   :  { %5452 = vlog2.f32 %v3712_v46  ;;  %v3716_v34 = vadd.f32 1.0, %v3715_v6  ;;  %v3670_v5 = vmul.f32 -0.5, %v8059_v51  ;;  %vm8134_vm14 = vcmp.lt.f32.partialorder %v3655_v8, 0.0004427343 }
 0x7d4   :  { %v8063_v39 = vpop.eup %5438  ;;  %v3666_v15 = vsel %vm8045_vm7, %v3663_v3, %v3660_v17  ;;  %5454 = vlog2.f32 %v3649_v10  ;;  %vm8112_vm0 = vcmp.lt.f32.partialorder %v3718_v63, 0.0004427343  ;;  %v3673_v6 = vand.u32 2147483647, %v8059_v51 }
 0x7d5   :  { %v5441_v50 = vpop.eup %5440  ;;  %v8079_v52 = vsel %vm3594_vm5, %v7978_v55, %v3666_v15  ;;  %v3730_v60 = vadd.f32 1.0, %v8063_v39  ;;  %5456 = vpow2.f32 %v3636_v28  ;;  %v3667_v55 = vadd.f32 1.0, %v8059_v51 }
 0x7d6   :  { %v8082_v47 = vpop.eup %5442  ;;  %v5007_v19 = vpack.c.bf16 %v8079_v52, %v8074_v14  ;;  %v3678_v44 = vmul.f32 0.6931472, %v5441_v50  ;;  %v3733_v18 = vmul.f32 -0.5, %v8063_v39  ;;  %v3736_v40 = vand.u32 2147483647, %v8063_v39 }
 0x7d7   :  { %5458 = vlog2.f32 %v3730_v60  ;;  %v3685_v4 = vadd.f32 1.0, %v8082_v47  ;;  %v3688_v28 = vmul.f32 -0.5, %v8082_v47  ;;  %vm3597_vm4 = vcmp.gt.f32.partialorder %v7999_v58, 20.0 }
 0x7d8   :  { %v8091_v31 = vpop.eup %5444  ;;  %5460 = vpow2.f32 %v3630_v13  ;;  %v3684_v27 = vsel %vm8094_vm10, %v3681_v32, %v3678_v44  ;;  %v3734_v43 = vadd.f32 1.0, %v3733_v18  ;;  %vm8148_vm2 = vcmp.lt.f32.partialorder %v3736_v40, 0.0004427343 }
 0x7d9   :  { %v5447_v49 = vpop.eup %5446  ;;  %v3748_v62 = vadd.f32 1.0, %v8091_v31  ;;  %5462 = vpow2.f32 %v3634_v57  ;;  %v8127_v30 = vsel %vm3596_vm8, %v7983_v1, %v3684_v27  ;;  %v3717_v1 = vmul.f32 %v8042_v12, %v3716_v34 }
 0x7da   :  { %v8105_v10 = vpop.eup %5448  ;;  %v3696_v37 = vmul.f32 0.6931472, %v5447_v49  ;;  %5464 = vlog2.f32 %v3667_v55  ;;  %v3671_v57 = vadd.f32 1.0, %v3670_v5  ;;  %v3654_v12 = vmul.f32 %v8016_v0, %v8053_v36 }
 0x7db   :  { %v8110_v45 = vpop.eup %5450  ;;  %5466 = vlog2.f32 %v3748_v62  ;;  %v3703_v13 = vadd.f32 1.0, %v8105_v10  ;;  %v3735_v25 = vmul.f32 %v8063_v39, %v3734_v43  ;;  %v3754_v7 = vand.u32 2147483647, %v8091_v31 }
 0x7dc   :  { %v3702_v9 = vsel %vm8098_vm11, %v3699_v54, %v3696_v37  ;;  %5468 = vlog2.f32 %v3685_v4  ;;  %v3721_v50 = vadd.f32 1.0, %v8110_v45  ;;  %v3689_v62 = vadd.f32 1.0, %v3688_v28 }
 0x7dd   :  { %v5453_v21 = vpop.eup %5452  ;;  %v8132_v46 = vsel %vm3598_vm9, %v7987_v35, %v3702_v9  ;;  %v3751_v35 = vmul.f32 -0.5, %v8091_v31  ;;  %5470 = vpow2.f32 %v3638_v59  ;;  %v3706_v8 = vmul.f32 -0.5, %v8105_v10 }
 0x7de   :  { %v5455_v17 = vpop.eup %5454  ;;  %v5011_v3 = vpack.c.bf16 %v8132_v46, %v8127_v30  ;;  %v3714_v2 = vmul.f32 0.6931472, %v5453_v21  ;;  %5472 = vlog2.f32 %v3703_v13  ;;  %v3672_v37 = vmul.f32 %v8059_v51, %v3671_v57 }
 0x7df   :  { %v8146_v15 = vpop.eup %5456  ;;  %v3651_v44 = vmul.f32 0.6931472, %v5455_v17  ;;  %v3752_v54 = vadd.f32 1.0, %v3751_v35  ;;  %vm3599_vm5 = vcmp.gt.f32.partialorder %v8006_v26, 20.0  ;;  %vm3674_vm6 = vcmp.lt.f32.partialorder %v3673_v6, 0.0004427343 }
 0x7e0   :  { %v3766_v60 = vadd.f32 1.0, %v8146_v15  ;;  %v3720_v55 = vsel %vm8112_vm0, %v3717_v1, %v3714_v2  ;;  %v3769_v27 = vmul.f32 -0.5, %v8146_v15  ;;  %v3691_v4 = vand.u32 2147483647, %v8082_v47 }
 0x7e1   :  { %v5459_v42 = vpop.eup %5458  ;;  %v8175_v39 = vsel %vm3600_vm12, %v7995_v48, %v3720_v55  ;;  %v3657_v34 = vsel %vm8134_vm14, %v3654_v12, %v3651_v44  ;;  %v3690_v5 = vmul.f32 %v8082_v47, %v3689_v62  ;;  %v3707_v21 = vadd.f32 1.0, %v3706_v8 }
 0x7e2   :  { %v8157_v63 = vpop.eup %5460  ;;  %v3732_v32 = vmul.f32 0.6931472, %v5459_v42  ;;  %5474 = vlog2.f32 %v3766_v60  ;;  %vm3604_vm7 = vcmp.gt.f32.partialorder %v8020_v20, 20.0  ;;  %v3770_v38 = vadd.f32 1.0, %v3769_v27 }
 0x7e3   :  { %v8163_v49 = vpop.eup %5462  ;;  %5476 = vlog2.f32 %v3721_v50  ;;  %v3739_v9 = vadd.f32 1.0, %v8157_v63  ;;  %v3785_v17 = vsel %vm3593_vm15, %v7980_v24, %v3657_v34  ;;  %v3724_v47 = vmul.f32 -0.5, %v8110_v45 }
 0x7e4   :  { %v5465_v0 = vpop.eup %5464  ;;  %v3738_v36 = vsel %vm8148_vm2, %v3735_v25, %v3732_v32  ;;  %v3753_v16 = vmul.f32 %v8091_v31, %v3752_v54  ;;  %vm8201_vm8 = vcmp.lt.f32.partialorder %v3754_v7, 0.0004427343  ;;  %vm8205_vm9 = vcmp.lt.f32.partialorder %v3691_v4, 0.0004427343 }
 0x7e5   :  { %v8180_v18 = vsel %vm3602_vm13, %v8004_v61, %v3738_v36  ;;  %v3669_v11 = vmul.f32 0.6931472, %v5465_v0  ;;  %v5467_v51 = vpop.eup %5466  ;;  %v3709_v61 = vand.u32 2147483647, %v8105_v10  ;;  %5478 = vlog2.f32 %v3739_v9 }
 0x7e6   :  { %v5015_v59 = vpack.c.bf16 %v8180_v18, %v8175_v39  ;;  %v5469_v48 = vpop.eup %5468  ;;  %v3750_v1 = vmul.f32 0.6931472, %v5467_v51  ;;  %v3772_v50 = vand.u32 2147483647, %v8146_v15  ;;  %v3708_v44 = vmul.f32 %v8105_v10, %v3707_v21  ;;  %v4858_v39 = vld [vmem:[%s8925_s4 + $0xc8] sm:$0xff]  ;;  %v4861_v18 = vld [vmem:[%s8925_s4 + $0xe0] sm:$0xff] }
 0x7e7   :  { %v3675_v40 = vsel %vm3674_vm6, %v3672_v37, %v3669_v11  ;;  %v3687_v43 = vmul.f32 0.6931472, %v5469_v48  ;;  %v8197_v13 = vpop.eup %5470  ;;  %vm3710_vm10 = vcmp.lt.f32.partialorder %v3709_v61, 0.0004427343  ;;  %v3742_v31 = vmul.f32 -0.5, %v8157_v63 }
 0x7e8   :  { %v3787_v2 = vsel %vm3595_vm1, %v7993_v56, %v3675_v40  ;;  %v5473_v28 = vpop.eup %5472  ;;  %v3757_v56 = vadd.f32 1.0, %v8163_v49  ;;  %v3775_v12 = vadd.f32 1.0, %v8197_v13  ;;  %v3756_v55 = vsel %vm8201_vm8, %v3753_v16, %v3750_v1 }
 0x7e9   :  { %v5005_v35 = vpack.c.bf16 %v3787_v2, %v3785_v17  ;;  %v3693_v42 = vsel %vm8205_vm9, %v3690_v5, %v3687_v43  ;;  %v3705_v60 = vmul.f32 0.6931472, %v5473_v28  ;;  %v3771_v32 = vmul.f32 %v8146_v15, %v3770_v38  ;;  %v3821_v28 = vpop.permute.xlu1 %3820 }
 0x7ea   :  { %5480 = vlog2.f32 %v3757_v56  ;;  %v3725_v7 = vadd.f32 1.0, %v3724_v47  ;;  %v3789_v14 = vsel %vm3597_vm4, %v7999_v58, %v3693_v42  ;;  %vm3773_vm11 = vcmp.lt.f32.partialorder %v3772_v50, 0.0004427343  ;;  %v4864_v47 = vld [vmem:[%s8925_s4 + $0xf8] sm:$0xff]  ;;  %v3826_v50 = vpop.permute.xlu0 %3825 }
 0x7eb   :  { %5006 = vmatprep.subr.bf16.mxu0 %v5005_v35  ;;  %v3711_v25 = vsel %vm3710_vm10, %v3708_v44, %v3705_v60  ;;  %5482 = vlog2.f32 %v3775_v12  ;;  %v3727_v62 = vand.u32 2147483647, %v8110_v45  ;;  %v3760_v8 = vmul.f32 -0.5, %v8163_v49  ;;  %v4863_v35 = vld [vmem:[%s8925_s4 + $0xf0] sm:$0xff] }
 0x7ec   :  { %5008 = vmatpush1.bf16.msra.mxu0 %v5007_v19  ;;  %v5475_v6 = vpop.eup %5474  ;;  %v3791_v52 = vsel %vm3599_vm5, %v8006_v26, %v3711_v25  ;;  %vm3606_vm0 = vcmp.gt.f32.partialorder %v8040_v23, 20.0  ;;  %v3743_v36 = vadd.f32 1.0, %v3742_v31  ;;  %v3796_v58 = vsel %vm3604_vm7, %v8020_v20, %v3756_v55 }
 0x7ed   :  { %v5477_v54 = vpop.eup %5476  ;;  %v3768_v10 = vmul.f32 0.6931472, %v5475_v6  ;;  %v5009_v19 = vpack.c.bf16 %v3791_v52, %v3789_v14  ;;  %v3745_v26 = vand.u32 2147483647, %v8157_v63  ;;  %v3778_v37 = vmul.f32 -0.5, %v8197_v13  ;;  %v3831_v6 = vpop.permute.xlu1 %3830 }
 0x7ee   :  { %v3723_v0 = vmul.f32 0.6931472, %v5477_v54  ;;  %v3726_v11 = vmul.f32 %v8110_v45, %v3725_v7  ;;  %vm3728_vm12 = vcmp.lt.f32.partialorder %v3727_v62, 0.0004427343  ;;  %v3761_v4 = vadd.f32 1.0, %v3760_v8 }
 0x7ef   :  { %v3774_v15 = vsel %vm3773_vm11, %v3771_v32, %v3768_v10  ;;  %5010 = vmatprep.subr.bf16.mxu0 %v5009_v19  ;;  %v5479_v51 = vpop.eup %5478  ;;  %v3744_v20 = vmul.f32 %v8157_v63, %v3743_v36  ;;  %vm3746_vm13 = vcmp.lt.f32.partialorder %v3745_v26, 0.0004427343  ;;  %v3779_v40 = vadd.f32 1.0, %v3778_v37  ;;  %v3836_v10 = vpop.permute.xlu0 %3835 }
 0x7f0   :  { %v3798_v27 = vsel %vm3606_vm0, %v8040_v23, %v3774_v15  ;;  %5012 = vmatpush1.bf16.msra.mxu0 %v5011_v3  ;;  %v3729_v9 = vsel %vm3728_vm12, %v3726_v11, %v3723_v0  ;;  %v3741_v48 = vmul.f32 0.6931472, %v5479_v51  ;;  %v3763_v23 = vand.u32 2147483647, %v8163_v49 }
 0x7f1   :  { %v5019_v34 = vpack.c.bf16 %v3798_v27, %v3796_v58  ;;  %vm3601_vm14 = vcmp.gt.f32.partialorder %v8014_v41, 20.0  ;;  %vm3603_vm15 = vcmp.gt.f32.partialorder %v8038_v22, 20.0  ;;  %v3781_v46 = vand.u32 2147483647, %v8197_v13  ;;  %v3841_v15 = vpop.permute.xlu1 %3840 }
 0x7f2   :  { %v3747_v30 = vsel %vm3746_vm13, %v3744_v20, %v3741_v48  ;;  %v3793_v45 = vsel %vm3601_vm14, %v8014_v41, %v3729_v9  ;;  %v3762_v61 = vmul.f32 %v8163_v49, %v3761_v4  ;;  %vm3764_vm1 = vcmp.lt.f32.partialorder %v3763_v23, 0.0004427343 }
 0x7f3   :  { %v3795_v3 = vsel %vm3603_vm15, %v8038_v22, %v3747_v30  ;;  %v3780_v43 = vmul.f32 %v8197_v13, %v3779_v40  ;;  %vm3782_vm2 = vcmp.lt.f32.partialorder %v3781_v46, 0.0004427343  ;;  %vm3605_vm4 = vcmp.gt.f32.partialorder %v8049_v29, 20.0  ;;  %v4857_v13 = vld [vmem:[%s8925_s4 + $0xc0] sm:$0xff]  ;;  %v3846_v51 = vpop.permute.xlu0 %3845 }
 0x7f4   :  { %v5481_v5 = vpop.eup %5480  ;;  %v5013_v38 = vpack.c.bf16 %v3795_v3, %v3793_v45  ;;  %vm3607_vm5 = vcmp.gt.f32.partialorder %v8086_v33, 20.0 }
 0x7f5   :  { %v3759_v21 = vmul.f32 0.6931472, %v5481_v5  ;;  %v5483_v63 = vpop.eup %5482  ;;  %v3851_v3 = vpop.permute.xlu1 %3850 }
 0x7f6   :  { %v3777_v2 = vmul.f32 0.6931472, %v5483_v63  ;;  %5014 = vmatprep.subr.bf16.mxu0 %v5013_v38 }
 0x7f7   :  { %v3765_v17 = vsel %vm3764_vm1, %v3762_v61, %v3759_v21  ;;  %5016 = vmatpush1.bf16.msra.mxu0 %v5015_v59  ;;  %v4862_v59 = vld [vmem:[%s8925_s4 + $0xe8] sm:$0xff] }
 0x7f8   :  { %v3783_v41 = vsel %vm3782_vm2, %v3780_v43, %v3777_v2  ;;  %v3797_v22 = vsel %vm3605_vm4, %v8049_v29, %v3765_v17  ;;  %v4859_v29 = vld [vmem:[%s8925_s4 + $0xd0] sm:$0xff] }
 0x7f9   :  { %v3799_v49 = vsel %vm3607_vm5, %v8086_v33, %v3783_v41  ;;  %v4860_v33 = vld [vmem:[%s8925_s4 + $0xd8] sm:$0xff] }
 0x7fa   :  { %v5017_v1 = vpack.c.bf16 %v3799_v49, %v3797_v22 }
 0x7fc   :  { %5018 = vmatprep.subr.bf16.mxu0 %v5017_v1 }
 0x7fd   :  { %5020 = vmatpush1.bf16.msra.mxu0 %v5019_v34 }
 0x800   :  { %4873 = vmatmul.mubr.msk.f32.vlgmr.msra.gmra.mrb[48].mxu0 %vm1845_vm3, %v4857_v13 }
 0x801   :  { %3952 = vmatprep.mubr.f32.mxu0 %v5645_v53 }
 0x804   :  { %4874 = vmatmul.mubr.msk.f32.gmra.mrb[50].mxu0 %vm1845_vm3, %v4858_v39 }
 0x805   :  { %3958 = vmatprep.mubr.f32.mxu0 %v5645_v53 }
 0x808   :  { %4875 = vmatmul.mubr.msk.f32.gmra.mrb[52].mxu0 %vm1845_vm3, %v4859_v29 }
 0x809   :  { %3964 = vmatprep.mubr.f32.mxu0 %v5645_v53 }
 0x80c   :  { %4876 = vmatmul.mubr.msk.f32.gmra.mrb[54].mxu0 %vm1845_vm3, %v4860_v33 }
 0x80d   :  { %3970 = vmatprep.mubr.f32.mxu0 %v5645_v53 }
 0x810   :  { %4877 = vmatmul.mubr.msk.f32.gmra.mrb[56].mxu0 %vm1845_vm3, %v4861_v18 }
 0x811   :  { %3976 = vmatprep.mubr.f32.mxu0 %v5645_v53 }
 0x814   :  { %4878 = vmatmul.mubr.msk.f32.gmra.mrb[58].mxu0 %vm1845_vm3, %v4862_v59 }
 0x815   :  { %3982 = vmatprep.mubr.f32.mxu0 %v5645_v53 }
 0x818   :  { %4879 = vmatmul.mubr.msk.f32.gmra.mrb[60].mxu0 %vm1845_vm3, %v4863_v35 }
 0x819   :  { %3988 = vmatprep.mubr.f32.mxu0 %v5645_v53 }
 0x81c   :  { %4880 = vmatmul.mubr.msk.f32.gmra.mrb[62].mxu0 %vm1845_vm3, %v4864_v47 }
 0x81d   :  { %4690 = vmatprep.mubr.f32.mxu0 %v5645_v53 }
 0x8d3   :  { %v3948_v16 = vpop.f32.mrb[48].mxu0 }
 0x8d4   :  { %v8297_v57 = vadd.f32 %v3948_v16, %v3821_v28  ;;  %v3950_v24 = vpop.f32.mrb[49].mxu0 }
 0x8d5   :  { %v8302_v31 = vadd.f32 %v3950_v24, %v3821_v28  ;;  %v3856_v28 = vpop.permute.xlu0 %3855 }
 0x8d6   :  { %v4011_v56 = vmul.f32 1.442695, %v8297_v57  ;;  %vm3995_vm6 = vcmp.gt.f32.partialorder %v8297_v57, 20.0 }
 0x8d7   :  { %v3954_v42 = vpop.f32.mrb[50].mxu0  ;;  %v4013_v7 = vmul.f32 1.442695, %v8302_v31  ;;  %vm3996_vm2 = vcmp.gt.f32.partialorder %v8302_v31, 20.0 }
 0x8d8   :  { %5484 = vpow2.f32 %v4011_v56  ;;  %v8300_v60 = vadd.f32 %v3954_v42, %v3826_v50  ;;  %v3956_v44 = vpop.f32.mrb[51].mxu0 }
 0x8d9   :  { %v8315_v36 = vadd.f32 %v3956_v44, %v3826_v50 }
 0x8da   :  { %v4015_v12 = vmul.f32 1.442695, %v8300_v60  ;;  %vm3997_vm7 = vcmp.gt.f32.partialorder %v8300_v60, 20.0 }
 0x8db   :  { %v3960_v55 = vpop.f32.mrb[52].mxu0  ;;  %v4017_v9 = vmul.f32 1.442695, %v8315_v36  ;;  %vm3998_vm4 = vcmp.gt.f32.partialorder %v8315_v36, 20.0 }
 0x8dc   :  { %5486 = vpow2.f32 %v4015_v12  ;;  %v8305_v32 = vadd.f32 %v3960_v55, %v3831_v6  ;;  %v3962_v25 = vpop.f32.mrb[53].mxu0 }
 0x8dd   :  { %v8321_v34 = vadd.f32 %v3962_v25, %v3831_v6 }
 0x8de   :  { %v4019_v54 = vmul.f32 1.442695, %v8305_v32  ;;  %vm3999_vm10 = vcmp.gt.f32.partialorder %v8305_v32, 20.0 }
 0x8df   :  { %v3966_v14 = vpop.f32.mrb[54].mxu0  ;;  %v4021_v46 = vmul.f32 1.442695, %v8321_v34 }
 0x8e0   :  { %5488 = vpow2.f32 %v4019_v54  ;;  %v8309_v52 = vadd.f32 %v3966_v14, %v3836_v10  ;;  %v3968_v19 = vpop.f32.mrb[55].mxu0 }
 0x8e1   :  { %5490 = vpow2.f32 %v4013_v7  ;;  %v8328_v40 = vadd.f32 %v3968_v19, %v3836_v10 }
 0x8e2   :  { %v8311_v62 = vpop.eup %5484  ;;  %v4023_v8 = vmul.f32 1.442695, %v8309_v52  ;;  %vm4001_vm11 = vcmp.gt.f32.partialorder %v8309_v52, 20.0 }
 0x8e3   :  { %v4043_v0 = vadd.f32 1.0, %v8311_v62  ;;  %v3972_v58 = vpop.f32.mrb[56].mxu0  ;;  %v4046_v30 = vmul.f32 -0.5, %v8311_v62  ;;  %v4049_v17 = vand.u32 2147483647, %v8311_v62 }
 0x8e4   :  { %5492 = vpow2.f32 %v4023_v8  ;;  %v8317_v27 = vadd.f32 %v3972_v58, %v3841_v15  ;;  %v3974_v26 = vpop.f32.mrb[57].mxu0  ;;  %v4025_v22 = vmul.f32 1.442695, %v8328_v40 }
 0x8e5   :  { %5494 = vlog2.f32 %v4043_v0  ;;  %v8336_v61 = vadd.f32 %v3974_v26, %v3841_v15  ;;  %v4047_v1 = vadd.f32 1.0, %v4046_v30  ;;  %vm8355_vm8 = vcmp.lt.f32.partialorder %v4049_v17, 0.0004427343 }
 0x8e6   :  { %v8319_v37 = vpop.eup %5486  ;;  %v4027_v11 = vmul.f32 1.442695, %v8317_v27  ;;  %vm4003_vm14 = vcmp.gt.f32.partialorder %v8317_v27, 20.0 }
 0x8e7   :  { %v4061_v4 = vadd.f32 1.0, %v8319_v37  ;;  %v3978_v48 = vpop.f32.mrb[58].mxu0  ;;  %v4064_v2 = vmul.f32 -0.5, %v8319_v37  ;;  %v4067_v13 = vand.u32 2147483647, %v8319_v37  ;;  %v4048_v55 = vmul.f32 %v8311_v62, %v4047_v1 }
 0x8e8   :  { %5496 = vpow2.f32 %v4027_v11  ;;  %v8326_v20 = vadd.f32 %v3978_v48, %v3846_v51  ;;  %v3980_v23 = vpop.f32.mrb[59].mxu0  ;;  %v4029_v18 = vmul.f32 1.442695, %v8336_v61 }
 0x8e9   :  { %5498 = vlog2.f32 %v4061_v4  ;;  %v4065_v56 = vadd.f32 1.0, %v4064_v2  ;;  %v8360_v44 = vadd.f32 %v3980_v23, %v3846_v51  ;;  %vm8367_vm9 = vcmp.lt.f32.partialorder %v4067_v13, 0.0004427343 }
 0x8ea   :  { %v8330_v5 = vpop.eup %5488  ;;  %v4031_v45 = vmul.f32 1.442695, %v8326_v20  ;;  %5500 = vpow2.f32 %v4017_v9  ;;  %vm4005_vm15 = vcmp.gt.f32.partialorder %v8326_v20, 20.0 }
 0x8eb   :  { %v4079_v21 = vadd.f32 1.0, %v8330_v5  ;;  %v3984_v63 = vpop.f32.mrb[60].mxu0  ;;  %v8338_v38 = vpop.eup %5490  ;;  %v4082_v42 = vmul.f32 -0.5, %v8330_v5  ;;  %v4066_v62 = vmul.f32 %v8319_v37, %v4065_v56  ;;  %v4085_v0 = vand.u32 2147483647, %v8330_v5 }
 0x8ec   :  { %5502 = vpow2.f32 %v4031_v45  ;;  %v8342_v43 = vadd.f32 %v3984_v63, %v3851_v3  ;;  %v3986_v41 = vpop.f32.mrb[61].mxu0  ;;  %v4052_v35 = vadd.f32 1.0, %v8338_v38  ;;  %v4055_v47 = vmul.f32 -0.5, %v8338_v38 }
 0x8ed   :  { %5504 = vlog2.f32 %v4079_v21  ;;  %v8371_v7 = vadd.f32 %v3986_v41, %v3851_v3  ;;  %v4083_v26 = vadd.f32 1.0, %v4082_v42  ;;  %v4033_v11 = vmul.f32 1.442695, %v8360_v44 }
 0x8ee   :  { %v8345_v49 = vpop.eup %5492  ;;  %5506 = vpow2.f32 %v4021_v46  ;;  %v4035_v39 = vmul.f32 1.442695, %v8342_v43  ;;  %v8375_v19 = vadd.f32 1.0, %v4055_v47  ;;  %vm8416_vm0 = vcmp.lt.f32.partialorder %v4085_v0, 0.0004427343 }
 0x8ef   :  { %v5495_v29 = vpop.eup %5494  ;;  %v4097_v33 = vadd.f32 1.0, %v8345_v49  ;;  %v3990_v59 = vpop.f32.mrb[62].mxu0  ;;  %v4100_v10 = vmul.f32 -0.5, %v8345_v49  ;;  %v4103_v37 = vand.u32 2147483647, %v8345_v49  ;;  %v4084_v1 = vmul.f32 %v8330_v5, %v4083_v26 }
 0x8f0   :  { %v4045_v16 = vmul.f32 0.6931472, %v5495_v29  ;;  %5508 = vpow2.f32 %v4035_v39  ;;  %v3992_v50 = vpop.f32.mrb[63].mxu0  ;;  %v8362_v12 = vadd.f32 %v3990_v59, %v3856_v28  ;;  %v4037_v48 = vmul.f32 1.442695, %v8371_v7 }
 0x8f1   :  { %5510 = vlog2.f32 %v4097_v33  ;;  %v4101_v45 = vadd.f32 1.0, %v4100_v10  ;;  %v8408_v2 = vadd.f32 %v3992_v50, %v3856_v28  ;;  %vm8420_vm12 = vcmp.lt.f32.partialorder %v4103_v37, 0.0004427343 }
 0x8f2   :  { %v8364_v6 = vpop.eup %5496  ;;  %5512 = vpow2.f32 %v4025_v22  ;;  %v4051_v8 = vsel %vm8355_vm8, %v4048_v55, %v4045_v16  ;;  %v4039_v51 = vmul.f32 1.442695, %v8362_v12  ;;  %v4058_v59 = vand.u32 2147483647, %v8338_v38 }
 0x8f3   :  { %v5499_v54 = vpop.eup %5498  ;;  %v4115_v14 = vadd.f32 1.0, %v8364_v6  ;;  %5514 = vpow2.f32 %v4029_v18  ;;  %v8396_v30 = vsel %vm3995_vm6, %v8297_v57, %v4051_v8  ;;  %v4118_v57 = vmul.f32 -0.5, %v8364_v6 }
 0x8f4   :  { %v4063_v15 = vmul.f32 0.6931472, %v5499_v54  ;;  %v8381_v58 = vpop.eup %5500  ;;  %v4121_v41 = vand.u32 2147483647, %v8364_v6  ;;  %v4102_v33 = vmul.f32 %v8345_v49, %v4101_v45  ;;  %v4041_v49 = vmul.f32 1.442695, %v8408_v2 }
 0x8f5   :  { %5516 = vlog2.f32 %v4115_v14  ;;  %v4119_v24 = vadd.f32 1.0, %v4118_v57  ;;  %v4073_v25 = vmul.f32 -0.5, %v8381_v58  ;;  %vm8456_vm1 = vcmp.lt.f32.partialorder %v4058_v59, 0.0004427343 }
 0x8f6   :  { %v8385_v4 = vpop.eup %5502  ;;  %v4069_v9 = vsel %vm8367_vm9, %v4066_v62, %v4063_v15  ;;  %5518 = vlog2.f32 %v4052_v35  ;;  %vm8434_vm13 = vcmp.lt.f32.partialorder %v4121_v41, 0.0004427343  ;;  %v4076_v57 = vand.u32 2147483647, %v8381_v58 }
 0x8f7   :  { %v5505_v23 = vpop.eup %5504  ;;  %v8401_v46 = vsel %vm3997_vm7, %v8300_v60, %v4069_v9  ;;  %v4133_v3 = vadd.f32 1.0, %v8385_v4  ;;  %5520 = vpow2.f32 %v4039_v51  ;;  %v4070_v60 = vadd.f32 1.0, %v8381_v58 }
 0x8f8   :  { %v8404_v21 = vpop.eup %5506  ;;  %v5023_v63 = vpack.c.bf16 %v8401_v46, %v8396_v30  ;;  %v4081_v17 = vmul.f32 0.6931472, %v5505_v23  ;;  %v4136_v28 = vmul.f32 -0.5, %v8385_v4  ;;  %v4139_v55 = vand.u32 2147483647, %v8385_v4 }
 0x8f9   :  { %5522 = vlog2.f32 %v4133_v3  ;;  %v4088_v50 = vadd.f32 1.0, %v8404_v21  ;;  %v4091_v51 = vmul.f32 -0.5, %v8404_v21  ;;  %vm4000_vm6 = vcmp.gt.f32.partialorder %v8321_v34, 20.0 }
 0x8fa   :  { %v8413_v22 = vpop.eup %5508  ;;  %5524 = vpow2.f32 %v4033_v11  ;;  %v4087_v5 = vsel %vm8416_vm0, %v4084_v1, %v4081_v17  ;;  %v4137_v26 = vadd.f32 1.0, %v4136_v28  ;;  %vm8470_vm5 = vcmp.lt.f32.partialorder %v4139_v55, 0.0004427343 }
 0x8fb   :  { %v5511_v29 = vpop.eup %5510  ;;  %v4151_v18 = vadd.f32 1.0, %v8413_v22  ;;  %5526 = vpow2.f32 %v4037_v48  ;;  %v8449_v10 = vsel %vm3999_vm10, %v8305_v32, %v4087_v5  ;;  %v4120_v32 = vmul.f32 %v8364_v6, %v4119_v24 }
 0x8fc   :  { %v8427_v35 = vpop.eup %5512  ;;  %v4099_v47 = vmul.f32 0.6931472, %v5511_v29  ;;  %5528 = vlog2.f32 %v4070_v60  ;;  %v4074_v48 = vadd.f32 1.0, %v4073_v25  ;;  %v4057_v6 = vmul.f32 %v8338_v38, %v8375_v19 }
 0x8fd   :  { %v8432_v16 = vpop.eup %5514  ;;  %5530 = vlog2.f32 %v4151_v18  ;;  %v4106_v11 = vadd.f32 1.0, %v8427_v35  ;;  %v4138_v13 = vmul.f32 %v8385_v4, %v4137_v26  ;;  %v4157_v39 = vand.u32 2147483647, %v8413_v22 }
 0x8fe   :  { %v4105_v42 = vsel %vm8420_vm12, %v4102_v33, %v4099_v47  ;;  %5532 = vlog2.f32 %v4088_v50  ;;  %v4124_v23 = vadd.f32 1.0, %v8432_v16  ;;  %v4092_v18 = vadd.f32 1.0, %v4091_v51 }
 0x8ff   :  { %v5517_v54 = vpop.eup %5516  ;;  %v8454_v14 = vsel %vm4001_vm11, %v8309_v52, %v4105_v42  ;;  %v4154_v52 = vmul.f32 -0.5, %v8413_v22  ;;  %5534 = vpow2.f32 %v4041_v49  ;;  %v4109_v59 = vmul.f32 -0.5, %v8427_v35 }
 0x900   :  { %v5519_v15 = vpop.eup %5518  ;;  %v5027_v62 = vpack.c.bf16 %v8454_v14, %v8449_v10  ;;  %v4117_v0 = vmul.f32 0.6931472, %v5517_v54  ;;  %5536 = vlog2.f32 %v4106_v11  ;;  %v4075_v47 = vmul.f32 %v8381_v58, %v4074_v48 }
 0x901   :  { %v8468_v9 = vpop.eup %5520  ;;  %v4054_v17 = vmul.f32 0.6931472, %v5519_v15  ;;  %v4155_v33 = vadd.f32 1.0, %v4154_v52  ;;  %vm4002_vm7 = vcmp.gt.f32.partialorder %v8328_v40, 20.0  ;;  %vm4077_vm8 = vcmp.lt.f32.partialorder %v4076_v57, 0.0004427343 }
 0x902   :  { %v4169_v3 = vadd.f32 1.0, %v8468_v9  ;;  %v4123_v60 = vsel %vm8434_vm13, %v4120_v32, %v4117_v0  ;;  %v4172_v5 = vmul.f32 -0.5, %v8468_v9  ;;  %v4094_v50 = vand.u32 2147483647, %v8404_v21 }
 0x903   :  { %v5523_v45 = vpop.eup %5522  ;;  %v8497_v4 = vsel %vm4003_vm14, %v8317_v27, %v4123_v60  ;;  %v4060_v24 = vsel %vm8456_vm1, %v4057_v6, %v4054_v17  ;;  %v4093_v25 = vmul.f32 %v8404_v21, %v4092_v18  ;;  %v4110_v54 = vadd.f32 1.0, %v4109_v59 }
 0x904   :  { %v8479_v41 = vpop.eup %5524  ;;  %v4135_v1 = vmul.f32 0.6931472, %v5523_v45  ;;  %5538 = vlog2.f32 %v4169_v3  ;;  %vm4007_vm9 = vcmp.gt.f32.partialorder %v8342_v43, 20.0  ;;  %v4173_v8 = vadd.f32 1.0, %v4172_v5 }
 0x905   :  { %v8485_v29 = vpop.eup %5526  ;;  %5540 = vlog2.f32 %v4124_v23  ;;  %v4142_v42 = vadd.f32 1.0, %v8479_v41  ;;  %v4188_v15 = vsel %vm3996_vm2, %v8302_v31, %v4060_v24  ;;  %v4127_v21 = vmul.f32 -0.5, %v8432_v16 }
 0x906   :  { %v5529_v38 = vpop.eup %5528  ;;  %v4141_v19 = vsel %vm8470_vm5, %v4138_v13, %v4135_v1  ;;  %v4156_v37 = vmul.f32 %v8413_v22, %v4155_v33  ;;  %vm8523_vm10 = vcmp.lt.f32.partialorder %v4157_v39, 0.0004427343  ;;  %vm8527_vm11 = vcmp.lt.f32.partialorder %v4094_v50, 0.0004427343 }
 0x907   :  { %v8502_v28 = vsel %vm4005_vm15, %v8326_v20, %v4141_v19  ;;  %v4072_v56 = vmul.f32 0.6931472, %v5529_v38  ;;  %v5531_v58 = vpop.eup %5530  ;;  %v4112_v20 = vand.u32 2147483647, %v8427_v35  ;;  %5542 = vlog2.f32 %v4142_v42 }
 0x908   :  { %v5031_v49 = vpack.c.bf16 %v8502_v28, %v8497_v4  ;;  %v5533_v27 = vpop.eup %5532  ;;  %v4153_v32 = vmul.f32 0.6931472, %v5531_v58  ;;  %v4175_v23 = vand.u32 2147483647, %v8468_v9  ;;  %v4111_v17 = vmul.f32 %v8427_v35, %v4110_v54  ;;  %v4882_v4 = vld [vmem:[%s8925_s4 + $0x108] sm:$0xff]  ;;  %v4885_v28 = vld [vmem:[%s8925_s4 + $0x120] sm:$0xff] }
 0x909   :  { %v4078_v55 = vsel %vm4077_vm8, %v4075_v47, %v4072_v56  ;;  %v4090_v26 = vmul.f32 0.6931472, %v5533_v27  ;;  %v8519_v11 = vpop.eup %5534  ;;  %vm4113_vm0 = vcmp.lt.f32.partialorder %v4112_v20, 0.0004427343  ;;  %v4145_v22 = vmul.f32 -0.5, %v8479_v41 }
 0x90a   :  { %v4190_v0 = vsel %vm3998_vm4, %v8315_v36, %v4078_v55  ;;  %v5537_v51 = vpop.eup %5536  ;;  %v4160_v36 = vadd.f32 1.0, %v8485_v29  ;;  %v4178_v6 = vadd.f32 1.0, %v8519_v11  ;;  %v4159_v60 = vsel %vm8523_vm10, %v4156_v37, %v4153_v32 }
 0x90b   :  { %v5021_v52 = vpack.c.bf16 %v4190_v0, %v4188_v15  ;;  %v4096_v45 = vsel %vm8527_vm11, %v4093_v25, %v4090_v26  ;;  %v4108_v3 = vmul.f32 0.6931472, %v5537_v51  ;;  %v4174_v1 = vmul.f32 %v8468_v9, %v4173_v8  ;;  %v4224_v51 = vpop.permute.xlu1 %4223 }
 0x90c   :  { %5544 = vlog2.f32 %v4160_v36  ;;  %v4128_v39 = vadd.f32 1.0, %v4127_v21  ;;  %v4192_v30 = vsel %vm4000_vm6, %v8321_v34, %v4096_v45  ;;  %vm4176_vm12 = vcmp.lt.f32.partialorder %v4175_v23, 0.0004427343  ;;  %v4888_v21 = vld [vmem:[%s8925_s4 + $0x138] sm:$0xff]  ;;  %v4229_v23 = vpop.permute.xlu0 %4228 }
 0x90d   :  { %5022 = vmatprep.subr.bf16.mxu1 %v5021_v52  ;;  %v4114_v13 = vsel %vm4113_vm0, %v4111_v17, %v4108_v3  ;;  %5546 = vlog2.f32 %v4178_v6  ;;  %v4130_v18 = vand.u32 2147483647, %v8432_v16  ;;  %v4163_v59 = vmul.f32 -0.5, %v8485_v29  ;;  %v4887_v52 = vld [vmem:[%s8925_s4 + $0x130] sm:$0xff] }
 0x90e   :  { %5024 = vmatpush1.bf16.msra.mxu1 %v5023_v63  ;;  %v5539_v57 = vpop.eup %5538  ;;  %v4194_v46 = vsel %vm4002_vm7, %v8328_v40, %v4114_v13  ;;  %vm4009_vm13 = vcmp.gt.f32.partialorder %v8362_v12, 20.0  ;;  %v4146_v19 = vadd.f32 1.0, %v4145_v22  ;;  %v4199_v34 = vsel %vm4007_vm9, %v8342_v43, %v4159_v60 }
 0x90f   :  { %v5541_v33 = vpop.eup %5540  ;;  %v4171_v35 = vmul.f32 0.6931472, %v5539_v57  ;;  %v5025_v63 = vpack.c.bf16 %v4194_v46, %v4192_v30  ;;  %v4148_v40 = vand.u32 2147483647, %v8479_v41  ;;  %v4181_v47 = vmul.f32 -0.5, %v8519_v11  ;;  %v4234_v57 = vpop.permute.xlu1 %4233 }
 0x910   :  { %v4126_v38 = vmul.f32 0.6931472, %v5541_v33  ;;  %v4129_v56 = vmul.f32 %v8432_v16, %v4128_v39  ;;  %vm4131_vm14 = vcmp.lt.f32.partialorder %v4130_v18, 0.0004427343  ;;  %v4164_v50 = vadd.f32 1.0, %v4163_v59 }
 0x911   :  { %v4177_v9 = vsel %vm4176_vm12, %v4174_v1, %v4171_v35  ;;  %5026 = vmatprep.subr.bf16.mxu1 %v5025_v63  ;;  %v5543_v58 = vpop.eup %5542  ;;  %v4147_v43 = vmul.f32 %v8479_v41, %v4146_v19  ;;  %vm4149_vm15 = vcmp.lt.f32.partialorder %v4148_v40, 0.0004427343  ;;  %v4182_v55 = vadd.f32 1.0, %v4181_v47  ;;  %v4239_v35 = vpop.permute.xlu0 %4238 }
 0x912   :  { %v4201_v5 = vsel %vm4009_vm13, %v8362_v12, %v4177_v9  ;;  %5028 = vmatpush1.bf16.msra.mxu1 %v5027_v62  ;;  %v4132_v42 = vsel %vm4131_vm14, %v4129_v56, %v4126_v38  ;;  %v4144_v27 = vmul.f32 0.6931472, %v5543_v58  ;;  %v4166_v12 = vand.u32 2147483647, %v8485_v29 }
 0x913   :  { %v5035_v24 = vpack.c.bf16 %v4201_v5, %v4199_v34  ;;  %vm4004_vm1 = vcmp.gt.f32.partialorder %v8336_v61, 20.0  ;;  %vm4006_vm2 = vcmp.gt.f32.partialorder %v8360_v44, 20.0  ;;  %v4184_v14 = vand.u32 2147483647, %v8519_v11  ;;  %v4244_v9 = vpop.permute.xlu1 %4243 }
 0x914   :  { %v4150_v10 = vsel %vm4149_vm15, %v4147_v43, %v4144_v27  ;;  %v4196_v16 = vsel %vm4004_vm1, %v8336_v61, %v4132_v42  ;;  %v4165_v20 = vmul.f32 %v8485_v29, %v4164_v50  ;;  %vm4167_vm4 = vcmp.lt.f32.partialorder %v4166_v12, 0.0004427343 }
 0x915   :  { %v4198_v62 = vsel %vm4006_vm2, %v8360_v44, %v4150_v10  ;;  %v4183_v26 = vmul.f32 %v8519_v11, %v4182_v55  ;;  %vm4185_vm5 = vcmp.lt.f32.partialorder %v4184_v14, 0.0004427343  ;;  %vm4008_vm6 = vcmp.gt.f32.partialorder %v8371_v7, 20.0  ;;  %v4881_v11 = vld [vmem:[%s8925_s4 + $0x100] sm:$0xff]  ;;  %v4249_v58 = vpop.permute.xlu0 %4248 }
 0x916   :  { %v5545_v25 = vpop.eup %5544  ;;  %v5029_v8 = vpack.c.bf16 %v4198_v62, %v4196_v16  ;;  %vm4010_vm7 = vcmp.gt.f32.partialorder %v8408_v2, 20.0 }
 0x917   :  { %v4162_v54 = vmul.f32 0.6931472, %v5545_v25  ;;  %v5547_v41 = vpop.eup %5546  ;;  %v4254_v62 = vpop.permute.xlu1 %4253 }
 0x918   :  { %v4180_v0 = vmul.f32 0.6931472, %v5547_v41  ;;  %5030 = vmatprep.subr.bf16.mxu1 %v5029_v8 }
 0x919   :  { %v4168_v15 = vsel %vm4167_vm4, %v4165_v20, %v4162_v54  ;;  %5032 = vmatpush1.bf16.msra.mxu1 %v5031_v49  ;;  %v4886_v49 = vld [vmem:[%s8925_s4 + $0x128] sm:$0xff] }
 0x91a   :  { %v4186_v61 = vsel %vm4185_vm5, %v4183_v26, %v4180_v0  ;;  %v4200_v44 = vsel %vm4008_vm6, %v8371_v7, %v4168_v15  ;;  %v4883_v7 = vld [vmem:[%s8925_s4 + $0x110] sm:$0xff] }
 0x91b   :  { %v4202_v29 = vsel %vm4010_vm7, %v8408_v2, %v4186_v61  ;;  %v4884_v2 = vld [vmem:[%s8925_s4 + $0x118] sm:$0xff] }
 0x91c   :  { %v5033_v32 = vpack.c.bf16 %v4202_v29, %v4200_v44 }
 0x91e   :  { %5034 = vmatprep.subr.bf16.mxu1 %v5033_v32 }
 0x91f   :  { %5036 = vmatpush1.bf16.msra.mxu1 %v5035_v24 }
 0x922   :  { %4897 = vmatmul.mubr.msk.f32.vlgmr.msra.gmra.mrb[40].mxu1 %vm1845_vm3, %v4881_v11 }
 0x923   :  { %4355 = vmatprep.mubr.f32.mxu1 %v5645_v53 }
 0x926   :  { %4898 = vmatmul.mubr.msk.f32.gmra.mrb[42].mxu1 %vm1845_vm3, %v4882_v4 }
 0x927   :  { %4361 = vmatprep.mubr.f32.mxu1 %v5645_v53 }
 0x92a   :  { %4899 = vmatmul.mubr.msk.f32.gmra.mrb[44].mxu1 %vm1845_vm3, %v4883_v7 }
 0x92b   :  { %4367 = vmatprep.mubr.f32.mxu1 %v5645_v53 }
 0x92e   :  { %4900 = vmatmul.mubr.msk.f32.gmra.mrb[46].mxu1 %vm1845_vm3, %v4884_v2 }
 0x92f   :  { %4373 = vmatprep.mubr.f32.mxu1 %v5645_v53 }
 0x932   :  { %4901 = vmatmul.mubr.msk.f32.gmra.mrb[48].mxu1 %vm1845_vm3, %v4885_v28 }
 0x933   :  { %4379 = vmatprep.mubr.f32.mxu1 %v5645_v53 }
 0x936   :  { %4902 = vmatmul.mubr.msk.f32.gmra.mrb[50].mxu1 %vm1845_vm3, %v4886_v49 }
 0x937   :  { %4385 = vmatprep.mubr.f32.mxu1 %v5645_v53 }
 0x93a   :  { %4903 = vmatmul.mubr.msk.f32.gmra.mrb[52].mxu1 %vm1845_vm3, %v4887_v52 }
 0x93b   :  { %4391 = vmatprep.mubr.f32.mxu1 %v5645_v53 }
 0x93e   :  { %4904 = vmatmul.mubr.msk.f32.gmra.mrb[54].mxu1 %vm1845_vm3, %v4888_v21 }
 0x9f5   :  { %v4351_v37 = vpop.f32.mrb[40].mxu1 }
 0x9f6   :  { %v8618_v48 = vadd.f32 %v4351_v37, %v4224_v51  ;;  %v4353_v31 = vpop.f32.mrb[41].mxu1 }
 0x9f7   :  { %v8623_v22 = vadd.f32 %v4353_v31, %v4224_v51  ;;  %v4259_v51 = vpop.permute.xlu0 %4258 }
 0x9f8   :  { %v4414_v36 = vmul.f32 1.442695, %v8618_v48  ;;  %vm4398_vm8 = vcmp.gt.f32.partialorder %v8618_v48, 20.0 }
 0x9f9   :  { %v4357_v45 = vpop.f32.mrb[42].mxu1  ;;  %v4416_v39 = vmul.f32 1.442695, %v8623_v22  ;;  %vm4399_vm5 = vcmp.gt.f32.partialorder %v8623_v22, 20.0 }
 0x9fa   :  { %5548 = vpow2.f32 %v4414_v36  ;;  %v8621_v3 = vadd.f32 %v4357_v45, %v4229_v23  ;;  %v4359_v17 = vpop.f32.mrb[43].mxu1 }
 0x9fb   :  { %v8636_v19 = vadd.f32 %v4359_v17, %v4229_v23 }
 0x9fc   :  { %v4418_v6 = vmul.f32 1.442695, %v8621_v3  ;;  %vm4400_vm9 = vcmp.gt.f32.partialorder %v8621_v3, 20.0 }
 0x9fd   :  { %v4363_v60 = vpop.f32.mrb[44].mxu1  ;;  %v4420_v42 = vmul.f32 1.442695, %v8636_v19  ;;  %vm4401_vm6 = vcmp.gt.f32.partialorder %v8636_v19, 20.0 }
 0x9fe   :  { %5550 = vpow2.f32 %v4418_v6  ;;  %v8626_v1 = vadd.f32 %v4363_v60, %v4234_v57  ;;  %v4365_v13 = vpop.f32.mrb[45].mxu1 }
 0x9ff   :  { %v8642_v24 = vadd.f32 %v4365_v13, %v4234_v57 }
 0xa00   :  { %v4422_v33 = vmul.f32 1.442695, %v8626_v1  ;;  %vm4402_vm0 = vcmp.gt.f32.partialorder %v8626_v1, 20.0 }
 0xa01   :  { %v4369_v30 = vpop.f32.mrb[46].mxu1  ;;  %v4424_v14 = vmul.f32 1.442695, %v8642_v24 }
 0xa02   :  { %5552 = vpow2.f32 %v4422_v33  ;;  %v8630_v46 = vadd.f32 %v4369_v30, %v4239_v35  ;;  %v4371_v63 = vpop.f32.mrb[47].mxu1 }
 0xa03   :  { %5554 = vpow2.f32 %v4416_v39  ;;  %v8649_v55 = vadd.f32 %v4371_v63, %v4239_v35 }
 0xa04   :  { %v8632_v18 = vpop.eup %5548  ;;  %v4426_v59 = vmul.f32 1.442695, %v8630_v46  ;;  %vm4404_vm12 = vcmp.gt.f32.partialorder %v8630_v46, 20.0 }
 0xa05   :  { %v4446_v38 = vadd.f32 1.0, %v8632_v18  ;;  %v4375_v34 = vpop.f32.mrb[48].mxu1  ;;  %v4449_v10 = vmul.f32 -0.5, %v8632_v18  ;;  %v4452_v15 = vand.u32 2147483647, %v8632_v18 }
 0xa06   :  { %5556 = vpow2.f32 %v4426_v59  ;;  %v8638_v5 = vadd.f32 %v4375_v34, %v4244_v9  ;;  %v4377_v40 = vpop.f32.mrb[49].mxu1  ;;  %v4428_v44 = vmul.f32 1.442695, %v8649_v55 }
 0xa07   :  { %5558 = vlog2.f32 %v4446_v38  ;;  %v8657_v20 = vadd.f32 %v4377_v40, %v4244_v9  ;;  %v4450_v32 = vadd.f32 1.0, %v4449_v10  ;;  %vm8676_vm10 = vcmp.lt.f32.partialorder %v4452_v15, 0.0004427343 }
 0xa08   :  { %v8640_v47 = vpop.eup %5550  ;;  %v4430_v56 = vmul.f32 1.442695, %v8638_v5  ;;  %vm4406_vm1 = vcmp.gt.f32.partialorder %v8638_v5, 20.0 }
 0xa09   :  { %v4464_v50 = vadd.f32 1.0, %v8640_v47  ;;  %v4381_v27 = vpop.f32.mrb[50].mxu1  ;;  %v4467_v0 = vmul.f32 -0.5, %v8640_v47  ;;  %v4470_v11 = vand.u32 2147483647, %v8640_v47  ;;  %v4451_v60 = vmul.f32 %v8632_v18, %v4450_v32 }
 0xa0a   :  { %5560 = vpow2.f32 %v4430_v56  ;;  %v8647_v43 = vadd.f32 %v4381_v27, %v4249_v58  ;;  %v4383_v12 = vpop.f32.mrb[51].mxu1  ;;  %v4432_v28 = vmul.f32 1.442695, %v8657_v20 }
 0xa0b   :  { %5562 = vlog2.f32 %v4464_v50  ;;  %v4468_v36 = vadd.f32 1.0, %v4467_v0  ;;  %v8681_v17 = vadd.f32 %v4383_v12, %v4249_v58  ;;  %vm8688_vm11 = vcmp.lt.f32.partialorder %v4470_v11, 0.0004427343 }
 0xa0c   :  { %v8651_v25 = vpop.eup %5552  ;;  %v4434_v16 = vmul.f32 1.442695, %v8647_v43  ;;  %5564 = vpow2.f32 %v4420_v42  ;;  %vm4408_vm2 = vcmp.gt.f32.partialorder %v8647_v43, 20.0 }
 0xa0d   :  { %v4482_v54 = vadd.f32 1.0, %v8651_v25  ;;  %v4387_v41 = vpop.f32.mrb[52].mxu1  ;;  %v8659_v8 = vpop.eup %5554  ;;  %v4485_v45 = vmul.f32 -0.5, %v8651_v25  ;;  %v4469_v18 = vmul.f32 %v8640_v47, %v4468_v36  ;;  %v4488_v38 = vand.u32 2147483647, %v8651_v25 }
 0xa0e   :  { %5566 = vpow2.f32 %v4434_v16  ;;  %v8663_v26 = vadd.f32 %v4387_v41, %v4254_v62  ;;  %v4389_v61 = vpop.f32.mrb[53].mxu1  ;;  %v4455_v52 = vadd.f32 1.0, %v8659_v8  ;;  %v4458_v21 = vmul.f32 -0.5, %v8659_v8 }
 0xa0f   :  { %5568 = vlog2.f32 %v4482_v54  ;;  %v8692_v39 = vadd.f32 %v4389_v61, %v4254_v62  ;;  %v4486_v40 = vadd.f32 1.0, %v4485_v45  ;;  %v4436_v56 = vmul.f32 1.442695, %v8681_v17 }
 0xa10   :  { %v8666_v29 = vpop.eup %5556  ;;  %5570 = vpow2.f32 %v4424_v14  ;;  %v4438_v4 = vmul.f32 1.442695, %v8663_v26  ;;  %v8696_v63 = vadd.f32 1.0, %v4458_v21  ;;  %vm8737_vm13 = vcmp.lt.f32.partialorder %v4488_v38, 0.0004427343 }
 0xa11   :  { %v5559_v7 = vpop.eup %5558  ;;  %v4500_v2 = vadd.f32 1.0, %v8666_v29  ;;  %v4393_v49 = vpop.f32.mrb[54].mxu1  ;;  %v4503_v35 = vmul.f32 -0.5, %v8666_v29  ;;  %v4506_v47 = vand.u32 2147483647, %v8666_v29  ;;  %v4487_v32 = vmul.f32 %v8651_v25, %v4486_v40 }
 0xa12   :  { %v4448_v37 = vmul.f32 0.6931472, %v5559_v7  ;;  %5572 = vpow2.f32 %v4438_v4  ;;  %v4395_v23 = vpop.f32.mrb[55].mxu1  ;;  %v8683_v6 = vadd.f32 %v4393_v49, %v4259_v51  ;;  %v4440_v27 = vmul.f32 1.442695, %v8692_v39 }
 0xa13   :  { %5574 = vlog2.f32 %v4500_v2  ;;  %v4504_v16 = vadd.f32 1.0, %v4503_v35  ;;  %v8729_v0 = vadd.f32 %v4395_v23, %v4259_v51  ;;  %vm8741_vm14 = vcmp.lt.f32.partialorder %v4506_v47, 0.0004427343 }
 0xa14   :  { %v8685_v57 = vpop.eup %5560  ;;  %5576 = vpow2.f32 %v4428_v44  ;;  %v4454_v59 = vsel %vm8676_vm10, %v4451_v60, %v4448_v37  ;;  %v4442_v58 = vmul.f32 1.442695, %v8683_v6  ;;  %v4461_v49 = vand.u32 2147483647, %v8659_v8 }
 0xa15   :  { %v5563_v33 = vpop.eup %5562  ;;  %v4518_v30 = vadd.f32 1.0, %v8685_v57  ;;  %5578 = vpow2.f32 %v4432_v28  ;;  %v8717_v10 = vsel %vm4398_vm8, %v8618_v48, %v4454_v59  ;;  %v4521_v48 = vmul.f32 -0.5, %v8685_v57 }
 0xa16   :  { %v4466_v9 = vmul.f32 0.6931472, %v5563_v33  ;;  %v8702_v34 = vpop.eup %5564  ;;  %v4524_v61 = vand.u32 2147483647, %v8685_v57  ;;  %v4505_v2 = vmul.f32 %v8666_v29, %v4504_v16  ;;  %v4444_v29 = vmul.f32 1.442695, %v8729_v0 }
 0xa17   :  { %5580 = vlog2.f32 %v4518_v30  ;;  %v4522_v31 = vadd.f32 1.0, %v4521_v48  ;;  %v4476_v13 = vmul.f32 -0.5, %v8702_v34  ;;  %vm8777_vm4 = vcmp.lt.f32.partialorder %v4461_v49, 0.0004427343 }
 0xa18   :  { %v8706_v50 = vpop.eup %5566  ;;  %v4472_v42 = vsel %vm8688_vm11, %v4469_v18, %v4466_v9  ;;  %5582 = vlog2.f32 %v4455_v52  ;;  %vm8755_vm15 = vcmp.lt.f32.partialorder %v4524_v61, 0.0004427343  ;;  %v4479_v48 = vand.u32 2147483647, %v8702_v34 }
 0xa19   :  { %v5569_v12 = vpop.eup %5568  ;;  %v8722_v14 = vsel %vm4400_vm9, %v8621_v3, %v4472_v42  ;;  %v4536_v62 = vadd.f32 1.0, %v8706_v50  ;;  %5584 = vpow2.f32 %v4442_v58  ;;  %v4473_v3 = vadd.f32 1.0, %v8702_v34 }
 0xa1a   :  { %v8725_v54 = vpop.eup %5570  ;;  %v5039_v41 = vpack.c.bf16 %v8722_v14, %v8717_v10  ;;  %v4484_v15 = vmul.f32 0.6931472, %v5569_v12  ;;  %v4539_v51 = vmul.f32 -0.5, %v8706_v50  ;;  %v4542_v60 = vand.u32 2147483647, %v8706_v50 }
 0xa1b   :  { %5586 = vlog2.f32 %v4536_v62  ;;  %v4491_v23 = vadd.f32 1.0, %v8725_v54  ;;  %v4494_v58 = vmul.f32 -0.5, %v8725_v54  ;;  %vm4403_vm8 = vcmp.gt.f32.partialorder %v8642_v24, 20.0 }
 0xa1c   :  { %v8734_v44 = vpop.eup %5572  ;;  %5588 = vpow2.f32 %v4436_v56  ;;  %v4490_v25 = vsel %vm8737_vm13, %v4487_v32, %v4484_v15  ;;  %v4540_v40 = vadd.f32 1.0, %v4539_v51  ;;  %vm8791_vm7 = vcmp.lt.f32.partialorder %v4542_v60, 0.0004427343 }
 0xa1d   :  { %v5575_v7 = vpop.eup %5574  ;;  %v4554_v28 = vadd.f32 1.0, %v8734_v44  ;;  %5590 = vpow2.f32 %v4440_v27  ;;  %v8770_v35 = vsel %vm4402_vm0, %v8626_v1, %v4490_v25  ;;  %v4523_v1 = vmul.f32 %v8685_v57, %v4522_v31 }
 0xa1e   :  { %v8748_v52 = vpop.eup %5576  ;;  %v4502_v21 = vmul.f32 0.6931472, %v5575_v7  ;;  %5592 = vlog2.f32 %v4473_v3  ;;  %v4477_v27 = vadd.f32 1.0, %v4476_v13  ;;  %v4460_v57 = vmul.f32 %v8659_v8, %v8696_v63 }
 0xa1f   :  { %v8753_v37 = vpop.eup %5578  ;;  %5594 = vlog2.f32 %v4554_v28  ;;  %v4509_v56 = vadd.f32 1.0, %v8748_v52  ;;  %v4541_v11 = vmul.f32 %v8706_v50, %v4540_v40  ;;  %v4560_v4 = vand.u32 2147483647, %v8734_v44 }
 0xa20   :  { %v4508_v45 = vsel %vm8741_vm14, %v4505_v2, %v4502_v21  ;;  %5596 = vlog2.f32 %v4491_v23  ;;  %v4527_v12 = vadd.f32 1.0, %v8753_v37  ;;  %v4495_v28 = vadd.f32 1.0, %v4494_v58 }
 0xa21   :  { %v5581_v33 = vpop.eup %5580  ;;  %v8775_v30 = vsel %vm4404_vm12, %v8630_v46, %v4508_v45  ;;  %v4557_v46 = vmul.f32 -0.5, %v8734_v44  ;;  %5598 = vpow2.f32 %v4444_v29  ;;  %v4512_v49 = vmul.f32 -0.5, %v8748_v52 }
 0xa22   :  { %v5583_v9 = vpop.eup %5582  ;;  %v5043_v18 = vpack.c.bf16 %v8775_v30, %v8770_v35  ;;  %v4520_v38 = vmul.f32 0.6931472, %v5581_v33  ;;  %5600 = vlog2.f32 %v4509_v56  ;;  %v4478_v21 = vmul.f32 %v8702_v34, %v4477_v27 }
 0xa23   :  { %v8789_v42 = vpop.eup %5584  ;;  %v4457_v15 = vmul.f32 0.6931472, %v5583_v9  ;;  %v4558_v2 = vadd.f32 1.0, %v4557_v46  ;;  %vm4405_vm9 = vcmp.gt.f32.partialorder %v8649_v55, 20.0  ;;  %vm4480_vm10 = vcmp.lt.f32.partialorder %v4479_v48, 0.0004427343 }
 0xa24   :  { %v4572_v62 = vadd.f32 1.0, %v8789_v42  ;;  %v4526_v3 = vsel %vm8755_vm15, %v4523_v1, %v4520_v38  ;;  %v4575_v25 = vmul.f32 -0.5, %v8789_v42  ;;  %v4497_v23 = vand.u32 2147483647, %v8725_v54 }
 0xa25   :  { %v5587_v16 = vpop.eup %5586  ;;  %v8818_v50 = vsel %vm4406_vm1, %v8638_v5, %v4526_v3  ;;  %v4463_v31 = vsel %vm8777_vm4, %v4460_v57, %v4457_v15  ;;  %v4496_v13 = vmul.f32 %v8725_v54, %v4495_v28  ;;  %v4513_v33 = vadd.f32 1.0, %v4512_v49 }
 0xa26   :  { %v8800_v61 = vpop.eup %5588  ;;  %v4538_v32 = vmul.f32 0.6931472, %v5587_v16  ;;  %5602 = vlog2.f32 %v4572_v62  ;;  %vm4410_vm11 = vcmp.gt.f32.partialorder %v8663_v26, 20.0  ;;  %v4576_v59 = vadd.f32 1.0, %v4575_v25 }
 0xa27   :  { %v8806_v7 = vpop.eup %5590  ;;  %5604 = vlog2.f32 %v4527_v12  ;;  %v4545_v45 = vadd.f32 1.0, %v8800_v61  ;;  %v4591_v9 = vsel %vm4399_vm5, %v8623_v22, %v4463_v31  ;;  %v4530_v54 = vmul.f32 -0.5, %v8753_v37 }
 0xa28   :  { %v5593_v8 = vpop.eup %5592  ;;  %v4544_v63 = vsel %vm8791_vm7, %v4541_v11, %v4538_v32  ;;  %v4559_v47 = vmul.f32 %v8734_v44, %v4558_v2  ;;  %vm8844_vm0 = vcmp.lt.f32.partialorder %v4560_v4, 0.0004427343  ;;  %vm8848_vm12 = vcmp.lt.f32.partialorder %v4497_v23, 0.0004427343 }
 0xa29   :  { %v8823_v51 = vsel %vm4408_vm2, %v8647_v43, %v4544_v63  ;;  %v4475_v36 = vmul.f32 0.6931472, %v5593_v8  ;;  %v5595_v34 = vpop.eup %5594  ;;  %v4515_v43 = vand.u32 2147483647, %v8748_v52  ;;  %5606 = vlog2.f32 %v4545_v45 }
 0xa2a   :  { %v5047_v29 = vpack.c.bf16 %v8823_v51, %v8818_v50  ;;  %v5597_v5 = vpop.eup %5596  ;;  %v4556_v1 = vmul.f32 0.6931472, %v5595_v34  ;;  %v4578_v12 = vand.u32 2147483647, %v8789_v42  ;;  %v4514_v15 = vmul.f32 %v8748_v52, %v4513_v33  ;;  %v4607_v50 = vld [vmem:[%s8932_s11 + $0x8] sm:$0x1] }
 0xa2b   :  { %v4481_v60 = vsel %vm4480_vm10, %v4478_v21, %v4475_v36  ;;  %v4493_v40 = vmul.f32 0.6931472, %v5597_v5  ;;  %v8840_v56 = vpop.eup %5598  ;;  %vm4516_vm13 = vcmp.lt.f32.partialorder %v4515_v43, 0.0004427343  ;;  %v4548_v44 = vmul.f32 -0.5, %v8800_v61 }
 0xa2c   :  { %v4593_v38 = vsel %vm4401_vm6, %v8636_v19, %v4481_v60  ;;  %v5601_v58 = vpop.eup %5600  ;;  %v4563_v19 = vadd.f32 1.0, %v8806_v7  ;;  %v4581_v57 = vadd.f32 1.0, %v8840_v56  ;;  %v4562_v3 = vsel %vm8844_vm0, %v4559_v47, %v4556_v1 }
 0xa2d   :  { %v5037_v46 = vpack.c.bf16 %v4593_v38, %v4591_v9  ;;  %v4499_v16 = vsel %vm8848_vm12, %v4496_v13, %v4493_v40  ;;  %v4511_v62 = vmul.f32 0.6931472, %v5601_v58  ;;  %v4577_v32 = vmul.f32 %v8789_v42, %v4576_v59 }
 0xa2e   :  { %5608 = vlog2.f32 %v4563_v19  ;;  %v4531_v4 = vadd.f32 1.0, %v4530_v54  ;;  %v4595_v10 = vsel %vm4403_vm8, %v8642_v24, %v4499_v16  ;;  %vm4579_vm14 = vcmp.lt.f32.partialorder %v4578_v12, 0.0004427343  ;;  %v4618_v54 = vpop.permute.xlu0 %4617 }
 0xa2f   :  { %5038 = vmatprep.subr.bf16.mxu0 %v5037_v46  ;;  %v4517_v11 = vsel %vm4516_vm13, %v4514_v15, %v4511_v62  ;;  %5610 = vlog2.f32 %v4581_v57  ;;  %v4533_v28 = vand.u32 2147483647, %v8753_v37  ;;  %v4566_v49 = vmul.f32 -0.5, %v8806_v7 }
 0xa30   :  { %5040 = vmatpush1.bf16.msra.mxu0 %v5039_v41  ;;  %v5603_v48 = vpop.eup %5602  ;;  %v4597_v14 = vsel %vm4405_vm9, %v8649_v55, %v4517_v11  ;;  %vm4412_vm15 = vcmp.gt.f32.partialorder %v8683_v6, 20.0  ;;  %v4549_v63 = vadd.f32 1.0, %v4548_v44  ;;  %v4602_v24 = vsel %vm4410_vm11, %v8663_v26, %v4562_v3 }
 0xa31   :  { %v5605_v2 = vpop.eup %5604  ;;  %v4574_v52 = vmul.f32 0.6931472, %v5603_v48  ;;  %v5041_v41 = vpack.c.bf16 %v4597_v14, %v4595_v10  ;;  %v4551_v55 = vand.u32 2147483647, %v8800_v61  ;;  %v4584_v21 = vmul.f32 -0.5, %v8840_v56 }
 0xa32   :  { %v4529_v8 = vmul.f32 0.6931472, %v5605_v2  ;;  %v4532_v36 = vmul.f32 %v8753_v37, %v4531_v4  ;;  %vm4534_vm1 = vcmp.lt.f32.partialorder %v4533_v28, 0.0004427343  ;;  %v4567_v23 = vadd.f32 1.0, %v4566_v49 }
 0xa33   :  { %v4580_v42 = vsel %vm4579_vm14, %v4577_v32, %v4574_v52  ;;  %5042 = vmatprep.subr.bf16.mxu0 %v5041_v41  ;;  %v5607_v34 = vpop.eup %5606  ;;  %v4550_v26 = vmul.f32 %v8800_v61, %v4549_v63  ;;  %vm4552_vm2 = vcmp.lt.f32.partialorder %v4551_v55, 0.0004427343  ;;  %v4585_v60 = vadd.f32 1.0, %v4584_v21 }
 0xa34   :  { %v4604_v25 = vsel %vm4412_vm15, %v8683_v6, %v4580_v42  ;;  %5044 = vmatpush1.bf16.msra.mxu0 %v5043_v18  ;;  %v4535_v45 = vsel %vm4534_vm1, %v4532_v36, %v4529_v8  ;;  %v4547_v5 = vmul.f32 0.6931472, %v5607_v34  ;;  %v4569_v6 = vand.u32 2147483647, %v8806_v7 }
 0xa35   :  { %v5051_v31 = vpack.c.bf16 %v4604_v25, %v4602_v24  ;;  %vm4407_vm4 = vcmp.gt.f32.partialorder %v8657_v20, 20.0  ;;  %vm4409_vm5 = vcmp.gt.f32.partialorder %v8681_v17, 20.0  ;;  %v4587_v30 = vand.u32 2147483647, %v8840_v56 }
 0xa36   :  { %v4553_v35 = vsel %vm4552_vm2, %v4550_v26, %v4547_v5  ;;  %v4599_v37 = vsel %vm4407_vm4, %v8657_v20, %v4535_v45  ;;  %v4568_v43 = vmul.f32 %v8806_v7, %v4567_v23  ;;  %vm4570_vm6 = vcmp.lt.f32.partialorder %v4569_v6, 0.0004427343 }
 0xa37   :  { %v4601_v18 = vsel %vm4409_vm5, %v8681_v17, %v4553_v35  ;;  %v4586_v40 = vmul.f32 %v8840_v56, %v4585_v60  ;;  %vm4588_vm7 = vcmp.lt.f32.partialorder %v4587_v30, 0.0004427343  ;;  %vm4411_vm8 = vcmp.gt.f32.partialorder %v8692_v39, 20.0  ;;  %v4606_v56 = vld [vmem:[%s8932_s11] sm:$0xff]  ;;  %s5614_s11 = scalar_lea.vmem %s4713_s21, 512 }
 0xa38   :  { %v5609_v13 = vpop.eup %5608  ;;  %v5045_v59 = vpack.c.bf16 %v4601_v18, %v4599_v37  ;;  %vm4413_vm9 = vcmp.gt.f32.partialorder %v8729_v0, 20.0  ;;  %p5615_p0 = scmp.ne.s32.totalorder %s4713_s21, %s5614_s11  ;;  %p5620_p2 = scmp.lt.s32.totalorder %s5614_s11, %s5614_s11 }
 0xa39   :  { %v4565_v33 = vmul.f32 0.6931472, %v5609_v13  ;;  %v5611_v61 = vpop.eup %5610 }
 0xa3a   :  { %v4583_v38 = vmul.f32 0.6931472, %v5611_v61  ;;  %5046 = vmatprep.subr.bf16.mxu0 %v5045_v59  ;;  %p5621_p3 = por %p5620_p2, %p5619_p1 }
 0xa3b   :  { %v4571_v9 = vsel %vm4570_vm6, %v4568_v43, %v4565_v33  ;;  %5048 = vmatpush1.bf16.msra.mxu0 %v5047_v29 }
 0xa3c   :  { %v4589_v20 = vsel %vm4588_vm7, %v4586_v40, %v4583_v38  ;;  %v4603_v17 = vsel %vm4411_vm8, %v8692_v39, %v4571_v9  ;;  %v4613_v39 = vpop.permute.xlu1 %4612  ;;  %p5622_p4 = pnand %p5621_p3, %p5615_p0 }
 0xa3d   :  { %v4605_v7 = vsel %vm4413_vm9, %v8729_v0, %v4589_v20 }
 0xa3e   :  { %v5049_v1 = vpack.c.bf16 %v4605_v7, %v4603_v17 }
 0xa40   :  { %5050 = vmatprep.subr.bf16.mxu0 %v5049_v1 }
 0xa41   :  { %5052 = vmatpush1.bf16.msra.mxu0 %v5051_v31 }
 0xa44   :  { %4905 = vmatmul.mubr.msk.f32.vlgmr.msra.gmra.mrb[64].mxu0 %vm1845_vm3, %v4606_v56 }
 0xa45   :  { %4696 = vmatprep.mubr.f32.mxu0 %v5645_v53 }
 0xa48   :  { %4906 = vmatmul.mubr.msk.f32.gmra.mrb[66].mxu0 %vm1845_vm3, %v4607_v50 }
 0xb17   :  { %v4692_v51 = vpop.f32.mrb[64].mxu0 }
 0xb18   :  { %v4693_v0 = vadd.f32 %v4692_v51, %v4613_v39  ;;  %v4694_v29 = vpop.f32.mrb[65].mxu0 }
 0xb19   :  { %v4695_v46 = vadd.f32 %v4694_v29, %v4613_v39 }
 0xb1a   :  { %4703 = vst [vmem:[#allocation3] sm:$0xff] %v4693_v0 }
 0xb1b   :  { %4704 = vst [vmem:[#allocation3 + $0x8] sm:$0xff] %v4695_v46  ;;  %v4698_v58 = vpop.f32.mrb[66].mxu0 }
 0xb1c   :  { %v4699_v47 = vadd.f32 %v4698_v58, %v4618_v54  ;;  %v4700_v27 = vpop.f32.mrb[67].mxu0 }
 0xb1d   :  { %v4701_v53 = vadd.f32 %v4700_v27, %v4618_v54 }
 0xb1e   :  { %4705 = vst [vmem:[#allocation3 + $0x10] sm:$0x1] %v4699_v47 }
 0xb1f   :  { %4706 = vst [vmem:[#allocation3 + $0x18] sm:$0x1] %v4701_v53 }
 0xb20   :  { %5625 = shalt.err (!%p5622_p4)
}
 0xb21   :  { %s5626_s6 = scalar_lea.hbm %s8934_s13, 512 }
 0xb22   :  { %p5627_p5 = scmp.ne.s32.totalorder %s8934_s13, %s5626_s6  ;;  %p5630_p6 = scmp.lt.u32.totalorder %s5626_s6, %s8934_s13 }
 0xb24   :  { %p5632_p7 = pnand %p5630_p6, %p5627_p5 }
 0xb26   :  { %5635 = shalt.err (!%p5632_p7)
}
 0xb27   :  { %s5648_s3 = smov 256   ;;  %s5649_s26 = smov 16  }
 0xb28   :  { %4718 = dma.vmem_to_hbm [thread:$0]  %s4713_s21, 512, %s8934_s13, [#allocation4], %s5648_s3, %s5648_s3, %s5649_s26  }
 0xb29   :  { %5636 = dma.done.wait [#allocation4], 512  }
 0xb2a   :  { %5637 = vsyncadd [#allocation4], 4294966784 }
 0xb2b   :  { %4722 = vsyncpa [#allocation4], 1 }

</bundles_post_ra>
